<compile_context>
chip_gen: v7x
topology: tpu7x:2x2x1
jax: 0.10.0
libtpu: 0.0.40
codegen_flags: <defaults>
</compile_context>

<pallas_src>
import functools

import jax
import jax.numpy as jnp
from jax import lax
from jax.experimental import pallas as pl
from jax.experimental.pallas import tpu as pltpu


def adj_generator_kernel(ctx_row_ref, ctx_all_ref, w_flat_ref, s_ref, adj_ref,
                         *, n_per):
    w_flat = w_flat_ref[...]                       # (1, K) f32
    s_blk = s_ref[...]                             # (K, K) block-diagonal ones

    def l2_normalize_flat(ctx_tiled):
        # ctx_tiled[m, p*D+d] = x[m, d]; scaling by w_flat gives w[p,d]*x[m,d].
        # The per-(m, p) squared norm is a block-sum over the D lanes of block
        # p, computed (and broadcast back over those lanes) by one MXU matmul
        # against the block-diagonal ones mask — no reshape / repeat needed.
        scaled = ctx_tiled * w_flat                # (M, K)
        sq = lax.dot_general(
            scaled * scaled, s_blk,
            dimension_numbers=(((1,), (0,)), ((), ())),
            preferred_element_type=jnp.float32)    # (M, K)
        denom = jnp.maximum(jnp.sqrt(sq), 1e-12)   # F.normalize eps (exact path
        return scaled / denom                      # keeps the 1e-5 tolerance)

    flat_row = l2_normalize_flat(ctx_row_ref[...].astype(jnp.float32))  # (tm, K)
    flat_all = l2_normalize_flat(ctx_all_ref[...].astype(jnp.float32))  # (N,  K)

    # Gram over the fused K = n_per*in_dim axis; transpose folded into the
    # contraction (no .T relayout), f32 accumulation on the MXU.
    gram = lax.dot_general(
        flat_row, flat_all,
        dimension_numbers=(((1,), (1,)), ((), ())),
        preferred_element_type=jnp.float32)        # (tm, N)

    att = jnp.maximum(gram * (1.0 / n_per), 0.0)   # mean over P + relu mask
    row_sum = jnp.maximum(jnp.sum(att, axis=-1, keepdims=True), 1e-12)
    adj_ref[...] = (att / row_sum).astype(adj_ref.dtype)


def adj_generator(context, weight, *, row_tile=None):
    """context: (N, in_dim) f32, weight: (n_per, in_dim) f32 -> adj (N, N) f32."""
    n, d = context.shape
    n_per, d_w = weight.shape
    assert d == d_w
    k = n_per * d

    # Row-tile choice: lane-dense (full N columns) output slabs; >=2 tiles when
    # possible so the "parallel" axis can shard across v7x TensorCores.
    if row_tile is None:
        if n >= 512:
            row_tile = 256
        elif n % 16 == 0:
            row_tile = n // 2
        else:
            row_tile = n
    assert n % row_tile == 0

    # Wrapper-side layout plumbing (no compute hoisting):
    ctx_tiled = jnp.tile(context.astype(jnp.float32), (1, n_per))       # (N, K)
    w_flat = weight.astype(jnp.float32).reshape(1, k)                   # (1, K)
    blk = jnp.arange(k, dtype=jnp.int32) // d
    s_mask = (blk[:, None] == blk[None, :]).astype(jnp.float32)         # (K, K)

    kernel = functools.partial(adj_generator_kernel, n_per=n_per)

    return pl.pallas_call(
        kernel,
        out_shape=jax.ShapeDtypeStruct((n, n), jnp.float32),
        grid_spec=pltpu.PrefetchScalarGridSpec(
            num_scalar_prefetch=0,
            grid=(n // row_tile,),
            in_specs=[
                pl.BlockSpec((row_tile, k), lambda i: (i, 0)),   # row tile of ctx_tiled
                pl.BlockSpec((n, k), lambda i: (0, 0)),          # full ctx_tiled (column side)
                pl.BlockSpec((1, k), lambda i: (0, 0)),          # flattened weight
                pl.BlockSpec((k, k), lambda i: (0, 0)),          # block-diagonal ones mask
            ],
            out_specs=pl.BlockSpec((row_tile, n), lambda i: (i, 0)),
        ),
        compiler_params=pltpu.CompilerParams(
            dimension_semantics=("parallel",),
        ),
    )(ctx_tiled, ctx_tiled, w_flat, s_mask)


def adj_generator_ref(context, weight):
    """Pure-JAX reference mirroring the PyTorch forward."""
    ctx_fc = weight[:, None, :] * context[None, :, :]                   # (P, N, D)
    norm = jnp.sqrt(jnp.sum(ctx_fc * ctx_fc, axis=-1, keepdims=True))
    ctx_norm = ctx_fc / jnp.maximum(norm, 1e-12)
    att = jnp.einsum("pnd,pmd->nm", ctx_norm, ctx_norm) / weight.shape[0]
    mask = (att > 0).astype(jnp.float32)
    att = att * mask
    return att / jnp.clip(jnp.sum(att, axis=-1, keepdims=True), 1e-12)


def xavier_uniform(key, shape, dtype=jnp.float32):
    fan_out, fan_in = shape  # 2D tensor: fan_in = dim 1, fan_out = dim 0
    bound = jnp.sqrt(6.0 / (fan_in + fan_out))
    return jax.random.uniform(key, shape, dtype, minval=-bound, maxval=bound)


if __name__ == "__main__":
    # N=128 keeps the output lane-dense (128-wide stores) while staying small.
    N, IN_DIM, N_PER = 128, 32, 16

    key = jax.random.PRNGKey(0)
    k_ctx, k_w = jax.random.split(key)
    context = jax.random.normal(k_ctx, (N, IN_DIM), dtype=jnp.float32)
    weight = xavier_uniform(k_w, (N_PER, IN_DIM))  # nn.init.xavier_uniform_

    adj = jax.block_until_ready(adj_generator(context, weight))

    ref = adj_generator_ref(context, weight)
    assert adj.shape == (N, N)
    assert jnp.allclose(adj, ref, atol=1e-5, rtol=1e-5), "mismatch vs reference"

    print("KERNEL_OK")
</pallas_src>

<mosaic_0001>
module attributes {stable_mosaic.version = 11 : i64} {
  func.func @adj_generator_kernel(%arg0: i32, %arg1: memref<64x512xf32, #tpu.memory_space<vmem>>, %arg2: memref<128x512xf32, #tpu.memory_space<vmem>>, %arg3: memref<1x512xf32, #tpu.memory_space<vmem>>, %arg4: memref<512x512xf32, #tpu.memory_space<vmem>>, %arg5: memref<64x128xf32, #tpu.memory_space<vmem>>) attributes {dimension_semantics = [#tpu.dimension_semantics<parallel>], iteration_bounds = array<i64: 2>, scalar_prefetch = 0 : i64, scratch_operands = 0 : i64, tpu.core_type = #tpu.core_type<tc>, window_params = [{transform_indices = @transform_0, window_bounds = array<i64: 64, 512>}, {pipeline_mode = #tpu.pipeline_mode<synchronous>, transform_indices = @transform_1, window_bounds = array<i64: 128, 512>}, {pipeline_mode = #tpu.pipeline_mode<synchronous>, transform_indices = @transform_2, window_bounds = array<i64: 1, 512>}, {pipeline_mode = #tpu.pipeline_mode<synchronous>, transform_indices = @transform_3, window_bounds = array<i64: 512, 512>}, {transform_indices = @transform_4, window_bounds = array<i64: 64, 128>}]} {
    %c0 = arith.constant 0 : index
    %c0_0 = arith.constant 0 : index
    %0 = vector.load %arg3[%c0, %c0_0] : memref<1x512xf32, #tpu.memory_space<vmem>>, vector<1x512xf32>
    %c0_1 = arith.constant 0 : index
    %c0_2 = arith.constant 0 : index
    %1 = vector.load %arg4[%c0_1, %c0_2] : memref<512x512xf32, #tpu.memory_space<vmem>>, vector<512x512xf32>
    %c0_3 = arith.constant 0 : index
    %c0_4 = arith.constant 0 : index
    %2 = vector.load %arg1[%c0_3, %c0_4] : memref<64x512xf32, #tpu.memory_space<vmem>>, vector<64x512xf32>
    %3 = vector.broadcast %0 : vector<1x512xf32> to vector<64x512xf32>
    %4 = arith.mulf %2, %3 : vector<64x512xf32>
    %5 = arith.mulf %4, %4 : vector<64x512xf32>
    %cst = arith.constant dense<0.000000e+00> : vector<64x512xf32>
    %6 = tpu.matmul %5, %1, %cst {dimension_numbers = #tpu.dot_dimension_numbers<[1], [0], [0], [1], [0, 0, 1, 1], [], []>} : vector<64x512xf32>, vector<512x512xf32>, vector<64x512xf32> -> vector<64x512xf32>
    %7 = math.sqrt %6 : vector<64x512xf32>
    %cst_5 = arith.constant 9.99999996E-13 : f32
    %8 = vector.broadcast %cst_5 : f32 to vector<64x512xf32>
    %9 = arith.maximumf %7, %8 : vector<64x512xf32>
    %10 = arith.divf %4, %9 : vector<64x512xf32>
    %c0_6 = arith.constant 0 : index
    %c0_7 = arith.constant 0 : index
    %11 = vector.load %arg2[%c0_6, %c0_7] : memref<128x512xf32, #tpu.memory_space<vmem>>, vector<128x512xf32>
    %12 = vector.broadcast %0 : vector<1x512xf32> to vector<128x512xf32>
    %13 = arith.mulf %11, %12 : vector<128x512xf32>
    %14 = arith.mulf %13, %13 : vector<128x512xf32>
    %cst_8 = arith.constant dense<0.000000e+00> : vector<128x512xf32>
    %15 = tpu.matmul %14, %1, %cst_8 {dimension_numbers = #tpu.dot_dimension_numbers<[1], [0], [0], [1], [0, 0, 1, 1], [], []>} : vector<128x512xf32>, vector<512x512xf32>, vector<128x512xf32> -> vector<128x512xf32>
    %16 = math.sqrt %15 : vector<128x512xf32>
    %cst_9 = arith.constant 9.99999996E-13 : f32
    %17 = vector.broadcast %cst_9 : f32 to vector<128x512xf32>
    %18 = arith.maximumf %16, %17 : vector<128x512xf32>
    %19 = arith.divf %13, %18 : vector<128x512xf32>
    %cst_10 = arith.constant dense<0.000000e+00> : vector<64x128xf32>
    %20 = tpu.matmul %10, %19, %cst_10 {dimension_numbers = #tpu.dot_dimension_numbers<[1], [1], [0], [0], [0, 0, 1, 0], [], []>} : vector<64x512xf32>, vector<128x512xf32>, vector<64x128xf32> -> vector<64x128xf32>
    %cst_11 = arith.constant 6.250000e-02 : f32
    %21 = vector.broadcast %cst_11 : f32 to vector<64x128xf32>
    %22 = arith.mulf %20, %21 : vector<64x128xf32>
    %cst_12 = arith.constant 0.000000e+00 : f32
    %23 = vector.broadcast %cst_12 : f32 to vector<64x128xf32>
    %24 = arith.maximumf %22, %23 : vector<64x128xf32>
    %cst_13 = arith.constant dense<0.000000e+00> : vector<64xf32>
    %25 = vector.multi_reduction <add>, %24, %cst_13 [1] : vector<64x128xf32> to vector<64xf32>
    %26 = vector.shape_cast %25 : vector<64xf32> to vector<64x1xf32>
    %cst_14 = arith.constant 9.99999996E-13 : f32
    %27 = vector.broadcast %cst_14 : f32 to vector<64x1xf32>
    %28 = arith.maximumf %26, %27 : vector<64x1xf32>
    %29 = vector.broadcast %28 : vector<64x1xf32> to vector<64x128xf32>
    %30 = arith.divf %24, %29 : vector<64x128xf32>
    %c0_15 = arith.constant 0 : index
    %c0_16 = arith.constant 0 : index
    %31 = vector.load %arg5[%c0_15, %c0_16] : memref<64x128xf32, #tpu.memory_space<vmem>>, vector<64x128xf32>
    tpu.vector_store %arg5[%c0_15, %c0_16], %30 {strides = array<i32>} : memref<64x128xf32, #tpu.memory_space<vmem>>, vector<64x128xf32>,
    return
  }
  func.func @transform_0(%arg0: i32) -> (i32, i32) {
    %c0_i32 = arith.constant 0 : i32
    %c0_i32_0 = arith.constant 0 : i32
    return %arg0, %c0_i32 : i32, i32
  }
  func.func @transform_1(%arg0: i32) -> (i32, i32) {
    %c0_i32 = arith.constant 0 : i32
    %c0_i32_0 = arith.constant 0 : i32
    %c0_i32_1 = arith.constant 0 : i32
    return %c0_i32, %c0_i32_0 : i32, i32
  }
  func.func @transform_2(%arg0: i32) -> (i32, i32) {
    %c0_i32 = arith.constant 0 : i32
    %c0_i32_0 = arith.constant 0 : i32
    %c0_i32_1 = arith.constant 0 : i32
    return %c0_i32, %c0_i32_0 : i32, i32
  }
  func.func @transform_3(%arg0: i32) -> (i32, i32) {
    %c0_i32 = arith.constant 0 : i32
    %c0_i32_0 = arith.constant 0 : i32
    %c0_i32_1 = arith.constant 0 : i32
    return %c0_i32, %c0_i32_0 : i32, i32
  }
  func.func @transform_4(%arg0: i32) -> (i32, i32) {
    %c0_i32 = arith.constant 0 : i32
    %c0_i32_0 = arith.constant 0 : i32
    return %arg0, %c0_i32 : i32, i32
  }
}

</mosaic_0001>

<bundles_post_ra>
// kernel: tpu_custom_call.1
= control target key start
LH: loop header
LB: loop body
LE: loop exit
PB: predicated region body
PF: predicated region fallthrough
CT: control target
= control target key end

     0   :  { %9 = vsyncpa [#allocation3], 0  ;;  %s7509_s0 = inlined_call_operand.hbm [shape: f32[128,512], index: 0, kind: input, shape index: {}]   ;;  %s7510_s1 = inlined_call_operand.hbm [shape: f32[128,512], index: 1, kind: input, shape index: {}]   ;;  %s7511_s2 = inlined_call_operand.vmem [shape: f32[1,512], index: 2, kind: input, shape index: {}]   ;;  %s7512_s3 = inlined_call_operand.hbm [shape: f32[512,512], index: 3, kind: input, shape index: {}]   ;;  %s7513_s4 = inlined_call_operand.hbm [shape: f32[128,128], index: 4, kind: output, shape index: {}]  }
   0x1   :  { %11 = vsyncpa [#allocation3 + $0x1], 0 }
   0x2   :  { %12 = vsyncpa [#allocation6], 0 }
   0x3   :  { %13 = vsyncpa [#allocation4], 0 }
   0x4   :  { %15 = vsyncpa [#allocation4 + $0x1], 0  ;;  %s4614_s15 = smov 0   ;;  %s4616_s16 = smov 0  }
   0x5   :  { %s4618_s17 = smov 0   ;;  %s4620_s18 = smov 0  }
   0x6 LB: > { %s4635_s19 = sadd.s32 4294967295, %s4579_s18   ;;  %s3250_s20 = sadd.s32 4294967294, %s4579_s18   ;;  %s4579_s18 = sphi %s4620_s18, %s8214_s18   ;;  %s4575_s17 = sphi %s4618_s17, %s8213_s17   ;;  %s4571_s16 = sphi %s4616_s16, %s8212_s16   ;;  %s4567_s15 = sphi %s4614_s15, %s8211_s15  }
   0x7   : > { %p41_p0 = scmp.ne.s32.totalorder %s4571_s16, %s4567_s15  ;;  %p7514_p1 = scmp.eq.s32.totalorder %s4635_s19, 0 }
   0x8   : > { %p134_p3 = scmp.eq.s32.totalorder %s3250_s20, 1  ;;  %p3251_p5 = scmp.ge.s32.totalorder %s4579_s18, 1 }
   0x9   : > { %p4644_p4 = por %p7514_p1, %p41_p0  ;;  %p141_p7 = scmp.lt.s32.totalorder %s4579_s18, 3 }
   0xa   : > { %p4649_p6 = por %p134_p3, %p41_p0  ;;  %s4581_s24 = smov [#allocation5]  }
   0xb   : > { %s7716_s21 = scalar_select %p4644_p4, 1, 0 }
   0xc   : > { %s7717_s22 = scalar_select %p4649_p6, 1, 0 }
   0xd   : > { %p4654_p8 = pnand %p3251_p5, %p141_p7  ;;  %s153_s25 = sshll.u32 %s4581_s24, 4  ;;  %s4658_s25 = int_to_ptr.vmem [resolvable:$true] %s153_s25 }
   0xe   : > { %s4582_s27 = smov [#allocation7]   ;;  %s4423_s5 = scalar_lea.hbm %s7510_s1, 8192 }
   0xf   : > { %p3964_p9 = pneg %p4654_p8  ;;  %s169_s28 = sshll.u32 %s4582_s27, 4  ;;  %s4669_s28 = int_to_ptr.vmem [resolvable:$true] %s169_s28 }
  0x10   : > { %p4424_p12 = scmp.ne.s32.totalorder %s7510_s1, %s4423_s5  ;;  %p4430_p5 = scmp.lt.u32.totalorder %s4423_s5, %s7510_s1 }
  0x11   : > { %p4665_p11 = pnand %p3964_p9, %p7514_p1 }
  0x13   : > { %p4425_p13 = pneg %p4665_p11 }
  0x15   : > { %p4426_p0 = pnand %p4425_p13, %p4424_p12 }
  0x17   : > { %p4427_p3 = pneg %p4426_p0 }
  0x19   : > { %p4432_p7 = pnand %p4430_p5, %p4427_p3 }
  0x1b   : > { %4435 = shalt.err (!%p4432_p7)
}
  0x1c   : > { %s4436_s10 = scalar_lea.vmem %s4658_s25, 8192  ;;  %p4444_p2 = scmp.lt.s32.totalorder %s4658_s25, %s4658_s25 }
  0x1d   : > { %p4437_p9 = scmp.ne.s32.totalorder %s4658_s25, %s4436_s10  ;;  %p4445_p12 = scmp.lt.s32.totalorder %s4436_s10, %s4436_s10 }
  0x1f   : > { %p4439_p10 = pnand %p4437_p9, %p4425_p13  ;;  %p4446_p0 = por %p4445_p12, %p4444_p2 }
  0x21   : > { %p4440_p1 = pneg %p4439_p10 }
  0x23   : > { %p4447_p6 = pnand %p4446_p0, %p4440_p1 }
  0x25   : > { %4450 = shalt.err (!%p4447_p6)
}
  0x26   : > { %s4583_s11 = smov 512   ;;  %s4584_s12 = smov 32  }
  0x27   : > { %3967 = dma.hbm_to_vmem [thread:$0]  (!%p4665_p11), %s7510_s1, 8192, %s4658_s25, [#allocation6], %s4583_s11, %s4583_s11, %s4584_s12  }
  0x28   : > { %s4451_s27 = scalar_lea.hbm %s7512_s3, 32768 }
  0x29   : > { %p4452_p1 = scmp.ne.s32.totalorder %s7512_s3, %s4451_s27  ;;  %p4458_p10 = scmp.lt.u32.totalorder %s4451_s27, %s7512_s3 }
  0x2b   : > { %p4454_p2 = pnand %p4452_p1, %p4425_p13 }
  0x2d   : > { %p4455_p6 = pneg %p4454_p2 }
  0x2f   : > { %p4460_p3 = pnand %p4458_p10, %p4455_p6 }
  0x31   : > { %4463 = shalt.err (!%p4460_p3)
}
  0x32   : > { %s4464_s25 = scalar_lea.vmem %s4669_s28, 32768  ;;  %p4472_p12 = scmp.lt.s32.totalorder %s4669_s28, %s4669_s28 }
  0x33   : > { %p4465_p5 = scmp.ne.s32.totalorder %s4669_s28, %s4464_s25  ;;  %p4473_p0 = scmp.lt.s32.totalorder %s4464_s25, %s4464_s25 }
  0x35   : > { %p4467_p7 = pnand %p4465_p5, %p4425_p13  ;;  %p4474_p1 = por %p4473_p0, %p4472_p12 }
  0x37   : > { %p4468_p9 = pneg %p4467_p7 }
  0x39   : > { %p4475_p2 = pnand %p4474_p1, %p4468_p9 }
  0x3b   : > { %4478 = shalt.err (!%p4475_p2)
}
  0x3c   : > { %3970 = dma.hbm_to_vmem [thread:$0]  (!%p4665_p11), %s7512_s3, 32768, %s4669_s28, [#allocation6], %s4583_s11, %s4583_s11, %s4584_s12  }
  0x3d   : > { %s4730_s26 = sadd.s32 1, %s4579_s18   ;;  %s28_s9 = sadd.s32 1, %s4575_s17 }
  0x3e   : > { %s25_s10 = ssub.s32 %s4579_s18, %s4730_s26  ;;  %p35_p13 = scmp.ne.s32.totalorder %s4575_s17, %s4571_s16 }
  0x3f   : > { %p26_p6 = scmp.eq.s32.totalorder %s25_s10, 0  ;;  %p36_p10 = scmp.eq.s32.totalorder %s4579_s18, 0 }
  0x40   : > { %p7720_p3 = scmp.eq.s32.totalorder %s4635_s19, 1  ;;  %p3981_p7 = scmp.lt.s32.totalorder %s4579_s18, 2 }
  0x41   : > { %s4746_s14 = scalar_select %p26_p6, %s4575_s17, %s28_s9  }
  0x42   : > { %p4740_p5 = por %p7720_p3, %p35_p13  ;;  %p37_p9 = por %p36_p10, %p35_p13 }
  0x43   : > { %s183_s20 = sand.u32 1, %s4575_s17   ;;  %s3270_s28 = sshll.u32 %s4579_s18, 12 }
  0x44   : > { %s7721_s13 = scalar_select %p4740_p5, 1, 0 }
  0x45   : > { %s3255_s24 = sshll.u32 %s183_s20, 8  ;;  %s4753_s30 = scalar_lea.hbm %s7509_s0, %s3270_s28 }
  0x46   : > { %s187_s5 = scalar_lea.vmem [#allocation2], %s3255_s24  ;;  %p4757_p11 = pnand %p3981_p7, %p37_p9 }
  0x47   : > { %s195_s6 = sshll.u32 %s187_s5, 4  ;;  %s4761_s7 = scalar_lea.sflag [#allocation3], %s183_s20  ;;  %s4755_s6 = int_to_ptr.vmem [resolvable:$true] %s195_s6 }
  0x48   : > { %s4479_s8 = scalar_lea.hbm %s4753_s30, 4096  ;;  %p4481_p0 = pneg %p4757_p11 }
  0x49   : > { %p4480_p12 = scmp.ne.s32.totalorder %s4753_s30, %s4479_s8  ;;  %s4484_s24 = scalar_lea.hbm %s7509_s0, 8192 }
  0x4a   : > { %p4485_p13 = scmp.lt.u32.totalorder %s4753_s30, %s7509_s0  ;;  %p4486_p6 = scmp.lt.u32.totalorder %s4484_s24, %s4479_s8 }
  0x4b   : > { %p4482_p1 = pnand %p4481_p0, %p4480_p12  ;;  %p4488_p3 = scmp.lt.u32.totalorder %s4479_s8, %s4753_s30 }
  0x4c   : > { %p4487_p10 = por %p4486_p6, %p4485_p13 }
  0x4d   : > { %p4483_p2 = pneg %p4482_p1 }
  0x4e   : > { %p4489_p7 = por %p4488_p3, %p4487_p10 }
  0x50   : > { %p4490_p9 = pnand %p4489_p7, %p4483_p2 }
  0x52   : > { %4493 = shalt.err (!%p4490_p9)
}
  0x53   : > { %s4494_s20 = scalar_lea.vmem %s4755_s6, 4096  ;;  %s4585_s29 = smov [#allocation2]  }
  0x54   : > { %p4495_p12 = scmp.ne.s32.totalorder %s4755_s6, %s4494_s20  ;;  %s4499_s5 = sshll.u32 %s4585_s29, 4  ;;  %s4500_s5 = int_to_ptr.vmem [resolvable:$false] %s4499_s5 }
  0x55   : > { %s4501_s9 = scalar_lea.vmem %s4500_s5, 8192  ;;  %p4502_p4 = scmp.lt.s32.totalorder %s4755_s6, %s4500_s5 }
  0x56   : > { %p4497_p1 = pnand %p4495_p12, %p4481_p0  ;;  %p4503_p13 = scmp.lt.s32.totalorder %s4501_s9, %s4494_s20 }
  0x58   : > { %p4498_p5 = pneg %p4497_p1  ;;  %p4504_p6 = por %p4503_p13, %p4502_p4 }
  0x5a   : > { %p4505_p10 = pnand %p4504_p6, %p4498_p5 }
  0x5c   : > { %4508 = shalt.err (!%p4505_p10)
}
  0x5d   : > { %3974 = dma.hbm_to_vmem [thread:$0]  (!%p4757_p11), %s4753_s30, 4096, %s4755_s6, %s4761_s7, %s4583_s11, %s4583_s11, %s4584_s12  }
  0x5e   : > { %207 = sbr.rel (%p4654_p8) target bundleno = 1217 (0x4c1), region = 36 }
  0x65   : > { %s4795_s8 = sand.u32 1, %s4571_s16   ;;  %p7723_p4 = scmp.ne.s32.totalorder %s7716_s21, 0 }
  0x66   : > { %s3260_s10 = sshll.u32 %s4795_s8, 8  ;;  %s210_s24 = scalar_lea.sflag [#allocation3], %s4795_s8 }
  0x67   : > { %s4799_s28 = scalar_lea.vmem [#allocation2], %s3260_s10 }
  0x68   : > { %4554 = dma.done.wait (%p7723_p4), %s210_s24, 4096  }
  0x69   : > { %4556 = vsyncadd (%p7723_p4), %s210_s24, 4294963200  ;;  %p7724_p5 = scmp.eq.s32.totalorder %s4635_s19, 0 }
  0x6b   : > { %4558 = dma.done.wait (%p7724_p5), [#allocation6], 40960   ;;  %p7725_p8 = pmov %p7724_p5 }
  0x6c   : > { %v250_v0 = vld [vmem:[#allocation7 + $0x8] sm:$0xff]  ;;  %v252_v2 = vld [vmem:[#allocation7 + $0x18] sm:$0xff]  ;;  %v249_v5 = vld [vmem:[#allocation7] sm:$0xff]  ;;  %s3263_s11 = sshll.u32 %s4795_s8, 6  ;;  %s3271_s30 = sshll.u32 %s4635_s19, 10 }
  0x6d   : > { %4560 = vsyncadd (%p7725_p8), [#allocation6], 4294926336  ;;  %v254_v1 = vld [vmem:[#allocation7 + $0x28] sm:$0xff]  ;;  %v256_v4 = vld [vmem:[#allocation7 + $0x38] sm:$0xff]  ;;  %s7446_s12 = scalar_lea.vmem [#allocation8], %s3263_s11  ;;  %s7462_s27 = scalar_lea.hbm %s7513_s4, %s3271_s30 }
  0x6e   : > { %v4809_v3 = vpack.c.bf16 %v254_v1, %v250_v0  ;;  %v253_v6 = vld [vmem:[#allocation7 + $0x20] sm:$0xff]  ;;  %v4811_v7 = vpack.c.bf16 %v256_v4, %v252_v2  ;;  %v251_v9 = vld [vmem:[#allocation7 + $0x10] sm:$0xff]  ;;  %v258_v11 = vld [vmem:[#allocation7 + $0x48] sm:$0xff]  ;;  %s3158_s6 = sshll.u32 %s7446_s12, 4  ;;  %s3145_s20 = scalar_lea.sflag [#allocation4], %s4795_s8  ;;  %s7464_s6 = int_to_ptr.vmem [resolvable:$true] %s3158_s6 }
  0x6f   : > { %v4813_v8 = vpack.c.bf16 %v253_v6, %v249_v5  ;;  %v255_v10 = vld [vmem:[#allocation7 + $0x30] sm:$0xff]  ;;  %v262_v13 = vld [vmem:[#allocation7 + $0x68] sm:$0xff]  ;;  %v260_v14 = vld [vmem:[#allocation7 + $0x58] sm:$0xff]  ;;  %s4509_s29 = scalar_lea.vmem %s7464_s6, 1024  ;;  %p8208_p0 = scmp.ne.s32.totalorder %s7721_s13, 0 }
  0x70   : > { %3273 = vmatprep.subr.bf16.mxu0 %v4809_v3  ;;  %v4816_v12 = vpack.c.bf16 %v255_v10, %v251_v9  ;;  %v264_v15 = vld [vmem:[#allocation7 + $0x78] sm:$0xff]  ;;  %3401 = vmatprep.subr.bf16.mxu1 %v4811_v7  ;;  %v4820_v16 = vpack.c.bf16 %v262_v13, %v258_v11  ;;  %v257_v18 = vld [vmem:[#allocation7 + $0x40] sm:$0xff]  ;;  %v259_v20 = vld [vmem:[#allocation7 + $0x50] sm:$0xff]  ;;  %p4510_p11 = scmp.ne.s32.totalorder %s7464_s6, %s4509_s29  ;;  %s4586_s19 = smov [#allocation8]  }
  0x71   : > { %3275 = vmatpush1.bf16.msra.mxu0 %v4813_v8  ;;  %v4822_v17 = vpack.c.bf16 %v264_v15, %v260_v14  ;;  %v261_v19 = vld [vmem:[#allocation7 + $0x60] sm:$0xff]  ;;  %v263_v22 = vld [vmem:[#allocation7 + $0x70] sm:$0xff]  ;;  %v266_v23 = vld [vmem:[#allocation7 + $0x88] sm:$0xff]  ;;  %s4513_s5 = sshll.u32 %s4586_s19, 4  ;;  %s4514_s5 = int_to_ptr.vmem [resolvable:$false] %s4513_s5 }
  0x72   : > { %3403 = vmatpush1.bf16.msra.mxu1 %v4816_v12  ;;  %v4825_v21 = vpack.c.bf16 %v261_v19, %v257_v18  ;;  %v270_v24 = vld [vmem:[#allocation7 + $0xa8] sm:$0xff]  ;;  %3277 = vmatprep.subr.bf16.mxu0 %v4820_v16  ;;  %v4829_v25 = vpack.c.bf16 %v263_v22, %v259_v20  ;;  %v268_v27 = vld [vmem:[#allocation7 + $0x98] sm:$0xff]  ;;  %v265_v29 = vld [vmem:[#allocation7 + $0x80] sm:$0xff]  ;;  %p4511_p2 = pnand %p4510_p11, %p8208_p0  ;;  %s4515_s9 = scalar_lea.vmem %s4514_s5, 2048 }
  0x73   : > { %3405 = vmatprep.subr.bf16.mxu1 %v4822_v17  ;;  %v4831_v26 = vpack.c.bf16 %v270_v24, %v266_v23  ;;  %v272_v28 = vld [vmem:[#allocation7 + $0xb8] sm:$0xff]  ;;  %v269_v31 = vld [vmem:[#allocation7 + $0xa0] sm:$0xff]  ;;  %v267_v32 = vld [vmem:[#allocation7 + $0x90] sm:$0xff]  ;;  %p4516_p7 = scmp.lt.s32.totalorder %s7464_s6, %s4514_s5  ;;  %p4517_p9 = scmp.lt.s32.totalorder %s4515_s9, %s4509_s29 }
  0x74   : > { %v4833_v30 = vpack.c.bf16 %v272_v28, %v268_v27  ;;  %v271_v33 = vld [vmem:[#allocation7 + $0xb0] sm:$0xff]  ;;  %v4836_v34 = vpack.c.bf16 %v269_v31, %v265_v29  ;;  %v274_v35 = vld [vmem:[#allocation7 + $0xc8] sm:$0xff]  ;;  %v276_v37 = vld [vmem:[#allocation7 + $0xd8] sm:$0xff]  ;;  %p4512_p3 = pneg %p4511_p2 }
  0x75   : > { %3279 = vmatpush1.bf16.msra.mxu0 %v4825_v21  ;;  %v278_v36 = vld [vmem:[#allocation7 + $0xe8] sm:$0xff]  ;;  %v4840_v38 = vpack.c.bf16 %v271_v33, %v267_v32  ;;  %v280_v40 = vld [vmem:[#allocation7 + $0xf8] sm:$0xff]  ;;  %v273_v41 = vld [vmem:[#allocation7 + $0xc0] sm:$0xff]  ;;  %p4518_p12 = por %p4517_p9, %p4516_p7 }
  0x76   : > { %3407 = vmatpush1.bf16.msra.mxu1 %v4829_v25  ;;  %3281 = vmatprep.subr.bf16.mxu0 %v4831_v26  ;;  %v4842_v39 = vpack.c.bf16 %v278_v36, %v274_v35  ;;  %v277_v42 = vld [vmem:[#allocation7 + $0xe0] sm:$0xff]  ;;  %v4845_v43 = vpack.c.bf16 %v280_v40, %v276_v37  ;;  %v275_v44 = vld [vmem:[#allocation7 + $0xd0] sm:$0xff]  ;;  %v282_v46 = vld [vmem:[#allocation7 + $0x108] sm:$0xff] }
  0x77   : > { %3409 = vmatprep.subr.bf16.mxu1 %v4833_v30  ;;  %v279_v45 = vld [vmem:[#allocation7 + $0xf0] sm:$0xff]  ;;  %v286_v47 = vld [vmem:[#allocation7 + $0x128] sm:$0xff]  ;;  %v284_v48 = vld [vmem:[#allocation7 + $0x118] sm:$0xff]  ;;  %v4848_v50 = vpack.c.bf16 %v277_v42, %v273_v41  ;;  %p4519_p1 = pnand %p4518_p12, %p4512_p3 }
  0x78   : > { %v288_v49 = vld [vmem:[#allocation7 + $0x138] sm:$0xff]  ;;  %v4852_v51 = vpack.c.bf16 %v279_v45, %v275_v44  ;;  %v4854_v52 = vpack.c.bf16 %v286_v47, %v282_v46  ;;  %v281_v53 = vld [vmem:[#allocation7 + $0x100] sm:$0xff]  ;;  %v283_v55 = vld [vmem:[#allocation7 + $0x110] sm:$0xff] }
  0x79   : > { %3283 = vmatpush1.bf16.msra.mxu0 %v4836_v34  ;;  %v285_v54 = vld [vmem:[#allocation7 + $0x120] sm:$0xff]  ;;  %v4857_v56 = vpack.c.bf16 %v288_v49, %v284_v48  ;;  %v287_v57 = vld [vmem:[#allocation7 + $0x130] sm:$0xff]  ;;  %v290_v58 = vld [vmem:[#allocation7 + $0x148] sm:$0xff] }
  0x7a   : > { %3411 = vmatpush1.bf16.msra.mxu1 %v4840_v38  ;;  %3285 = vmatprep.subr.bf16.mxu0 %v4842_v39  ;;  %v294_v59 = vld [vmem:[#allocation7 + $0x168] sm:$0xff]  ;;  %v292_v60 = vld [vmem:[#allocation7 + $0x158] sm:$0xff]  ;;  %v4860_v62 = vpack.c.bf16 %v285_v54, %v281_v53  ;;  %v4864_v63 = vpack.c.bf16 %v287_v57, %v283_v55  ;;  %v289_v1 = vld [vmem:[#allocation7 + $0x140] sm:$0xff] }
  0x7b   : > { %3413 = vmatprep.subr.bf16.mxu1 %v4845_v43  ;;  %v296_v61 = vld [vmem:[#allocation7 + $0x178] sm:$0xff]  ;;  %v4866_v0 = vpack.c.bf16 %v294_v59, %v290_v58  ;;  %v293_v2 = vld [vmem:[#allocation7 + $0x160] sm:$0xff]  ;;  %v291_v4 = vld [vmem:[#allocation7 + $0x150] sm:$0xff] }
  0x7c   : > { %v4869_v5 = vpack.c.bf16 %v296_v61, %v292_v60  ;;  %v295_v6 = vld [vmem:[#allocation7 + $0x170] sm:$0xff]  ;;  %v298_v9 = vld [vmem:[#allocation7 + $0x188] sm:$0xff]  ;;  %v300_v11 = vld [vmem:[#allocation7 + $0x198] sm:$0xff]  ;;  %v4872_v14 = vpack.c.bf16 %v293_v2, %v289_v1 }
  0x7d   : > { %3287 = vmatpush1.bf16.msra.mxu0 %v4848_v50  ;;  %v302_v10 = vld [vmem:[#allocation7 + $0x1a8] sm:$0xff]  ;;  %v304_v13 = vld [vmem:[#allocation7 + $0x1b8] sm:$0xff]  ;;  %v4876_v15 = vpack.c.bf16 %v295_v6, %v291_v4  ;;  %v297_v19 = vld [vmem:[#allocation7 + $0x180] sm:$0xff]  ;;  %v538_v4 = vlaneseq }
  0x7e   : > { %3415 = vmatpush1.bf16.msra.mxu1 %v4852_v51  ;;  %3289 = vmatprep.subr.bf16.mxu0 %v4854_v52  ;;  %v4878_v18 = vpack.c.bf16 %v302_v10, %v298_v9  ;;  %v301_v20 = vld [vmem:[#allocation7 + $0x1a0] sm:$0xff]  ;;  %v299_v22 = vld [vmem:[#allocation7 + $0x190] sm:$0xff]  ;;  %v4881_v23 = vpack.c.bf16 %v304_v13, %v300_v11  ;;  %v306_v27 = vld [vmem:[#allocation7 + $0x1c8] sm:$0xff] }
  0x7f   : > { %3417 = vmatprep.subr.bf16.mxu1 %v4857_v56  ;;  %v303_v24 = vld [vmem:[#allocation7 + $0x1b0] sm:$0xff]  ;;  %v310_v28 = vld [vmem:[#allocation7 + $0x1e8] sm:$0xff]  ;;  %v308_v29 = vld [vmem:[#allocation7 + $0x1d8] sm:$0xff]  ;;  %v4884_v32 = vpack.c.bf16 %v301_v20, %v297_v19 }
  0x80   : > { %v312_v31 = vld [vmem:[#allocation7 + $0x1f8] sm:$0xff]  ;;  %v4888_v33 = vpack.c.bf16 %v303_v24, %v299_v22  ;;  %v4890_v35 = vpack.c.bf16 %v310_v28, %v306_v27  ;;  %v305_v36 = vld [vmem:[#allocation7 + $0x1c0] sm:$0xff]  ;;  %v307_v40 = vld [vmem:[#allocation7 + $0x1d0] sm:$0xff] }
  0x81   : > { %3291 = vmatpush1.bf16.msra.mxu0 %v4860_v62  ;;  %v309_v37 = vld [vmem:[#allocation7 + $0x1e0] sm:$0xff]  ;;  %v4893_v41 = vpack.c.bf16 %v312_v31, %v308_v29  ;;  %v311_v42 = vld [vmem:[#allocation7 + $0x1f0] sm:$0xff]  ;;  %v314_v44 = vld [vmem:[#allocation7 + $0x208] sm:$0xff]  ;;  %v4919_v31 = vshrl.u32 %v538_v4, 7 }
  0x82   : > { %3419 = vmatpush1.bf16.msra.mxu1 %v4864_v63  ;;  %3293 = vmatprep.subr.bf16.mxu0 %v4866_v0  ;;  %v318_v45 = vld [vmem:[#allocation7 + $0x228] sm:$0xff]  ;;  %v316_v46 = vld [vmem:[#allocation7 + $0x218] sm:$0xff]  ;;  %v4896_v48 = vpack.c.bf16 %v309_v37, %v305_v36  ;;  %v4900_v49 = vpack.c.bf16 %v311_v42, %v307_v40  ;;  %v313_v54 = vld [vmem:[#allocation7 + $0x200] sm:$0xff] }
  0x83   : > { %3421 = vmatprep.subr.bf16.mxu1 %v4869_v5  ;;  %v320_v47 = vld [vmem:[#allocation7 + $0x238] sm:$0xff]  ;;  %v4902_v53 = vpack.c.bf16 %v318_v45, %v314_v44  ;;  %v317_v55 = vld [vmem:[#allocation7 + $0x220] sm:$0xff]  ;;  %v315_v57 = vld [vmem:[#allocation7 + $0x210] sm:$0xff] }
  0x84   : > { %v4905_v58 = vpack.c.bf16 %v320_v47, %v316_v46  ;;  %v319_v59 = vld [vmem:[#allocation7 + $0x230] sm:$0xff]  ;;  %v322_v60 = vld [vmem:[#allocation7 + $0x248] sm:$0xff]  ;;  %v324_v1 = vld [vmem:[#allocation7 + $0x258] sm:$0xff]  ;;  %v4908_v6 = vpack.c.bf16 %v317_v55, %v313_v54 }
  0x85   : > { %3295 = vmatpush1.bf16.msra.mxu0 %v4872_v14  ;;  %v326_v61 = vld [vmem:[#allocation7 + $0x268] sm:$0xff]  ;;  %v328_v2 = vld [vmem:[#allocation7 + $0x278] sm:$0xff]  ;;  %v4912_v9 = vpack.c.bf16 %v319_v59, %v315_v57  ;;  %v321_v11 = vld [vmem:[#allocation7 + $0x240] sm:$0xff] }
  0x86   : > { %3423 = vmatpush1.bf16.msra.mxu1 %v4876_v15  ;;  %3297 = vmatprep.subr.bf16.mxu0 %v4878_v18  ;;  %7726 = vst [vmem:[#allocation12_spill] sm:$0xff] %v4905_v58  ;;  %7727 = vst [vmem:[#allocation13_spill] sm:$0xff] %v4908_v6  ;;  %v4914_v10 = vpack.c.bf16 %v326_v61, %v322_v60  ;;  %v325_v13 = vld [vmem:[#allocation7 + $0x260] sm:$0xff]  ;;  %v323_v19 = vld [vmem:[#allocation7 + $0x250] sm:$0xff]  ;;  %v4917_v20 = vpack.c.bf16 %v328_v2, %v324_v1  ;;  %v544_v60 = vsub.s32 1, %v4919_v31 }
  0x87   : > { %3425 = vmatprep.subr.bf16.mxu1 %v4881_v23  ;;  %7728 = vst [vmem:[#allocation14_spill] sm:$0xff] %v4912_v9  ;;  %v327_v22 = vld [vmem:[#allocation7 + $0x270] sm:$0xff]  ;;  %v330_v24 = vld [vmem:[#allocation7 + $0x288] sm:$0xff]  ;;  %v332_v28 = vld [vmem:[#allocation7 + $0x298] sm:$0xff]  ;;  %v4922_v36 = vpack.c.bf16 %v325_v13, %v321_v11  ;;  %v548_v61 = vsub.s32 2, %v4919_v31 }
  0x88   : > { %7729 = vst [vmem:[#allocation15_spill] sm:$0xff] %v4914_v10  ;;  %7730 = vst [vmem:[#allocation16_spill] sm:$0xff] %v4917_v20  ;;  %v334_v27 = vld [vmem:[#allocation7 + $0x2a8] sm:$0xff]  ;;  %v336_v29 = vld [vmem:[#allocation7 + $0x2b8] sm:$0xff]  ;;  %v4926_v37 = vpack.c.bf16 %v327_v22, %v323_v19 }
  0x89   : > { %3299 = vmatpush1.bf16.msra.mxu0 %v4884_v32  ;;  %7731 = vst [vmem:[#allocation17_spill] sm:$0xff] %v4922_v36  ;;  %v4928_v40 = vpack.c.bf16 %v334_v27, %v330_v24  ;;  %v329_v42 = vld [vmem:[#allocation7 + $0x280] sm:$0xff]  ;;  %v331_v45 = vld [vmem:[#allocation7 + $0x290] sm:$0xff]  ;;  %v4931_v46 = vpack.c.bf16 %v336_v29, %v332_v28  ;;  %v338_v54 = vld [vmem:[#allocation7 + $0x2c8] sm:$0xff] }
  0x8a   : > { %3427 = vmatpush1.bf16.msra.mxu1 %v4888_v33  ;;  %3301 = vmatprep.subr.bf16.mxu0 %v4890_v35  ;;  %7732 = vst [vmem:[#allocation18_spill] sm:$0xff] %v4926_v37  ;;  %v333_v44 = vld [vmem:[#allocation7 + $0x2a0] sm:$0xff]  ;;  %v335_v47 = vld [vmem:[#allocation7 + $0x2b0] sm:$0xff]  ;;  %v342_v55 = vld [vmem:[#allocation7 + $0x2e8] sm:$0xff] }
  0x8b   : > { %3429 = vmatprep.subr.bf16.mxu1 %v4893_v41  ;;  %7733 = vst [vmem:[#allocation19_spill] sm:$0xff] %v4928_v40  ;;  %7734 = vst [vmem:[#allocation20_spill] sm:$0xff] %v4931_v46  ;;  %v340_v57 = vld [vmem:[#allocation7 + $0x2d8] sm:$0xff]  ;;  %v4936_v1 = vpack.c.bf16 %v333_v44, %v329_v42  ;;  %v337_v2 = vld [vmem:[#allocation7 + $0x2c0] sm:$0xff]  ;;  %v4940_v4 = vpack.c.bf16 %v335_v47, %v331_v45  ;;  %v4942_v11 = vpack.c.bf16 %v342_v55, %v338_v54 }
  0x8c   : > { %v344_v59 = vld [vmem:[#allocation7 + $0x2f8] sm:$0xff]  ;;  %v341_v13 = vld [vmem:[#allocation7 + $0x2e0] sm:$0xff]  ;;  %v339_v19 = vld [vmem:[#allocation7 + $0x2d0] sm:$0xff] }
  0x8d   : > { %3303 = vmatpush1.bf16.msra.mxu0 %v4896_v48  ;;  %7735 = vst [vmem:[#allocation21_spill] sm:$0xff] %v4936_v1  ;;  %7736 = vst [vmem:[#allocation22_spill] sm:$0xff] %v4940_v4  ;;  %v343_v22 = vld [vmem:[#allocation7 + $0x2f0] sm:$0xff]  ;;  %v4945_v24 = vpack.c.bf16 %v344_v59, %v340_v57  ;;  %v346_v27 = vld [vmem:[#allocation7 + $0x308] sm:$0xff]  ;;  %v4960_v55 = vpack.c.bf16 %v341_v13, %v337_v2 }
  0x8e   : > { %3431 = vmatpush1.bf16.msra.mxu1 %v4900_v49  ;;  %3305 = vmatprep.subr.bf16.mxu0 %v4902_v53  ;;  %7737 = vst [vmem:[#allocation23_spill] sm:$0xff] %v4942_v11  ;;  %v350_v28 = vld [vmem:[#allocation7 + $0x328] sm:$0xff]  ;;  %v4950_v29 = vld [vmem:[%s7511_s2] sm:$0xf]  ;;  %v348_v42 = vld [vmem:[#allocation7 + $0x318] sm:$0xff]  ;;  %v4964_v57 = vpack.c.bf16 %v343_v22, %v339_v19 }
  0x8f   : > { %3433 = vmatprep.subr.bf16.mxu1 %v4905_v58  ;;  %7738 = vst [vmem:[#allocation24_spill] sm:$0xff] %v4945_v24  ;;  %v352_v44 = vld [vmem:[#allocation7 + $0x338] sm:$0xff]  ;;  %v506_v45 = vld [vmem:[%s4799_s28 + $0x8] sm:$0xff]  ;;  %v4954_v47 = vrot.slane %v4950_v29, %v544_v60  ;;  %v4957_v54 = vrot.slane %v4950_v29, %v548_v61  ;;  %7739 = vst [vmem:[#allocation25_spill] sm:$0xff] %v4960_v55  ;;  %v4966_v59 = vpack.c.bf16 %v350_v28, %v346_v27 }
  0x90   : > { %7740 = vst [vmem:[#allocation26_spill] sm:$0xff] %v4964_v57  ;;  %v4972_v61 = vpack.c.bf16 %v352_v44, %v348_v42  ;;  %v351_v2 = vld [vmem:[#allocation7 + $0x330] sm:$0xff]  ;;  %v354_v13 = vld [vmem:[#allocation7 + $0x348] sm:$0xff]  ;;  %v353_v42 = vld [vmem:[#allocation7 + $0x340] sm:$0xff] }
  0x91   : > { %3307 = vmatpush1.bf16.msra.mxu0 %v4908_v6  ;;  %7741 = vst [vmem:[#allocation27_spill] sm:$0xff] %v4966_v59  ;;  %v4969_v60 = vmul.f32 %v4954_v47, %v506_v45  ;;  %v357_v44 = vld [vmem:[#allocation7 + $0x360] sm:$0xff]  ;;  %v355_v45 = vld [vmem:[#allocation7 + $0x350] sm:$0xff]  ;;  %v518_v6 = vld [vmem:[%s4799_s28 + $0x68] sm:$0xff] }
  0x92   : > { %3435 = vmatpush1.bf16.msra.mxu1 %v4912_v9  ;;  %3309 = vmatprep.subr.bf16.mxu0 %v4914_v10  ;;  %7743 = vst [vmem:[#allocation29_spill] sm:$0xff] %v4972_v61  ;;  %v401_v10 = vld [vmem:[#allocation7 + $0x4c0] sm:$0xff]  ;;  %v412_v58 = vld [vmem:[#allocation7 + $0x518] sm:$0xff] }
  0x93   : > { %3437 = vmatprep.subr.bf16.mxu1 %v4917_v20  ;;  %7742 = vst [vmem:[#allocation28_spill] sm:$0xff] %v4969_v60  ;;  %v591_v19 = vmul.f32 %v4969_v60, %v4969_v60  ;;  %v359_v60 = vld [vmem:[#allocation7 + $0x370] sm:$0xff]  ;;  %v384_v20 = vld [vmem:[#allocation7 + $0x438] sm:$0xff] }
  0x95   : > { %3311 = vmatpush1.bf16.msra.mxu0 %v4922_v36  ;;  %v360_v36 = vld [vmem:[#allocation7 + $0x378] sm:$0xff]  ;;  %686 = vmatprep.mubr.f32.mxu0 %v591_v19 }
  0x96   : > { %3439 = vmatpush1.bf16.msra.mxu1 %v4926_v37  ;;  %3313 = vmatprep.subr.bf16.mxu0 %v4928_v40  ;;  %v349_v40 = vld [vmem:[#allocation7 + $0x320] sm:$0xff]  ;;  %v347_v37 = vld [vmem:[#allocation7 + $0x310] sm:$0xff] }
  0x97   : > { %3441 = vmatprep.subr.bf16.mxu1 %v4931_v46  ;;  %v345_v46 = vld [vmem:[#allocation7 + $0x300] sm:$0xff]  ;;  %v4981_v27 = vpack.c.bf16 %v351_v2, %v347_v37  ;;  %912 = vmatprep.mubr.f32.mxu1 %v591_v19  ;;  %v4990_v37 = vpack.c.bf16 %v357_v44, %v353_v42  ;;  %v374_v42 = vld [vmem:[#allocation7 + $0x3e8] sm:$0xff]  ;;  %v372_v44 = vld [vmem:[#allocation7 + $0x3d8] sm:$0xff] }
  0x98   : > { %v4977_v22 = vpack.c.bf16 %v349_v40, %v345_v46  ;;  %v364_v40 = vld [vmem:[#allocation7 + $0x398] sm:$0xff]  ;;  %v365_v2 = vld [vmem:[#allocation7 + $0x3a0] sm:$0xff] }
  0x99   : > { %3315 = vmatpush1.bf16.msra.mxu0 %v4936_v1  ;;  %v358_v1 = vld [vmem:[#allocation7 + $0x368] sm:$0xff]  ;;  %7745 = vst [vmem:[#allocation31_spill] sm:$0xff] %v4981_v27  ;;  %v368_v46 = vld [vmem:[#allocation7 + $0x3b8] sm:$0xff]  ;;  %7748 = vst [vmem:[#allocation34_spill] sm:$0xff] %v4990_v37 }
  0x9a   : > { %3443 = vmatpush1.bf16.msra.mxu1 %v4940_v4  ;;  %3317 = vmatprep.subr.bf16.mxu0 %v4942_v11  ;;  %v356_v4 = vld [vmem:[#allocation7 + $0x358] sm:$0xff]  ;;  %7744 = vst [vmem:[#allocation30_spill] sm:$0xff] %v4977_v22  ;;  %v4983_v28 = vpack.c.bf16 %v358_v1, %v354_v13  ;;  %v362_v11 = vld [vmem:[#allocation7 + $0x388] sm:$0xff]  ;;  %v363_v13 = vld [vmem:[#allocation7 + $0x390] sm:$0xff]  ;;  %v4999_v19 = vpack.c.bf16 %v368_v46, %v364_v40 }
  0x9b   : > { %3445 = vmatprep.subr.bf16.mxu1 %v4945_v24  ;;  %v4986_v24 = vpack.c.bf16 %v360_v36, %v356_v4  ;;  %v4994_v36 = vpack.c.bf16 %v359_v60, %v355_v45  ;;  %v361_v4 = vld [vmem:[#allocation7 + $0x380] sm:$0xff] }
  0x9c   : > { %7746 = vst [vmem:[#allocation32_spill] sm:$0xff] %v4983_v28  ;;  %7751 = vst [vmem:[#allocation37_spill] sm:$0xff] %v4999_v19  ;;  %v5005_v60 = vpack.c.bf16 %v365_v2, %v361_v4  ;;  %v369_v40 = vld [vmem:[#allocation7 + $0x3c0] sm:$0xff]  ;;  %v382_v4 = vld [vmem:[#allocation7 + $0x428] sm:$0xff] }
  0x9d   : > { %3319 = vmatpush1.bf16.msra.mxu0 %v4960_v55  ;;  %7747 = vst [vmem:[#allocation33_spill] sm:$0xff] %v4986_v24  ;;  %v366_v55 = vld [vmem:[#allocation7 + $0x3a8] sm:$0xff]  ;;  %7749 = vst [vmem:[#allocation35_spill] sm:$0xff] %v4994_v36  ;;  %v373_v46 = vld [vmem:[#allocation7 + $0x3e0] sm:$0xff] }
  0x9e   : > { %3447 = vmatpush1.bf16.msra.mxu1 %v4964_v57  ;;  %3321 = vmatprep.subr.bf16.mxu0 %v4966_v59  ;;  %v540_v59 = vsub.s32 0, %v4919_v31  ;;  %v4996_v1 = vpack.c.bf16 %v366_v55, %v362_v11  ;;  %v376_v57 = vld [vmem:[#allocation7 + $0x3f8] sm:$0xff]  ;;  %7752 = vst [vmem:[#allocation38_spill] sm:$0xff] %v5005_v60  ;;  %v505_v11 = vld [vmem:[%s4799_s28] sm:$0xff] }
  0x9f   : > { %3449 = vmatprep.subr.bf16.mxu1 %v4972_v61  ;;  %v367_v61 = vld [vmem:[#allocation7 + $0x3b0] sm:$0xff]  ;;  %v380_v2 = vld [vmem:[#allocation7 + $0x418] sm:$0xff] }
  0xa0   : > { %7750 = vst [vmem:[#allocation36_spill] sm:$0xff] %v4996_v1  ;;  %v5010_v55 = vpack.c.bf16 %v367_v61, %v363_v13  ;;  %v5021_v61 = vpack.c.bf16 %v373_v46, %v369_v40  ;;  %v377_v13 = vld [vmem:[#allocation7 + $0x400] sm:$0xff]  ;;  %v388_v46 = vld [vmem:[#allocation7 + $0x458] sm:$0xff] }
  0xa1   : > { %3323 = vmatpush1.bf16.msra.mxu0 %v4977_v22  ;;  %v370_v22 = vld [vmem:[#allocation7 + $0x3c8] sm:$0xff] }
  0xa2   : > { %3451 = vmatpush1.bf16.msra.mxu1 %v4981_v27  ;;  %3325 = vmatprep.subr.bf16.mxu0 %v4983_v28  ;;  %v5002_v27 = vrot.slane %v4950_v29, %v540_v59  ;;  %7753 = vst [vmem:[#allocation39_spill] sm:$0xff] %v5010_v55  ;;  %v5012_v45 = vpack.c.bf16 %v374_v42, %v370_v22  ;;  %v375_v28 = vld [vmem:[#allocation7 + $0x3f0] sm:$0xff]  ;;  %7757 = vst [vmem:[#allocation43_spill] sm:$0xff] %v5021_v61  ;;  %v381_v42 = vld [vmem:[#allocation7 + $0x420] sm:$0xff] }
  0xa3   : > { %3453 = vmatprep.subr.bf16.mxu1 %v4986_v24  ;;  %v371_v24 = vld [vmem:[#allocation7 + $0x3d0] sm:$0xff]  ;;  %v5015_v59 = vpack.c.bf16 %v376_v57, %v372_v44 }
  0xa4   : > { %7754 = vst [vmem:[#allocation40_spill] sm:$0xff] %v5012_v45  ;;  %v5025_v22 = vpack.c.bf16 %v375_v28, %v371_v24  ;;  %v379_v44 = vld [vmem:[#allocation7 + $0x410] sm:$0xff]  ;;  %v5035_v24 = vpack.c.bf16 %v381_v42, %v377_v13  ;;  %v394_v13 = vld [vmem:[#allocation7 + $0x488] sm:$0xff] }
  0xa5   : > { %3327 = vmatpush1.bf16.msra.mxu0 %v4990_v37  ;;  %7755 = vst [vmem:[#allocation41_spill] sm:$0xff] %v5015_v59  ;;  %v378_v37 = vld [vmem:[#allocation7 + $0x408] sm:$0xff] }
  0xa6   : > { %3455 = vmatpush1.bf16.msra.mxu1 %v4994_v36  ;;  %3329 = vmatprep.subr.bf16.mxu0 %v4996_v1  ;;  %v5018_v36 = vmul.f32 %v5002_v27, %v505_v11  ;;  %7758 = vst [vmem:[#allocation44_spill] sm:$0xff] %v5025_v22  ;;  %v5027_v57 = vpack.c.bf16 %v382_v4, %v378_v37  ;;  %v383_v11 = vld [vmem:[#allocation7 + $0x430] sm:$0xff]  ;;  %v386_v1 = vld [vmem:[#allocation7 + $0x448] sm:$0xff]  ;;  %7761 = vst [vmem:[#allocation47_spill] sm:$0xff] %v5035_v24 }
  0xa7   : > { %3457 = vmatprep.subr.bf16.mxu1 %v4999_v19  ;;  %v5030_v19 = vpack.c.bf16 %v384_v20, %v380_v2  ;;  %v5039_v28 = vpack.c.bf16 %v383_v11, %v379_v44  ;;  %v385_v37 = vld [vmem:[#allocation7 + $0x440] sm:$0xff]  ;;  %v387_v2 = vld [vmem:[#allocation7 + $0x450] sm:$0xff]  ;;  %v398_v42 = vld [vmem:[#allocation7 + $0x4a8] sm:$0xff] }
  0xa8   : > { %7756 = vst [vmem:[#allocation42_spill] sm:$0xff] %v5018_v36  ;;  %7759 = vst [vmem:[#allocation45_spill] sm:$0xff] %v5027_v57  ;;  %v590_v40 = vmul.f32 %v5018_v36, %v5018_v36  ;;  %v389_v4 = vld [vmem:[#allocation7 + $0x460] sm:$0xff] }
  0xa9   : > { %3331 = vmatpush1.bf16.msra.mxu0 %v5005_v60  ;;  %7760 = vst [vmem:[#allocation46_spill] sm:$0xff] %v5030_v19  ;;  %v390_v60 = vld [vmem:[#allocation7 + $0x468] sm:$0xff]  ;;  %7762 = vst [vmem:[#allocation48_spill] sm:$0xff] %v5039_v28  ;;  %v509_v11 = vld [vmem:[%s4799_s28 + $0x20] sm:$0xff] }
  0xaa   : > { %3459 = vmatpush1.bf16.msra.mxu1 %v5010_v55  ;;  %3333 = vmatprep.subr.bf16.mxu0 %v5012_v45  ;;  %v392_v55 = vld [vmem:[#allocation7 + $0x478] sm:$0xff]  ;;  %v5041_v20 = vpack.c.bf16 %v390_v60, %v386_v1  ;;  %v510_v45 = vld [vmem:[%s4799_s28 + $0x28] sm:$0xff]  ;;  %v5048_v1 = vpack.c.bf16 %v389_v4, %v385_v37  ;;  %v393_v60 = vld [vmem:[#allocation7 + $0x480] sm:$0xff]  ;;  %v5061_v37 = vmul.f32 %v5002_v27, %v509_v11 }
  0xab   : > { %3461 = vmatprep.subr.bf16.mxu1 %v5015_v59  ;;  %v5044_v36 = vpack.c.bf16 %v392_v55, %v388_v46  ;;  %v396_v59 = vld [vmem:[#allocation7 + $0x498] sm:$0xff]  ;;  %v5051_v44 = vmul.f32 %v4954_v47, %v510_v45  ;;  %v5058_v46 = vpack.c.bf16 %v398_v42, %v394_v13  ;;  %v402_v4 = vld [vmem:[#allocation7 + $0x4c8] sm:$0xff]  ;;  %v513_v42 = vld [vmem:[%s4799_s28 + $0x40] sm:$0xff] }
  0xac   : > { %7763 = vst [vmem:[#allocation49_spill] sm:$0xff] %v5041_v20  ;;  %7765 = vst [vmem:[#allocation51_spill] sm:$0xff] %v5048_v1  ;;  %v514_v13 = vld [vmem:[%s4799_s28 + $0x48] sm:$0xff] }
  0xad   : > { %3335 = vmatpush1.bf16.msra.mxu0 %v5021_v61  ;;  %7764 = vst [vmem:[#allocation50_spill] sm:$0xff] %v5044_v36  ;;  %v391_v61 = vld [vmem:[#allocation7 + $0x470] sm:$0xff]  ;;  %7766 = vst [vmem:[#allocation52_spill] sm:$0xff] %v5051_v44 }
  0xae   : > { %3463 = vmatpush1.bf16.msra.mxu1 %v5025_v22  ;;  %3337 = vmatprep.subr.bf16.mxu0 %v5027_v57  ;;  %v400_v22 = vld [vmem:[#allocation7 + $0x4b8] sm:$0xff]  ;;  %v5056_v55 = vpack.c.bf16 %v391_v61, %v387_v2  ;;  %7768 = vst [vmem:[#allocation54_spill] sm:$0xff] %v5058_v46  ;;  %7769 = vst [vmem:[#allocation55_spill] sm:$0xff] %v5061_v37  ;;  %v594_v2 = vmul.f32 %v5061_v37, %v5061_v37 }
  0xaf   : > { %3465 = vmatprep.subr.bf16.mxu1 %v5030_v19  ;;  %v397_v19 = vld [vmem:[#allocation7 + $0x4a0] sm:$0xff]  ;;  %v5064_v45 = vpack.c.bf16 %v400_v22, %v396_v59  ;;  %v404_v57 = vld [vmem:[#allocation7 + $0x4d8] sm:$0xff]  ;;  %v5076_v59 = vmul.f32 %v4954_v47, %v514_v13  ;;  %v5079_v22 = vmul.f32 %v5002_v27, %v513_v42  ;;  %v414_v13 = vld [vmem:[#allocation7 + $0x528] sm:$0xff] }
  0xb0   : > { %687 = vmatmul.mubr.f32.vlgmr.msra.gmra.mrb[0].mxu0 %v590_v40  ;;  %7767 = vst [vmem:[#allocation53_spill] sm:$0xff] %v5056_v55  ;;  %v408_v61 = vld [vmem:[#allocation7 + $0x4f8] sm:$0xff]  ;;  %v5073_v11 = vpack.c.bf16 %v397_v19, %v393_v60  ;;  %v403_v19 = vld [vmem:[#allocation7 + $0x4d0] sm:$0xff] }
  0xb1   : > { %3339 = vmatpush1.bf16.msra.mxu0 %v5035_v24  ;;  %913 = vmatmul.mubr.f32.vlgmr.msra.gmra.mrb[0].mxu1 %v590_v40  ;;  %v395_v24 = vld [vmem:[#allocation7 + $0x490] sm:$0xff]  ;;  %7771 = vst [vmem:[#allocation57_spill] sm:$0xff] %v5076_v59  ;;  %7772 = vst [vmem:[#allocation58_spill] sm:$0xff] %v5079_v22  ;;  %v5088_v9 = vpack.c.bf16 %v408_v61, %v404_v57  ;;  %v599_v42 = vmul.f32 %v5076_v59, %v5076_v59  ;;  %v522_v59 = vld [vmem:[%s4799_s28 + $0x88] sm:$0xff] }
  0xb2   : > { %3467 = vmatpush1.bf16.msra.mxu1 %v5039_v28  ;;  %3341 = vmatprep.subr.bf16.mxu0 %v5041_v20  ;;  %v399_v40 = vld [vmem:[#allocation7 + $0x4b0] sm:$0xff]  ;;  %v406_v28 = vld [vmem:[#allocation7 + $0x4e8] sm:$0xff]  ;;  %v595_v20 = vmul.f32 %v5051_v44, %v5051_v44  ;;  %7770 = vst [vmem:[#allocation56_spill] sm:$0xff] %v5073_v11 }
  0xb3   : > { %3469 = vmatprep.subr.bf16.mxu1 %v5044_v36  ;;  %v405_v36 = vld [vmem:[#allocation7 + $0x4e0] sm:$0xff]  ;;  %v5083_v37 = vpack.c.bf16 %v399_v40, %v395_v24  ;;  %v5085_v44 = vpack.c.bf16 %v406_v28, %v402_v4  ;;  %v407_v60 = vld [vmem:[#allocation7 + $0x4f0] sm:$0xff]  ;;  %7775 = vst [vmem:[#allocation61_spill] sm:$0xff] %v5088_v9  ;;  %v598_v24 = vmul.f32 %v5079_v22, %v5079_v22 }
  0xb4   : > { %692 = vmatprep.mubr.f32.mxu0 %v595_v20  ;;  %918 = vmatprep.mubr.f32.mxu1 %v595_v20  ;;  %v5097_v28 = vmul.f32 %v4954_v47, %v518_v6  ;;  %v5103_v20 = vpack.c.bf16 %v405_v36, %v401_v10  ;;  %v409_v40 = vld [vmem:[#allocation7 + $0x500] sm:$0xff]  ;;  %v5107_v61 = vpack.c.bf16 %v407_v60, %v403_v19  ;;  %v411_v6 = vld [vmem:[#allocation7 + $0x510] sm:$0xff]  ;;  %v418_v36 = vld [vmem:[#allocation7 + $0x548] sm:$0xff] }
  0xb5   : > { %3343 = vmatpush1.bf16.msra.mxu0 %v5048_v1  ;;  %7773 = vst [vmem:[#allocation59_spill] sm:$0xff] %v5083_v37  ;;  %7774 = vst [vmem:[#allocation60_spill] sm:$0xff] %v5085_v44  ;;  %v410_v1 = vld [vmem:[#allocation7 + $0x508] sm:$0xff]  ;;  %919 = vmatmul.mubr.f32.gmra.mrb[2].mxu1 %v594_v2  ;;  %v413_v4 = vld [vmem:[#allocation7 + $0x520] sm:$0xff] }
  0xb6   : > { %3471 = vmatpush1.bf16.msra.mxu1 %v5056_v55  ;;  %3345 = vmatprep.subr.bf16.mxu0 %v5058_v46  ;;  %v517_v55 = vld [vmem:[%s4799_s28 + $0x60] sm:$0xff]  ;;  %v416_v46 = vld [vmem:[#allocation7 + $0x538] sm:$0xff]  ;;  %7776 = vst [vmem:[#allocation62_spill] sm:$0xff] %v5097_v28  ;;  %7778 = vst [vmem:[#allocation64_spill] sm:$0xff] %v5103_v20 }
  0xb7   : > { %3473 = vmatprep.subr.bf16.mxu1 %v5064_v45  ;;  %693 = vmatmul.mubr.f32.gmra.mrb[2].mxu0 %v594_v2  ;;  %v5100_v57 = vmul.f32 %v5002_v27, %v517_v55  ;;  %7779 = vst [vmem:[#allocation65_spill] sm:$0xff] %v5107_v61  ;;  %v5109_v2 = vpack.c.bf16 %v414_v13, %v410_v1  ;;  %v415_v22 = vld [vmem:[#allocation7 + $0x530] sm:$0xff]  ;;  %v521_v19 = vld [vmem:[%s4799_s28 + $0x80] sm:$0xff]  ;;  %v420_v60 = vld [vmem:[#allocation7 + $0x558] sm:$0xff] }
  0xb8   : > { %698 = vmatprep.mubr.f32.mxu0 %v599_v42  ;;  %v603_v55 = vmul.f32 %v5097_v28, %v5097_v28  ;;  %v5115_v10 = vpack.c.bf16 %v416_v46, %v412_v58  ;;  %924 = vmatprep.mubr.f32.mxu1 %v599_v42  ;;  %v424_v1 = vld [vmem:[#allocation7 + $0x578] sm:$0xff]  ;;  %v5124_v28 = vmul.f32 %v5002_v27, %v521_v19  ;;  %v417_v46 = vld [vmem:[#allocation7 + $0x540] sm:$0xff]  ;;  %v419_v19 = vld [vmem:[#allocation7 + $0x550] sm:$0xff] }
  0xb9   : > { %7777 = vst [vmem:[#allocation63_spill] sm:$0xff] %v5100_v57  ;;  %3347 = vmatpush1.bf16.msra.mxu0 %v5073_v11  ;;  %7780 = vst [vmem:[#allocation66_spill] sm:$0xff] %v5109_v2  ;;  %v422_v11 = vld [vmem:[#allocation7 + $0x568] sm:$0xff]  ;;  %925 = vmatmul.mubr.f32.gmra.mrb[4].mxu1 %v598_v24  ;;  %v602_v13 = vmul.f32 %v5100_v57, %v5100_v57  ;;  %v5127_v58 = vpack.c.bf16 %v413_v4, %v409_v40  ;;  %v423_v4 = vld [vmem:[#allocation7 + $0x570] sm:$0xff] }
  0xba   : > { %3475 = vmatpush1.bf16.msra.mxu1 %v5083_v37  ;;  %3349 = vmatprep.subr.bf16.mxu0 %v5085_v44  ;;  %7781 = vst [vmem:[#allocation67_spill] sm:$0xff] %v5115_v10  ;;  %v5118_v37 = vmul.f32 %v4954_v47, %v522_v59  ;;  %7783 = vst [vmem:[#allocation69_spill] sm:$0xff] %v5124_v28  ;;  %v421_v59 = vld [vmem:[#allocation7 + $0x560] sm:$0xff]  ;;  %v5135_v57 = vpack.c.bf16 %v422_v11, %v418_v36 }
  0xbb   : > { %3477 = vmatprep.subr.bf16.mxu1 %v5088_v9  ;;  %699 = vmatmul.mubr.f32.gmra.mrb[4].mxu0 %v598_v24  ;;  %7784 = vst [vmem:[#allocation70_spill] sm:$0xff] %v5127_v58  ;;  %v5133_v24 = vpack.c.bf16 %v415_v22, %v411_v6  ;;  %v526_v9 = vld [vmem:[%s4799_s28 + $0xa8] sm:$0xff]  ;;  %v525_v44 = vld [vmem:[%s4799_s28 + $0xa0] sm:$0xff]  ;;  %v5140_v40 = vpack.c.bf16 %v424_v1, %v420_v60  ;;  %v428_v22 = vld [vmem:[#allocation7 + $0x598] sm:$0xff]  ;;  %v552_v60 = vsub.s32 3, %v4919_v31 }
  0xbc   : > { %7782 = vst [vmem:[#allocation68_spill] sm:$0xff] %v5118_v37  ;;  %704 = vmatprep.mubr.f32.mxu0 %v603_v55  ;;  %v607_v42 = vmul.f32 %v5118_v37, %v5118_v37  ;;  %7786 = vst [vmem:[#allocation72_spill] sm:$0xff] %v5135_v57  ;;  %v430_v37 = vld [vmem:[#allocation7 + $0x5a8] sm:$0xff]  ;;  %930 = vmatprep.mubr.f32.mxu1 %v603_v55  ;;  %v432_v6 = vld [vmem:[#allocation7 + $0x5b8] sm:$0xff]  ;;  %v606_v11 = vmul.f32 %v5124_v28, %v5124_v28 }
  0xbd   : > { %3351 = vmatpush1.bf16.msra.mxu0 %v5103_v20  ;;  %7785 = vst [vmem:[#allocation71_spill] sm:$0xff] %v5133_v24  ;;  %7787 = vst [vmem:[#allocation73_spill] sm:$0xff] %v5140_v40  ;;  %v426_v20 = vld [vmem:[#allocation7 + $0x588] sm:$0xff]  ;;  %931 = vmatmul.mubr.f32.gmra.mrb[6].mxu1 %v602_v13  ;;  %v5148_v36 = vmul.f32 %v5002_v27, %v525_v44  ;;  %v5152_v1 = vpack.c.bf16 %v421_v59, %v417_v46  ;;  %v425_v28 = vld [vmem:[#allocation7 + $0x580] sm:$0xff] }
  0xbe   : > { %3479 = vmatpush1.bf16.msra.mxu1 %v5107_v61  ;;  %3353 = vmatprep.subr.bf16.mxu0 %v5109_v2  ;;  %v5143_v61 = vmul.f32 %v4954_v47, %v526_v9  ;;  %v530_v55 = vld [vmem:[%s4799_s28 + $0xc8] sm:$0xff]  ;;  %v5162_v44 = vpack.c.bf16 %v430_v37, %v426_v20  ;;  %v429_v31 = vld [vmem:[#allocation7 + $0x5a0] sm:$0xff]  ;;  %v5168_v59 = vpack.c.bf16 %v432_v6, %v428_v22 }
  0xbf   : > { %3481 = vmatprep.subr.bf16.mxu1 %v5115_v10  ;;  %705 = vmatmul.mubr.f32.gmra.mrb[6].mxu0 %v602_v13  ;;  %7789 = vst [vmem:[#allocation75_spill] sm:$0xff] %v5148_v36  ;;  %7790 = vst [vmem:[#allocation76_spill] sm:$0xff] %v5152_v1  ;;  %v529_v10 = vld [vmem:[%s4799_s28 + $0xc0] sm:$0xff]  ;;  %v5160_v13 = vpack.c.bf16 %v423_v4, %v419_v19  ;;  %v5165_v46 = vmul.f32 %v4954_v47, %v530_v55  ;;  %v434_v2 = vld [vmem:[#allocation7 + $0x5c8] sm:$0xff] }
  0xc0   : > { %7788 = vst [vmem:[#allocation74_spill] sm:$0xff] %v5143_v61  ;;  %710 = vmatprep.mubr.f32.mxu0 %v607_v42  ;;  %v611_v9 = vmul.f32 %v5143_v61, %v5143_v61  ;;  %7792 = vst [vmem:[#allocation78_spill] sm:$0xff] %v5162_v44  ;;  %v431_v61 = vld [vmem:[#allocation7 + $0x5b0] sm:$0xff]  ;;  %936 = vmatprep.mubr.f32.mxu1 %v607_v42  ;;  %v436_v19 = vld [vmem:[#allocation7 + $0x5d8] sm:$0xff]  ;;  %v610_v37 = vmul.f32 %v5148_v36, %v5148_v36 }
  0xc1   : > { %3355 = vmatpush1.bf16.msra.mxu0 %v5127_v58  ;;  %7791 = vst [vmem:[#allocation77_spill] sm:$0xff] %v5160_v13  ;;  %v427_v58 = vld [vmem:[#allocation7 + $0x590] sm:$0xff]  ;;  %7793 = vst [vmem:[#allocation79_spill] sm:$0xff] %v5165_v46  ;;  %v440_v4 = vld [vmem:[#allocation7 + $0x5f8] sm:$0xff]  ;;  %937 = vmatmul.mubr.f32.gmra.mrb[8].mxu1 %v606_v11  ;;  %v5173_v20 = vmul.f32 %v5002_v27, %v529_v10  ;;  %v5180_v22 = vpack.c.bf16 %v429_v31, %v425_v28 }
  0xc2   : > { %3483 = vmatpush1.bf16.msra.mxu1 %v5133_v24  ;;  %3357 = vmatprep.subr.bf16.mxu0 %v5135_v57  ;;  %7794 = vst [vmem:[#allocation80_spill] sm:$0xff] %v5168_v59  ;;  %v438_v24 = vld [vmem:[#allocation7 + $0x5e8] sm:$0xff]  ;;  %v615_v42 = vmul.f32 %v5165_v46, %v5165_v46  ;;  %v5190_v10 = vpack.c.bf16 %v431_v61, %v427_v58  ;;  %v437_v28 = vld [vmem:[#allocation7 + $0x5e0] sm:$0xff]  ;;  %v435_v31 = vld [vmem:[#allocation7 + $0x5d0] sm:$0xff] }
  0xc3   : > { %3485 = vmatprep.subr.bf16.mxu1 %v5140_v40  ;;  %711 = vmatmul.mubr.f32.gmra.mrb[8].mxu0 %v606_v11  ;;  %7795 = vst [vmem:[#allocation81_spill] sm:$0xff] %v5173_v20  ;;  %v534_v55 = vld [vmem:[%s4799_s28 + $0xe8] sm:$0xff]  ;;  %v5177_v40 = vrot.slane %v4950_v29, %v552_v60  ;;  %7796 = vst [vmem:[#allocation82_spill] sm:$0xff] %v5180_v22  ;;  %v533_v11 = vld [vmem:[%s4799_s28 + $0xe0] sm:$0xff]  ;;  %v5192_v29 = vpack.c.bf16 %v438_v24, %v434_v2 }
  0xc4   : > { %716 = vmatprep.mubr.f32.mxu0 %v611_v9  ;;  %v5185_v6 = vmul.f32 %v4954_v47, %v534_v55  ;;  %v433_v60 = vld [vmem:[#allocation7 + $0x5c0] sm:$0xff]  ;;  %v5195_v36 = vpack.c.bf16 %v440_v4, %v436_v19  ;;  %v439_v46 = vld [vmem:[#allocation7 + $0x5f0] sm:$0xff]  ;;  %v442_v55 = vld [vmem:[#allocation7 + $0x608] sm:$0xff]  ;;  %942 = vmatprep.mubr.f32.mxu1 %v611_v9  ;;  %v614_v61 = vmul.f32 %v5173_v20, %v5173_v20 }
  0xc5   : > { %3359 = vmatpush1.bf16.msra.mxu0 %v5152_v1  ;;  %v446_v1 = vld [vmem:[#allocation7 + $0x628] sm:$0xff]  ;;  %v444_v57 = vld [vmem:[#allocation7 + $0x618] sm:$0xff]  ;;  %943 = vmatmul.mubr.f32.gmra.mrb[10].mxu1 %v610_v37  ;;  %v5200_v2 = vmul.f32 %v5002_v27, %v533_v11  ;;  %v5204_v24 = vpack.c.bf16 %v437_v28, %v433_v60  ;;  %v5213_v4 = vpack.c.bf16 %v439_v46, %v435_v31  ;;  %v441_v11 = vld [vmem:[#allocation7 + $0x600] sm:$0xff] }
  0xc6   : > { %7797 = vst [vmem:[#allocation83_spill] sm:$0xff] %v5185_v6  ;;  %3487 = vmatpush1.bf16.msra.mxu1 %v5160_v13  ;;  %3361 = vmatprep.subr.bf16.mxu0 %v5162_v44  ;;  %7798 = vst [vmem:[#allocation84_spill] sm:$0xff] %v5195_v36  ;;  %v448_v13 = vld [vmem:[#allocation7 + $0x638] sm:$0xff]  ;;  %v619_v19 = vmul.f32 %v5185_v6, %v5185_v6  ;;  %v445_v20 = vld [vmem:[#allocation7 + $0x620] sm:$0xff] }
  0xc7   : > { %3489 = vmatprep.subr.bf16.mxu1 %v5168_v59  ;;  %717 = vmatmul.mubr.f32.gmra.mrb[10].mxu0 %v610_v37  ;;  %7799 = vst [vmem:[#allocation85_spill] sm:$0xff] %v5200_v2  ;;  %v508_v58 = vld [vmem:[%s4799_s28 + $0x18] sm:$0xff]  ;;  %7800 = vst [vmem:[#allocation86_spill] sm:$0xff] %v5204_v24  ;;  %v5215_v37 = vpack.c.bf16 %v446_v1, %v442_v55  ;;  %v5218_v60 = vpack.c.bf16 %v448_v13, %v444_v57  ;;  %v447_v28 = vld [vmem:[#allocation7 + $0x630] sm:$0xff] }
  0xc8   : > { %722 = vmatprep.mubr.f32.mxu0 %v615_v42  ;;  %v5209_v9 = vmul.f32 %v5177_v40, %v508_v58  ;;  %v450_v6 = vld [vmem:[#allocation7 + $0x648] sm:$0xff]  ;;  %948 = vmatprep.mubr.f32.mxu1 %v615_v42  ;;  %v452_v58 = vld [vmem:[#allocation7 + $0x658] sm:$0xff]  ;;  %v618_v46 = vmul.f32 %v5200_v2, %v5200_v2  ;;  %v5223_v1 = vpack.c.bf16 %v445_v20, %v441_v11  ;;  %v449_v31 = vld [vmem:[#allocation7 + $0x640] sm:$0xff] }
  0xc9   : > { %3363 = vmatpush1.bf16.msra.mxu0 %v5180_v22  ;;  %v443_v22 = vld [vmem:[#allocation7 + $0x610] sm:$0xff]  ;;  %7802 = vst [vmem:[#allocation88_spill] sm:$0xff] %v5218_v60  ;;  %v454_v59 = vld [vmem:[#allocation7 + $0x668] sm:$0xff]  ;;  %v456_v44 = vld [vmem:[#allocation7 + $0x678] sm:$0xff]  ;;  %949 = vmatmul.mubr.f32.gmra.mrb[12].mxu1 %v614_v61 }
  0xca   : > { %7801 = vst [vmem:[#allocation87_spill] sm:$0xff] %v5209_v9  ;;  %3491 = vmatpush1.bf16.msra.mxu1 %v5190_v10  ;;  %3365 = vmatprep.subr.bf16.mxu0 %v5192_v29  ;;  %7803 = vst [vmem:[#allocation89_spill] sm:$0xff] %v5223_v1  ;;  %v593_v57 = vmul.f32 %v5209_v9, %v5209_v9  ;;  %v5229_v13 = vpack.c.bf16 %v447_v28, %v443_v22  ;;  %v453_v55 = vld [vmem:[#allocation7 + $0x660] sm:$0xff]  ;;  %v455_v20 = vld [vmem:[#allocation7 + $0x670] sm:$0xff] }
  0xcb   : > { %3493 = vmatprep.subr.bf16.mxu1 %v5195_v36  ;;  %723 = vmatmul.mubr.f32.gmra.mrb[12].mxu0 %v614_v61  ;;  %v5231_v42 = vpack.c.bf16 %v454_v59, %v450_v6  ;;  %v451_v61 = vld [vmem:[#allocation7 + $0x650] sm:$0xff]  ;;  %v5234_v2 = vpack.c.bf16 %v456_v44, %v452_v58  ;;  %v458_v11 = vld [vmem:[#allocation7 + $0x688] sm:$0xff]  ;;  %v460_v9 = vld [vmem:[#allocation7 + $0x698] sm:$0xff]  ;;  %v5237_v22 = vpack.c.bf16 %v453_v55, %v449_v31 }
  0xcc   : > { %728 = vmatprep.mubr.f32.mxu0 %v619_v19  ;;  %954 = vmatprep.mubr.f32.mxu1 %v619_v19  ;;  %v464_v36 = vld [vmem:[#allocation7 + $0x6b8] sm:$0xff]  ;;  %v5241_v59 = vpack.c.bf16 %v455_v20, %v451_v61  ;;  %v457_v6 = vld [vmem:[#allocation7 + $0x680] sm:$0xff]  ;;  %v459_v19 = vld [vmem:[#allocation7 + $0x690] sm:$0xff] }
  0xcd   : > { %3367 = vmatpush1.bf16.msra.mxu0 %v5204_v24  ;;  %7804 = vst [vmem:[#allocation90_spill] sm:$0xff] %v5231_v42  ;;  %7805 = vst [vmem:[#allocation91_spill] sm:$0xff] %v5234_v2  ;;  %v462_v24 = vld [vmem:[#allocation7 + $0x6a8] sm:$0xff]  ;;  %955 = vmatmul.mubr.f32.gmra.mrb[14].mxu1 %v618_v46  ;;  %v461_v28 = vld [vmem:[#allocation7 + $0x6a0] sm:$0xff]  ;;  %v5246_v58 = vpack.c.bf16 %v464_v36, %v460_v9 }
  0xce   : > { %3495 = vmatpush1.bf16.msra.mxu1 %v5213_v4  ;;  %3369 = vmatprep.subr.bf16.mxu0 %v5215_v37  ;;  %7806 = vst [vmem:[#allocation92_spill] sm:$0xff] %v5237_v22  ;;  %7807 = vst [vmem:[#allocation93_spill] sm:$0xff] %v5241_v59  ;;  %v5243_v44 = vpack.c.bf16 %v462_v24, %v458_v11  ;;  %v470_v31 = vld [vmem:[#allocation7 + $0x6e8] sm:$0xff]  ;;  %v468_v55 = vld [vmem:[#allocation7 + $0x6d8] sm:$0xff] }
  0xcf   : > { %3497 = vmatprep.subr.bf16.mxu1 %v5218_v60  ;;  %729 = vmatmul.mubr.f32.gmra.mrb[14].mxu0 %v618_v46  ;;  %7809 = vst [vmem:[#allocation95_spill] sm:$0xff] %v5246_v58  ;;  %v463_v46 = vld [vmem:[#allocation7 + $0x6b0] sm:$0xff]  ;;  %v472_v60 = vld [vmem:[#allocation7 + $0x6f8] sm:$0xff]  ;;  %v465_v36 = vld [vmem:[#allocation7 + $0x6c0] sm:$0xff] }
  0xd0   : > { %799 = vmatprep.mubr.f32.mxu0 %v593_v57  ;;  %7808 = vst [vmem:[#allocation94_spill] sm:$0xff] %v5243_v44  ;;  %1025 = vmatprep.mubr.f32.mxu1 %v593_v57  ;;  %v5253_v24 = vpack.c.bf16 %v463_v46, %v459_v19  ;;  %v469_v9 = vld [vmem:[#allocation7 + $0x6e0] sm:$0xff]  ;;  %v467_v20 = vld [vmem:[#allocation7 + $0x6d0] sm:$0xff]  ;;  %v5258_v57 = vpack.c.bf16 %v472_v60, %v468_v55 }
  0xd1   : > { %3371 = vmatpush1.bf16.msra.mxu0 %v5223_v1  ;;  %v466_v1 = vld [vmem:[#allocation7 + $0x6c8] sm:$0xff]  ;;  %v471_v11 = vld [vmem:[#allocation7 + $0x6f0] sm:$0xff]  ;;  %v473_v46 = vld [vmem:[#allocation7 + $0x700] sm:$0xff] }
  0xd2   : > { %3499 = vmatpush1.bf16.msra.mxu1 %v5229_v13  ;;  %3373 = vmatprep.subr.bf16.mxu0 %v5231_v42  ;;  %v5249_v42 = vpack.c.bf16 %v461_v28, %v457_v6  ;;  %7811 = vst [vmem:[#allocation97_spill] sm:$0xff] %v5253_v24  ;;  %v5255_v61 = vpack.c.bf16 %v470_v31, %v466_v1  ;;  %7813 = vst [vmem:[#allocation99_spill] sm:$0xff] %v5258_v57  ;;  %v476_v6 = vld [vmem:[#allocation7 + $0x718] sm:$0xff]  ;;  %v477_v60 = vld [vmem:[#allocation7 + $0x720] sm:$0xff] }
  0xd3   : > { %3501 = vmatprep.subr.bf16.mxu1 %v5234_v2  ;;  %v474_v2 = vld [vmem:[#allocation7 + $0x708] sm:$0xff]  ;;  %v480_v28 = vld [vmem:[#allocation7 + $0x738] sm:$0xff]  ;;  %v5265_v1 = vpack.c.bf16 %v471_v11, %v467_v20  ;;  %v475_v31 = vld [vmem:[#allocation7 + $0x710] sm:$0xff] }
  0xd4   : > { %7810 = vst [vmem:[#allocation96_spill] sm:$0xff] %v5249_v42  ;;  %7812 = vst [vmem:[#allocation98_spill] sm:$0xff] %v5255_v61  ;;  %v5270_v55 = vpack.c.bf16 %v480_v28, %v476_v6  ;;  %v481_v20 = vld [vmem:[#allocation7 + $0x740] sm:$0xff]  ;;  %v483_v6 = vld [vmem:[#allocation7 + $0x750] sm:$0xff] }
  0xd5   : > { %3375 = vmatpush1.bf16.msra.mxu0 %v5237_v22  ;;  %v478_v22 = vld [vmem:[#allocation7 + $0x728] sm:$0xff]  ;;  %7815 = vst [vmem:[#allocation101_spill] sm:$0xff] %v5265_v1  ;;  %v485_v11 = vld [vmem:[#allocation7 + $0x760] sm:$0xff] }
  0xd6   : > { %3503 = vmatpush1.bf16.msra.mxu1 %v5241_v59  ;;  %3377 = vmatprep.subr.bf16.mxu0 %v5243_v44  ;;  %v5261_v59 = vpack.c.bf16 %v469_v9, %v465_v36  ;;  %v5267_v19 = vpack.c.bf16 %v478_v22, %v474_v2  ;;  %7816 = vst [vmem:[#allocation102_spill] sm:$0xff] %v5270_v55  ;;  %v482_v44 = vld [vmem:[#allocation7 + $0x748] sm:$0xff]  ;;  %v484_v36 = vld [vmem:[#allocation7 + $0x758] sm:$0xff] }
  0xd7   : > { %3505 = vmatprep.subr.bf16.mxu1 %v5246_v58  ;;  %v479_v58 = vld [vmem:[#allocation7 + $0x730] sm:$0xff]  ;;  %v488_v9 = vld [vmem:[#allocation7 + $0x778] sm:$0xff] }
  0xd8   : > { %7814 = vst [vmem:[#allocation100_spill] sm:$0xff] %v5261_v59  ;;  %v5277_v2 = vpack.c.bf16 %v479_v58, %v475_v31  ;;  %v5282_v28 = vpack.c.bf16 %v488_v9, %v484_v36  ;;  %v489_v58 = vld [vmem:[#allocation7 + $0x780] sm:$0xff]  ;;  %v491_v36 = vld [vmem:[#allocation7 + $0x790] sm:$0xff] }
  0xd9   : > { %3379 = vmatpush1.bf16.msra.mxu0 %v5249_v42  ;;  %v486_v42 = vld [vmem:[#allocation7 + $0x768] sm:$0xff]  ;;  %v493_v31 = vld [vmem:[#allocation7 + $0x7a0] sm:$0xff] }
  0xda   : > { %3507 = vmatpush1.bf16.msra.mxu1 %v5253_v24  ;;  %3381 = vmatprep.subr.bf16.mxu0 %v5255_v61  ;;  %v5273_v24 = vpack.c.bf16 %v477_v60, %v473_v46  ;;  %7818 = vst [vmem:[#allocation104_spill] sm:$0xff] %v5277_v2  ;;  %v5279_v22 = vpack.c.bf16 %v486_v42, %v482_v44  ;;  %7820 = vst [vmem:[#allocation106_spill] sm:$0xff] %v5282_v28  ;;  %v490_v61 = vld [vmem:[#allocation7 + $0x788] sm:$0xff]  ;;  %v492_v46 = vld [vmem:[#allocation7 + $0x798] sm:$0xff] }
  0xdb   : > { %3509 = vmatprep.subr.bf16.mxu1 %v5258_v57  ;;  %v487_v57 = vld [vmem:[#allocation7 + $0x770] sm:$0xff]  ;;  %v496_v60 = vld [vmem:[#allocation7 + $0x7b8] sm:$0xff] }
  0xdc   : > { %7817 = vst [vmem:[#allocation103_spill] sm:$0xff] %v5273_v24  ;;  %7819 = vst [vmem:[#allocation105_spill] sm:$0xff] %v5279_v22  ;;  %v5289_v42 = vpack.c.bf16 %v487_v57, %v483_v6  ;;  %v5294_v9 = vpack.c.bf16 %v496_v60, %v492_v46  ;;  %v497_v6 = vld [vmem:[#allocation7 + $0x7c0] sm:$0xff] }
  0xdd   : > { %3383 = vmatpush1.bf16.msra.mxu0 %v5261_v59  ;;  %v494_v59 = vld [vmem:[#allocation7 + $0x7a8] sm:$0xff]  ;;  %v501_v46 = vld [vmem:[#allocation7 + $0x7e0] sm:$0xff] }
  0xde   : > { %3511 = vmatpush1.bf16.msra.mxu1 %v5265_v1  ;;  %3385 = vmatprep.subr.bf16.mxu0 %v5267_v19  ;;  %v5285_v1 = vpack.c.bf16 %v485_v11, %v481_v20  ;;  %v5291_v44 = vpack.c.bf16 %v494_v59, %v490_v61  ;;  %v502_v20 = vld [vmem:[#allocation7 + $0x7e8] sm:$0xff]  ;;  %v500_v11 = vld [vmem:[#allocation7 + $0x7d8] sm:$0xff]  ;;  %v507_v59 = vld [vmem:[%s4799_s28 + $0x10] sm:$0xff] }
  0xdf   : > { %3513 = vmatprep.subr.bf16.mxu1 %v5270_v55  ;;  %v495_v55 = vld [vmem:[#allocation7 + $0x7b0] sm:$0xff] }
  0xe0   : > { %7821 = vst [vmem:[#allocation107_spill] sm:$0xff] %v5285_v1  ;;  %v5302_v61 = vpack.c.bf16 %v495_v55, %v491_v36  ;;  %v5314_v55 = vpack.c.bf16 %v501_v46, %v497_v6  ;;  %v515_v6 = vld [vmem:[%s4799_s28 + $0x50] sm:$0xff] }
  0xe1   : > { %3387 = vmatpush1.bf16.msra.mxu0 %v5273_v24  ;;  %v498_v24 = vld [vmem:[#allocation7 + $0x7c8] sm:$0xff] }
  0xe2   : > { %3515 = vmatpush1.bf16.msra.mxu1 %v5277_v2  ;;  %3389 = vmatprep.subr.bf16.mxu0 %v5279_v22  ;;  %v504_v2 = vld [vmem:[#allocation7 + $0x7f8] sm:$0xff]  ;;  %v5297_v22 = vpack.c.bf16 %v493_v31, %v489_v58  ;;  %v5304_v57 = vpack.c.bf16 %v502_v20, %v498_v24  ;;  %v503_v58 = vld [vmem:[#allocation7 + $0x7f0] sm:$0xff] }
  0xe3   : > { %3517 = vmatprep.subr.bf16.mxu1 %v5282_v28  ;;  %v5307_v60 = vpack.c.bf16 %v504_v2, %v500_v11  ;;  %v512_v31 = vld [vmem:[%s4799_s28 + $0x38] sm:$0xff]  ;;  %v5311_v28 = vmul.f32 %v4957_v54, %v507_v59  ;;  %v511_v24 = vld [vmem:[%s4799_s28 + $0x30] sm:$0xff] }
  0xe4   : > { %v5322_v2 = vmul.f32 %v5177_v40, %v512_v31  ;;  %v516_v20 = vld [vmem:[%s4799_s28 + $0x58] sm:$0xff]  ;;  %v5329_v59 = vmul.f32 %v4957_v54, %v511_v24  ;;  %v5345_v24 = vmul.f32 %v4957_v54, %v515_v6 }
  0xe5   : > { %3391 = vmatpush1.bf16.msra.mxu0 %v5285_v1  ;;  %v499_v1 = vld [vmem:[#allocation7 + $0x7d0] sm:$0xff]  ;;  %7822 = vst [vmem:[#allocation108_spill] sm:$0xff] %v5311_v28  ;;  %v592_v11 = vmul.f32 %v5311_v28, %v5311_v28  ;;  %v5338_v46 = vmul.f32 %v5177_v40, %v516_v20  ;;  %v524_v6 = vld [vmem:[%s4799_s28 + $0x98] sm:$0xff] }
  0xe6   : > { %3519 = vmatpush1.bf16.msra.mxu1 %v5289_v42  ;;  %3393 = vmatprep.subr.bf16.mxu0 %v5291_v44  ;;  %v5319_v36 = vpack.c.bf16 %v503_v58, %v499_v1  ;;  %7823 = vst [vmem:[#allocation109_spill] sm:$0xff] %v5322_v2  ;;  %7824 = vst [vmem:[#allocation110_spill] sm:$0xff] %v5329_v59  ;;  %v597_v1 = vmul.f32 %v5322_v2, %v5322_v2  ;;  %v520_v58 = vld [vmem:[%s4799_s28 + $0x78] sm:$0xff] }
  0xe7   : > { %3521 = vmatprep.subr.bf16.mxu1 %v5294_v9  ;;  %7825 = vst [vmem:[#allocation111_spill] sm:$0xff] %v5338_v46  ;;  %v596_v31 = vmul.f32 %v5329_v59, %v5329_v59  ;;  %7826 = vst [vmem:[#allocation112_spill] sm:$0xff] %v5345_v24  ;;  %v601_v20 = vmul.f32 %v5338_v46, %v5338_v46  ;;  %v1437_v59 = vld [vmem:[#allocation5 + $0x158] sm:$0xff] }
  0xe8   : > { %v1441_v28 = vld [vmem:[#allocation5 + $0x178] sm:$0xff] }
  0xe9   : > { %3395 = vmatpush1.bf16.msra.mxu0 %v5297_v22 }
  0xea   : > { %3523 = vmatpush1.bf16.msra.mxu1 %v5302_v61  ;;  %3397 = vmatprep.subr.bf16.mxu0 %v5304_v57 }
  0xeb   : > { %3525 = vmatprep.subr.bf16.mxu1 %v5307_v60 }
  0xed   : > { %3399 = vmatpush1.bf16.msra.mxu0 %v5314_v55 }
  0xee   : > { %3527 = vmatpush1.bf16.msra.mxu1 %v5319_v36  ;;  %3529 = vmatprep.subr.bf16.mxu0 %v4809_v3  ;;  %v519_v3 = vld [vmem:[%s4799_s28 + $0x70] sm:$0xff] }
  0xef   : > { %3657 = vmatprep.subr.bf16.mxu1 %v4811_v7  ;;  %v5353_v7 = vmul.f32 %v5177_v40, %v520_v58  ;;  %v527_v58 = vld [vmem:[%s4799_s28 + $0xb0] sm:$0xff] }
  0xf0   : > { %800 = vmatmul.mubr.f32.vlgmr.msra.gmra.mrb[0].mxu0 %v592_v11 }
  0xf1   : > { %1026 = vmatmul.mubr.f32.vlgmr.msra.gmra.mrb[0].mxu1 %v592_v11  ;;  %3531 = vmatpush1.bf16.msra.mxu0 %v4813_v8  ;;  %7827 = vst [vmem:[#allocation113_spill] sm:$0xff] %v5353_v7  ;;  %v600_v8 = vmul.f32 %v5345_v24, %v5345_v24  ;;  %v523_v11 = vld [vmem:[%s4799_s28 + $0x90] sm:$0xff]  ;;  %v1433_v24 = vld [vmem:[#allocation5 + $0x138] sm:$0xff] }
  0xf2   : > { %3659 = vmatpush1.bf16.msra.mxu1 %v4816_v12  ;;  %805 = vmatprep.mubr.f32.mxu0 %v597_v1  ;;  %v5361_v12 = vmul.f32 %v4957_v54, %v519_v3  ;;  %v531_v3 = vld [vmem:[%s4799_s28 + $0xd0] sm:$0xff] }
  0xf3   : > { %1031 = vmatprep.mubr.f32.mxu1 %v597_v1  ;;  %3533 = vmatprep.subr.bf16.mxu0 %v4820_v16  ;;  %v605_v16 = vmul.f32 %v5353_v7, %v5353_v7  ;;  %v5369_v1 = vmul.f32 %v5177_v40, %v524_v6  ;;  %v5409_v6 = vmul.f32 %v4957_v54, %v531_v3  ;;  %v7854_v3 = vld [vmem:[#allocation30_spill] sm:$0xff] }
  0xf4   : > { %806 = vmatmul.mubr.f32.gmra.mrb[2].mxu0 %v596_v31  ;;  %3661 = vmatprep.subr.bf16.mxu1 %v4822_v17  ;;  %7828 = vst [vmem:[#allocation114_spill] sm:$0xff] %v5361_v12  ;;  %v528_v17 = vld [vmem:[%s4799_s28 + $0xb8] sm:$0xff] }
  0xf5   : > { %1032 = vmatmul.mubr.f32.gmra.mrb[2].mxu1 %v596_v31  ;;  %3535 = vmatpush1.bf16.msra.mxu0 %v4825_v21  ;;  %7829 = vst [vmem:[#allocation115_spill] sm:$0xff] %v5369_v1  ;;  %v604_v21 = vmul.f32 %v5361_v12, %v5361_v12  ;;  %v5385_v31 = vmul.f32 %v5177_v40, %v528_v17  ;;  %7834 = vst [vmem:[#allocation120_spill] sm:$0xff] %v5409_v6  ;;  %v7848_v17 = vld [vmem:[#allocation23_spill] sm:$0xff] }
  0xf6   : > { %3663 = vmatpush1.bf16.msra.mxu1 %v4829_v25  ;;  %811 = vmatprep.mubr.f32.mxu0 %v601_v20  ;;  %v5377_v25 = vmul.f32 %v4957_v54, %v523_v11  ;;  %v1429_v12 = vld [vmem:[#allocation5 + $0x118] sm:$0xff] }
  0xf7   : > { %1037 = vmatprep.mubr.f32.mxu1 %v601_v20  ;;  %3537 = vmatprep.subr.bf16.mxu0 %v4831_v26  ;;  %v609_v26 = vmul.f32 %v5369_v1, %v5369_v1  ;;  %7831 = vst [vmem:[#allocation117_spill] sm:$0xff] %v5385_v31 }
  0xf8   : > { %812 = vmatmul.mubr.f32.gmra.mrb[4].mxu0 %v600_v8  ;;  %3665 = vmatprep.subr.bf16.mxu1 %v4833_v30  ;;  %7830 = vst [vmem:[#allocation116_spill] sm:$0xff] %v5377_v25  ;;  %v532_v30 = vld [vmem:[%s4799_s28 + $0xd8] sm:$0xff] }
  0xf9   : > { %1038 = vmatmul.mubr.f32.gmra.mrb[4].mxu1 %v600_v8  ;;  %3539 = vmatpush1.bf16.msra.mxu0 %v4836_v34  ;;  %v608_v34 = vmul.f32 %v5377_v25, %v5377_v25  ;;  %v5401_v20 = vmul.f32 %v5177_v40, %v532_v30  ;;  %v7852_v30 = vld [vmem:[#allocation27_spill] sm:$0xff]  ;;  %v1396_v25 = vld [vmem:[#allocation5 + $0x10] sm:$0xff] }
  0xfa   : > { %3667 = vmatpush1.bf16.msra.mxu1 %v4840_v38  ;;  %817 = vmatprep.mubr.f32.mxu0 %v605_v16  ;;  %v5393_v38 = vmul.f32 %v4957_v54, %v527_v58  ;;  %v7850_v58 = vld [vmem:[#allocation25_spill] sm:$0xff] }
  0xfb   : > { %1043 = vmatprep.mubr.f32.mxu1 %v605_v16  ;;  %3541 = vmatprep.subr.bf16.mxu0 %v4842_v39  ;;  %v613_v39 = vmul.f32 %v5385_v31, %v5385_v31  ;;  %7833 = vst [vmem:[#allocation119_spill] sm:$0xff] %v5401_v20  ;;  %v7847_v16 = vld [vmem:[#allocation22_spill] sm:$0xff]  ;;  %v7937_v31 = vld [vmem:[#allocation104_spill] sm:$0xff] }
  0xfc   : > { %818 = vmatmul.mubr.f32.gmra.mrb[6].mxu0 %v604_v21  ;;  %3669 = vmatprep.subr.bf16.mxu1 %v4845_v43  ;;  %7832 = vst [vmem:[#allocation118_spill] sm:$0xff] %v5393_v38  ;;  %v536_v43 = vld [vmem:[%s4799_s28 + $0xf8] sm:$0xff] }
  0xfd   : > { %1044 = vmatmul.mubr.f32.gmra.mrb[6].mxu1 %v604_v21  ;;  %3543 = vmatpush1.bf16.msra.mxu0 %v4848_v50  ;;  %v612_v50 = vmul.f32 %v5393_v38, %v5393_v38  ;;  %v5417_v8 = vmul.f32 %v5177_v40, %v536_v43  ;;  %v7849_v21 = vld [vmem:[#allocation24_spill] sm:$0xff]  ;;  %v7932_v38 = vld [vmem:[#allocation101_spill] sm:$0xff] }
  0xfe   : > { %3671 = vmatpush1.bf16.msra.mxu1 %v4852_v51  ;;  %823 = vmatprep.mubr.f32.mxu0 %v609_v26  ;;  %v535_v51 = vld [vmem:[%s4799_s28 + $0xf0] sm:$0xff]  ;;  %v7856_v43 = vld [vmem:[#allocation32_spill] sm:$0xff] }
  0xff   : > { %1049 = vmatprep.mubr.f32.mxu1 %v609_v26  ;;  %3545 = vmatprep.subr.bf16.mxu0 %v4854_v52  ;;  %v617_v52 = vmul.f32 %v5401_v20, %v5401_v20  ;;  %7835 = vst [vmem:[#allocation121_spill] sm:$0xff] %v5417_v8  ;;  %v621_v11 = vmul.f32 %v5417_v8, %v5417_v8  ;;  %v7851_v26 = vld [vmem:[#allocation26_spill] sm:$0xff]  ;;  %v1446_v8 = vld [vmem:[#allocation5 + $0x1a0] sm:$0xff] }
 0x100   : > { %824 = vmatmul.mubr.f32.gmra.mrb[8].mxu0 %v608_v34  ;;  %3673 = vmatprep.subr.bf16.mxu1 %v4857_v56  ;;  %v616_v56 = vmul.f32 %v5409_v6, %v5409_v6  ;;  %v7926_v6 = vld [vmem:[#allocation97_spill] sm:$0xff]  ;;  %v1450_v20 = vld [vmem:[#allocation5 + $0x1c0] sm:$0xff] }
 0x101   : > { %1050 = vmatmul.mubr.f32.gmra.mrb[8].mxu1 %v608_v34  ;;  %3547 = vmatpush1.bf16.msra.mxu0 %v4860_v62  ;;  %v5424_v62 = vmul.f32 %v4957_v54, %v535_v51  ;;  %v7853_v34 = vld [vmem:[#allocation29_spill] sm:$0xff]  ;;  %v7858_v51 = vld [vmem:[#allocation34_spill] sm:$0xff] }
 0x102   : > { %3675 = vmatpush1.bf16.msra.mxu1 %v4864_v63  ;;  %829 = vmatprep.mubr.f32.mxu0 %v613_v39  ;;  %v1395_v63 = vld [vmem:[#allocation5 + $0x8] sm:$0xff] }
 0x103   : > { %1055 = vmatprep.mubr.f32.mxu1 %v613_v39  ;;  %3549 = vmatprep.subr.bf16.mxu0 %v4866_v0  ;;  %7836 = vst [vmem:[#allocation122_spill] sm:$0xff] %v5424_v62  ;;  %v5432_v0 = vmul.f32 %v1395_v63, %v4954_v47  ;;  %v7855_v39 = vld [vmem:[#allocation31_spill] sm:$0xff]  ;;  %v7860_v63 = vld [vmem:[#allocation36_spill] sm:$0xff] }
 0x104   : > { %830 = vmatmul.mubr.f32.gmra.mrb[10].mxu0 %v612_v50  ;;  %3677 = vmatprep.subr.bf16.mxu1 %v4869_v5  ;;  %v620_v5 = vmul.f32 %v5424_v62, %v5424_v62  ;;  %v7920_v62 = vld [vmem:[#allocation93_spill] sm:$0xff] }
 0x105   : > { %1056 = vmatmul.mubr.f32.gmra.mrb[10].mxu1 %v612_v50  ;;  %3551 = vmatpush1.bf16.msra.mxu0 %v4872_v14  ;;  %v1523_v14 = vmul.f32 %v5432_v0, %v5432_v0  ;;  %v7857_v50 = vld [vmem:[#allocation33_spill] sm:$0xff] }
 0x106   : > { %3679 = vmatpush1.bf16.msra.mxu1 %v4876_v15  ;;  %835 = vmatprep.mubr.f32.mxu0 %v617_v52  ;;  %v7837_v15 = vld [vmem:[#allocation12_spill] sm:$0xff] }
 0x107   : > { %1061 = vmatprep.mubr.f32.mxu1 %v617_v52  ;;  %3553 = vmatprep.subr.bf16.mxu0 %v4878_v18  ;;  %v7838_v18 = vld [vmem:[#allocation13_spill] sm:$0xff]  ;;  %v1394_v52 = vld [vmem:[#allocation5] sm:$0xff] }
 0x108   : > { %836 = vmatmul.mubr.f32.gmra.mrb[12].mxu0 %v616_v56  ;;  %3681 = vmatprep.subr.bf16.mxu1 %v4881_v23  ;;  %v7839_v23 = vld [vmem:[#allocation14_spill] sm:$0xff] }
 0x109   : > { %1062 = vmatmul.mubr.f32.gmra.mrb[12].mxu1 %v616_v56  ;;  %3555 = vmatpush1.bf16.msra.mxu0 %v4884_v32  ;;  %v7840_v32 = vld [vmem:[#allocation15_spill] sm:$0xff] }
 0x10a   : > { %3683 = vmatpush1.bf16.msra.mxu1 %v4888_v33  ;;  %841 = vmatprep.mubr.f32.mxu0 %v621_v11  ;;  %v7841_v33 = vld [vmem:[#allocation16_spill] sm:$0xff]  ;;  %v7859_v56 = vld [vmem:[#allocation35_spill] sm:$0xff] }
 0x10b   : > { %1067 = vmatprep.mubr.f32.mxu1 %v621_v11  ;;  %3557 = vmatprep.subr.bf16.mxu0 %v4890_v35  ;;  %v7842_v35 = vld [vmem:[#allocation17_spill] sm:$0xff] }
 0x10c   : > { %842 = vmatmul.mubr.f32.gmra.mrb[14].mxu0 %v620_v5  ;;  %3685 = vmatprep.subr.bf16.mxu1 %v4893_v41  ;;  %v7843_v41 = vld [vmem:[#allocation18_spill] sm:$0xff]  ;;  %v7861_v11 = vld [vmem:[#allocation37_spill] sm:$0xff] }
 0x10d   : > { %1068 = vmatmul.mubr.f32.gmra.mrb[14].mxu1 %v620_v5  ;;  %3559 = vmatpush1.bf16.msra.mxu0 %v4896_v48  ;;  %v7844_v48 = vld [vmem:[#allocation19_spill] sm:$0xff]  ;;  %v1399_v5 = vld [vmem:[#allocation5 + $0x28] sm:$0xff] }
 0x10e   : > { %3687 = vmatpush1.bf16.msra.mxu1 %v4900_v49  ;;  %3561 = vmatprep.subr.bf16.mxu0 %v4902_v53  ;;  %v7845_v49 = vld [vmem:[#allocation20_spill] sm:$0xff]  ;;  %v7846_v53 = vld [vmem:[#allocation21_spill] sm:$0xff] }
 0x10f   : > { %3689 = vmatprep.subr.bf16.mxu1 %v7837_v15  ;;  %1650 = vmatprep.mubr.f32.mxu0 %v1523_v14  ;;  %v7862_v15 = vld [vmem:[#allocation38_spill] sm:$0xff] }
 0x110   : > { %1972 = vmatprep.mubr.f32.mxu1 %v1523_v14  ;;  %v5472_v14 = vmul.f32 %v1394_v52, %v5002_v27 }
 0x111   : > { %3563 = vmatpush1.bf16.msra.mxu0 %v7838_v18  ;;  %v1398_v18 = vld [vmem:[#allocation5 + $0x20] sm:$0xff] }
 0x112   : > { %3691 = vmatpush1.bf16.msra.mxu1 %v7839_v23  ;;  %3565 = vmatprep.subr.bf16.mxu0 %v7840_v32  ;;  %v7863_v23 = vld [vmem:[#allocation39_spill] sm:$0xff]  ;;  %v7864_v32 = vld [vmem:[#allocation40_spill] sm:$0xff] }
 0x113   : > { %3693 = vmatprep.subr.bf16.mxu1 %v7841_v33  ;;  %v5478_v33 = vmul.f32 %v1399_v5, %v4954_v47  ;;  %v7875_v5 = vld [vmem:[#allocation50_spill] sm:$0xff] }
 0x115   : > { %3567 = vmatpush1.bf16.msra.mxu0 %v7842_v35  ;;  %v7865_v35 = vld [vmem:[#allocation41_spill] sm:$0xff] }
 0x116   : > { %3695 = vmatpush1.bf16.msra.mxu1 %v7843_v41  ;;  %3569 = vmatprep.subr.bf16.mxu0 %v7844_v48  ;;  %v1403_v41 = vld [vmem:[#allocation5 + $0x48] sm:$0xff]  ;;  %v1522_v48 = vmul.f32 %v5472_v14, %v5472_v14 }
 0x117   : > { %3697 = vmatprep.subr.bf16.mxu1 %v7845_v49  ;;  %v5484_v49 = vmul.f32 %v1398_v18, %v5002_v27 }
 0x119   : > { %3571 = vmatpush1.bf16.msra.mxu0 %v7846_v53  ;;  %v7866_v53 = vld [vmem:[#allocation43_spill] sm:$0xff] }
 0x11a   : > { %3699 = vmatpush1.bf16.msra.mxu1 %v7847_v16  ;;  %3573 = vmatprep.subr.bf16.mxu0 %v7848_v17  ;;  %v1402_v16 = vld [vmem:[#allocation5 + $0x40] sm:$0xff] }
 0x11b   : > { %3701 = vmatprep.subr.bf16.mxu1 %v7849_v21  ;;  %v7867_v17 = vld [vmem:[#allocation44_spill] sm:$0xff]  ;;  %v7868_v21 = vld [vmem:[#allocation45_spill] sm:$0xff] }
 0x11d   : > { %3575 = vmatpush1.bf16.msra.mxu0 %v7850_v58  ;;  %v1527_v58 = vmul.f32 %v5478_v33, %v5478_v33 }
 0x11e   : > { %3703 = vmatpush1.bf16.msra.mxu1 %v7851_v26  ;;  %3577 = vmatprep.subr.bf16.mxu0 %v7852_v30  ;;  %v5492_v26 = vmul.f32 %v1403_v41, %v4954_v47  ;;  %v7869_v30 = vld [vmem:[#allocation46_spill] sm:$0xff] }
 0x11f   : > { %3705 = vmatprep.subr.bf16.mxu1 %v7853_v34  ;;  %v1407_v34 = vld [vmem:[#allocation5 + $0x68] sm:$0xff] }
 0x120   : > { %v1531_v52 = vmul.f32 %v5492_v26, %v5492_v26 }
 0x121   : > { %3579 = vmatpush1.bf16.msra.mxu0 %v7854_v3  ;;  %v1526_v3 = vmul.f32 %v5484_v49, %v5484_v49 }
 0x122   : > { %3707 = vmatpush1.bf16.msra.mxu1 %v7855_v39  ;;  %3581 = vmatprep.subr.bf16.mxu0 %v7856_v43  ;;  %v5498_v39 = vmul.f32 %v1402_v16, %v5002_v27  ;;  %v7871_v43 = vld [vmem:[#allocation47_spill] sm:$0xff]  ;;  %v1415_v16 = vld [vmem:[#allocation5 + $0xa8] sm:$0xff] }
 0x123   : > { %3709 = vmatprep.subr.bf16.mxu1 %v7857_v50  ;;  %v1406_v50 = vld [vmem:[#allocation5 + $0x60] sm:$0xff] }
 0x124   : > { %7870 = vst [vmem:[#allocation12_spill] sm:$0xff] %v5498_v39  ;;  %v5512_v18 = vmul.f32 %v1406_v50, %v5002_v27  ;;  %v1419_v50 = vld [vmem:[#allocation5 + $0xc8] sm:$0xff] }
 0x125   : > { %3583 = vmatpush1.bf16.msra.mxu0 %v7858_v51  ;;  %v7872_v51 = vld [vmem:[#allocation48_spill] sm:$0xff] }
 0x126   : > { %3711 = vmatpush1.bf16.msra.mxu1 %v7859_v56  ;;  %3585 = vmatprep.subr.bf16.mxu0 %v7860_v63  ;;  %v5505_v56 = vmul.f32 %v1407_v34, %v4954_v47  ;;  %v7874_v63 = vld [vmem:[#allocation49_spill] sm:$0xff]  ;;  %7876 = vst [vmem:[#allocation14_spill] sm:$0xff] %v5512_v18  ;;  %v7883_v34 = vld [vmem:[#allocation59_spill] sm:$0xff] }
 0x127   : > { %3713 = vmatprep.subr.bf16.mxu1 %v7861_v11  ;;  %v1411_v11 = vld [vmem:[#allocation5 + $0x88] sm:$0xff] }
 0x128   : > { %7873 = vst [vmem:[#allocation13_spill] sm:$0xff] %v5505_v56  ;;  %v1535_v41 = vmul.f32 %v5505_v56, %v5505_v56 }
 0x129   : > { %3587 = vmatpush1.bf16.msra.mxu0 %v7862_v15  ;;  %v1530_v15 = vmul.f32 %v5498_v39, %v5498_v39 }
 0x12a   : > { %3715 = vmatpush1.bf16.msra.mxu1 %v7863_v23  ;;  %3589 = vmatprep.subr.bf16.mxu0 %v7864_v32  ;;  %v7877_v23 = vld [vmem:[#allocation51_spill] sm:$0xff]  ;;  %v1410_v32 = vld [vmem:[#allocation5 + $0x80] sm:$0xff] }
 0x12b   : > { %3717 = vmatprep.subr.bf16.mxu1 %v7865_v35  ;;  %v7878_v35 = vld [vmem:[#allocation53_spill] sm:$0xff] }
 0x12d   : > { %3591 = vmatpush1.bf16.msra.mxu0 %v7866_v53  ;;  %v7880_v53 = vld [vmem:[#allocation54_spill] sm:$0xff] }
 0x12e   : > { %3719 = vmatpush1.bf16.msra.mxu1 %v7867_v17  ;;  %3593 = vmatprep.subr.bf16.mxu0 %v7868_v21  ;;  %v1534_v17 = vmul.f32 %v5512_v18, %v5512_v18  ;;  %v5526_v21 = vmul.f32 %v1410_v32, %v5002_v27  ;;  %v5547_v32 = vmul.f32 %v1419_v50, %v4954_v47  ;;  %v7897_v50 = vld [vmem:[#allocation72_spill] sm:$0xff] }
 0x12f   : > { %3721 = vmatprep.subr.bf16.mxu1 %v7869_v30  ;;  %v1414_v30 = vld [vmem:[#allocation5 + $0xa0] sm:$0xff] }
 0x130   : > { %1651 = vmatmul.mubr.f32.vlgmr.msra.gmra.mrb[16].mxu0 %v1522_v48  ;;  %7881 = vst [vmem:[#allocation16_spill] sm:$0xff] %v5526_v21  ;;  %7890 = vst [vmem:[#allocation19_spill] sm:$0xff] %v5547_v32 }
 0x131   : > { %1973 = vmatmul.mubr.f32.vlgmr.msra.gmra.mrb[16].mxu1 %v1522_v48  ;;  %3595 = vmatpush1.bf16.msra.mxu0 %v7871_v43  ;;  %v5519_v48 = vmul.f32 %v1411_v11, %v4954_v47  ;;  %v5533_v43 = vmul.f32 %v1415_v16, %v4954_v47  ;;  %v7888_v11 = vld [vmem:[#allocation64_spill] sm:$0xff] }
 0x132   : > { %3723 = vmatpush1.bf16.msra.mxu1 %v7872_v51  ;;  %1656 = vmatprep.mubr.f32.mxu0 %v1527_v58  ;;  %v7886_v51 = vld [vmem:[#allocation61_spill] sm:$0xff] }
 0x133   : > { %1978 = vmatprep.mubr.f32.mxu1 %v1527_v58  ;;  %3597 = vmatprep.subr.bf16.mxu0 %v7874_v63  ;;  %7879 = vst [vmem:[#allocation15_spill] sm:$0xff] %v5519_v48  ;;  %v7882_v58 = vld [vmem:[#allocation56_spill] sm:$0xff]  ;;  %7884 = vst [vmem:[#allocation17_spill] sm:$0xff] %v5533_v43  ;;  %v5540_v63 = vmul.f32 %v1414_v30, %v5002_v27 }
 0x134   : > { %1657 = vmatmul.mubr.f32.gmra.mrb[18].mxu0 %v1526_v3  ;;  %3725 = vmatprep.subr.bf16.mxu1 %v7875_v5  ;;  %v1418_v5 = vld [vmem:[#allocation5 + $0xc0] sm:$0xff] }
 0x135   : > { %1979 = vmatmul.mubr.f32.gmra.mrb[18].mxu1 %v1526_v3  ;;  %3599 = vmatpush1.bf16.msra.mxu0 %v7877_v23  ;;  %v1539_v3 = vmul.f32 %v5519_v48, %v5519_v48  ;;  %7887 = vst [vmem:[#allocation18_spill] sm:$0xff] %v5540_v63  ;;  %v1543_v23 = vmul.f32 %v5533_v43, %v5533_v43  ;;  %v1422_v30 = vld [vmem:[#allocation5 + $0xe0] sm:$0xff] }
 0x136   : > { %3727 = vmatpush1.bf16.msra.mxu1 %v7878_v35  ;;  %1662 = vmatprep.mubr.f32.mxu0 %v1531_v52  ;;  %v7891_v35 = vld [vmem:[#allocation66_spill] sm:$0xff]  ;;  %v1542_v16 = vmul.f32 %v5540_v63, %v5540_v63 }
 0x137   : > { %1984 = vmatprep.mubr.f32.mxu1 %v1531_v52  ;;  %3601 = vmatprep.subr.bf16.mxu0 %v7880_v53  ;;  %v1538_v52 = vmul.f32 %v5526_v21, %v5526_v21  ;;  %v7892_v53 = vld [vmem:[#allocation67_spill] sm:$0xff] }
 0x138   : > { %1663 = vmatmul.mubr.f32.gmra.mrb[20].mxu0 %v1530_v15  ;;  %3729 = vmatprep.subr.bf16.mxu1 %v5064_v45  ;;  %v7885_v45 = vld [vmem:[#allocation60_spill] sm:$0xff] }
 0x139   : > { %1985 = vmatmul.mubr.f32.gmra.mrb[20].mxu1 %v1530_v15  ;;  %3603 = vmatpush1.bf16.msra.mxu0 %v7882_v58  ;;  %v7889_v15 = vld [vmem:[#allocation65_spill] sm:$0xff]  ;;  %v7894_v58 = vld [vmem:[#allocation70_spill] sm:$0xff] }
 0x13a   : > { %3731 = vmatpush1.bf16.msra.mxu1 %v7883_v34  ;;  %1668 = vmatprep.mubr.f32.mxu0 %v1535_v41  ;;  %v7895_v34 = vld [vmem:[#allocation71_spill] sm:$0xff] }
 0x13b   : > { %1990 = vmatprep.mubr.f32.mxu1 %v1535_v41  ;;  %3605 = vmatprep.subr.bf16.mxu0 %v7885_v45  ;;  %v1423_v41 = vld [vmem:[#allocation5 + $0xe8] sm:$0xff] }
 0x13c   : > { %1669 = vmatmul.mubr.f32.gmra.mrb[22].mxu0 %v1534_v17  ;;  %3733 = vmatprep.subr.bf16.mxu1 %v7886_v51  ;;  %v5561_v45 = vmul.f32 %v1423_v41, %v4954_v47  ;;  %v1427_v51 = vld [vmem:[#allocation5 + $0x108] sm:$0xff] }
 0x13d   : > { %1991 = vmatmul.mubr.f32.gmra.mrb[22].mxu1 %v1534_v17  ;;  %3607 = vmatpush1.bf16.msra.mxu0 %v7888_v11  ;;  %v5554_v17 = vmul.f32 %v1418_v5, %v5002_v27  ;;  %v7898_v11 = vld [vmem:[#allocation73_spill] sm:$0xff]  ;;  %v5568_v5 = vmul.f32 %v1422_v30, %v5002_v27  ;;  %v5575_v41 = vmul.f32 %v1427_v51, %v4954_v47  ;;  %v7904_v30 = vld [vmem:[#allocation80_spill] sm:$0xff] }
 0x13e   : > { %3735 = vmatpush1.bf16.msra.mxu1 %v7889_v15  ;;  %1674 = vmatprep.mubr.f32.mxu0 %v1539_v3  ;;  %7896 = vst [vmem:[#allocation21_spill] sm:$0xff] %v5561_v45  ;;  %v7900_v15 = vld [vmem:[#allocation76_spill] sm:$0xff] }
 0x13f   : > { %1996 = vmatprep.mubr.f32.mxu1 %v1539_v3  ;;  %3609 = vmatprep.subr.bf16.mxu0 %v7891_v35  ;;  %7893 = vst [vmem:[#allocation20_spill] sm:$0xff] %v5554_v17  ;;  %v1547_v3 = vmul.f32 %v5547_v32, %v5547_v32  ;;  %7899 = vst [vmem:[#allocation22_spill] sm:$0xff] %v5568_v5  ;;  %v1426_v35 = vld [vmem:[#allocation5 + $0x100] sm:$0xff] }
 0x140   : > { %1675 = vmatmul.mubr.f32.gmra.mrb[24].mxu0 %v1538_v52  ;;  %3737 = vmatprep.subr.bf16.mxu1 %v7892_v53  ;;  %v7901_v53 = vld [vmem:[#allocation77_spill] sm:$0xff]  ;;  %7902 = vst [vmem:[#allocation23_spill] sm:$0xff] %v5575_v41 }
 0x141   : > { %1997 = vmatmul.mubr.f32.gmra.mrb[24].mxu1 %v1538_v52  ;;  %3611 = vmatpush1.bf16.msra.mxu0 %v7894_v58  ;;  %v1546_v52 = vmul.f32 %v5554_v17, %v5554_v17  ;;  %v7903_v58 = vld [vmem:[#allocation78_spill] sm:$0xff]  ;;  %v7989_v17 = vld [vmem:[#allocation28_spill] sm:$0xff] }
 0x142   : > { %3739 = vmatpush1.bf16.msra.mxu1 %v7895_v34  ;;  %1680 = vmatprep.mubr.f32.mxu0 %v1543_v23  ;;  %v1431_v34 = vld [vmem:[#allocation5 + $0x128] sm:$0xff] }
 0x143   : > { %2002 = vmatprep.mubr.f32.mxu1 %v1543_v23  ;;  %3613 = vmatprep.subr.bf16.mxu0 %v7897_v50  ;;  %v1551_v23 = vmul.f32 %v5561_v45, %v5561_v45  ;;  %v5582_v50 = vmul.f32 %v1426_v35, %v5002_v27  ;;  %v5589_v51 = vmul.f32 %v1431_v34, %v4954_v47  ;;  %v7908_v35 = vld [vmem:[#allocation84_spill] sm:$0xff]  ;;  %v1439_v34 = vld [vmem:[#allocation5 + $0x168] sm:$0xff] }
 0x144   : > { %1681 = vmatmul.mubr.f32.gmra.mrb[26].mxu0 %v1542_v16  ;;  %3741 = vmatprep.subr.bf16.mxu1 %v7898_v11  ;;  %v7906_v11 = vld [vmem:[#allocation82_spill] sm:$0xff] }
 0x145   : > { %2003 = vmatmul.mubr.f32.gmra.mrb[26].mxu1 %v1542_v16  ;;  %3615 = vmatpush1.bf16.msra.mxu0 %v7900_v15  ;;  %v1550_v16 = vmul.f32 %v5568_v5, %v5568_v5  ;;  %7905 = vst [vmem:[#allocation24_spill] sm:$0xff] %v5582_v50  ;;  %v1430_v15 = vld [vmem:[#allocation5 + $0x120] sm:$0xff]  ;;  %7907 = vst [vmem:[#allocation25_spill] sm:$0xff] %v5589_v51 }
 0x146   : > { %3743 = vmatpush1.bf16.msra.mxu1 %v7901_v53  ;;  %1686 = vmatprep.mubr.f32.mxu0 %v1547_v3  ;;  %v1435_v53 = vld [vmem:[#allocation5 + $0x148] sm:$0xff] }
 0x147   : > { %2008 = vmatprep.mubr.f32.mxu1 %v1547_v3  ;;  %3617 = vmatprep.subr.bf16.mxu0 %v7903_v58  ;;  %v1555_v3 = vmul.f32 %v5575_v41, %v5575_v41  ;;  %v5596_v58 = vmul.f32 %v1430_v15, %v5002_v27 }
 0x148   : > { %1687 = vmatmul.mubr.f32.gmra.mrb[28].mxu0 %v1546_v52  ;;  %3745 = vmatprep.subr.bf16.mxu1 %v7904_v30  ;;  %v1434_v30 = vld [vmem:[#allocation5 + $0x140] sm:$0xff] }
 0x149   : > { %2009 = vmatmul.mubr.f32.gmra.mrb[28].mxu1 %v1546_v52  ;;  %3619 = vmatpush1.bf16.msra.mxu0 %v7906_v11  ;;  %v1554_v52 = vmul.f32 %v5582_v50, %v5582_v50  ;;  %7909 = vst [vmem:[#allocation26_spill] sm:$0xff] %v5596_v58  ;;  %v7912_v11 = vld [vmem:[#allocation88_spill] sm:$0xff]  ;;  %v5610_v15 = vmul.f32 %v1434_v30, %v5002_v27  ;;  %v7917_v30 = vld [vmem:[#allocation91_spill] sm:$0xff] }
 0x14a   : > { %3747 = vmatpush1.bf16.msra.mxu1 %v5190_v10  ;;  %1692 = vmatprep.mubr.f32.mxu0 %v1551_v23  ;;  %v7910_v10 = vld [vmem:[#allocation86_spill] sm:$0xff] }
 0x14b   : > { %2014 = vmatprep.mubr.f32.mxu1 %v1551_v23  ;;  %3621 = vmatprep.subr.bf16.mxu0 %v5192_v29  ;;  %v1559_v29 = vmul.f32 %v5589_v51, %v5589_v51  ;;  %v5603_v23 = vmul.f32 %v1435_v53, %v4954_v47  ;;  %7913 = vst [vmem:[#allocation29_spill] sm:$0xff] %v5610_v15  ;;  %v7916_v53 = vld [vmem:[#allocation90_spill] sm:$0xff] }
 0x14c   : > { %1693 = vmatmul.mubr.f32.gmra.mrb[30].mxu0 %v1550_v16  ;;  %3749 = vmatprep.subr.bf16.mxu1 %v7908_v35  ;;  %v1438_v35 = vld [vmem:[#allocation5 + $0x160] sm:$0xff] }
 0x14d   : > { %2015 = vmatmul.mubr.f32.gmra.mrb[30].mxu1 %v1550_v16  ;;  %3623 = vmatpush1.bf16.msra.mxu0 %v7910_v10  ;;  %7911 = vst [vmem:[#allocation27_spill] sm:$0xff] %v5603_v23  ;;  %v1558_v16 = vmul.f32 %v5596_v58, %v5596_v58  ;;  %v1443_v10 = vld [vmem:[#allocation5 + $0x188] sm:$0xff] }
 0x14e   : > { %3751 = vmatpush1.bf16.msra.mxu1 %v5213_v4  ;;  %1698 = vmatprep.mubr.f32.mxu0 %v1555_v3  ;;  %v7914_v4 = vld [vmem:[#allocation89_spill] sm:$0xff] }
 0x14f   : > { %2020 = vmatprep.mubr.f32.mxu1 %v1555_v3  ;;  %3625 = vmatprep.subr.bf16.mxu0 %v5215_v37  ;;  %v1563_v37 = vmul.f32 %v5603_v23, %v5603_v23  ;;  %v5617_v3 = vmul.f32 %v1439_v34, %v4954_v47  ;;  %v5631_v34 = vmul.f32 %v1443_v10, %v4954_v47 }
 0x150   : > { %1699 = vmatmul.mubr.f32.gmra.mrb[32].mxu0 %v1554_v52  ;;  %3753 = vmatprep.subr.bf16.mxu1 %v7912_v11  ;;  %v5624_v11 = vmul.f32 %v1438_v35, %v5002_v27  ;;  %v7923_v35 = vld [vmem:[#allocation95_spill] sm:$0xff] }
 0x151   : > { %2021 = vmatmul.mubr.f32.gmra.mrb[32].mxu1 %v1554_v52  ;;  %3627 = vmatpush1.bf16.msra.mxu0 %v7914_v4  ;;  %7915 = vst [vmem:[#allocation30_spill] sm:$0xff] %v5617_v3  ;;  %v1562_v52 = vmul.f32 %v5610_v15, %v5610_v15  ;;  %v1442_v4 = vld [vmem:[#allocation5 + $0x180] sm:$0xff]  ;;  %7921 = vst [vmem:[#allocation32_spill] sm:$0xff] %v5631_v34 }
 0x152   : > { %3755 = vmatpush1.bf16.msra.mxu1 %v5229_v13  ;;  %1704 = vmatprep.mubr.f32.mxu0 %v1559_v29  ;;  %7918 = vst [vmem:[#allocation31_spill] sm:$0xff] %v5624_v11  ;;  %v7919_v13 = vld [vmem:[#allocation92_spill] sm:$0xff] }
 0x153   : > { %2026 = vmatprep.mubr.f32.mxu1 %v1559_v29  ;;  %3629 = vmatprep.subr.bf16.mxu0 %v7916_v53  ;;  %v1567_v29 = vmul.f32 %v5617_v3, %v5617_v3  ;;  %v7922_v53 = vld [vmem:[#allocation94_spill] sm:$0xff] }
 0x154   : > { %1705 = vmatmul.mubr.f32.gmra.mrb[34].mxu0 %v1558_v16  ;;  %3757 = vmatprep.subr.bf16.mxu1 %v7917_v30  ;;  %v1447_v30 = vld [vmem:[#allocation5 + $0x1a8] sm:$0xff] }
 0x155   : > { %2027 = vmatmul.mubr.f32.gmra.mrb[34].mxu1 %v1558_v16  ;;  %3631 = vmatpush1.bf16.msra.mxu0 %v7919_v13  ;;  %v1566_v16 = vmul.f32 %v5624_v11, %v5624_v11  ;;  %v5638_v13 = vmul.f32 %v1442_v4, %v5002_v27  ;;  %v5645_v10 = vmul.f32 %v1447_v30, %v4954_v47  ;;  %v7929_v4 = vld [vmem:[#allocation99_spill] sm:$0xff] }
 0x156   : > { %3759 = vmatpush1.bf16.msra.mxu1 %v7920_v62  ;;  %1710 = vmatprep.mubr.f32.mxu0 %v1563_v37  ;;  %v7925_v62 = vld [vmem:[#allocation96_spill] sm:$0xff] }
 0x157   : > { %2032 = vmatprep.mubr.f32.mxu1 %v1563_v37  ;;  %3633 = vmatprep.subr.bf16.mxu0 %v7922_v53  ;;  %7924 = vst [vmem:[#allocation33_spill] sm:$0xff] %v5638_v13  ;;  %v1571_v37 = vmul.f32 %v5631_v34, %v5631_v34  ;;  %7927 = vst [vmem:[#allocation34_spill] sm:$0xff] %v5645_v10  ;;  %v7928_v53 = vld [vmem:[#allocation98_spill] sm:$0xff] }
 0x158   : > { %1711 = vmatmul.mubr.f32.gmra.mrb[36].mxu0 %v1562_v52  ;;  %3761 = vmatprep.subr.bf16.mxu1 %v7923_v35  ;;  %v1451_v35 = vld [vmem:[#allocation5 + $0x1c8] sm:$0xff] }
 0x159   : > { %2033 = vmatmul.mubr.f32.gmra.mrb[36].mxu1 %v1562_v52  ;;  %3635 = vmatpush1.bf16.msra.mxu0 %v7925_v62  ;;  %v1570_v52 = vmul.f32 %v5638_v13, %v5638_v13  ;;  %v5652_v62 = vmul.f32 %v1446_v8, %v5002_v27  ;;  %v5659_v30 = vmul.f32 %v1451_v35, %v4954_v47  ;;  %v7934_v8 = vld [vmem:[#allocation102_spill] sm:$0xff]  ;;  %v7939_v35 = vld [vmem:[#allocation105_spill] sm:$0xff]  ;;  %v1453_v13 = vld [vmem:[#allocation5 + $0x1d8] sm:$0xff] }
 0x15a   : > { %3763 = vmatpush1.bf16.msra.mxu1 %v7926_v6  ;;  %1716 = vmatprep.mubr.f32.mxu0 %v1567_v29  ;;  %v7931_v6 = vld [vmem:[#allocation100_spill] sm:$0xff] }
 0x15b   : > { %2038 = vmatprep.mubr.f32.mxu1 %v1567_v29  ;;  %3637 = vmatprep.subr.bf16.mxu0 %v7928_v53  ;;  %7930 = vst [vmem:[#allocation35_spill] sm:$0xff] %v5652_v62  ;;  %v1575_v29 = vmul.f32 %v5645_v10, %v5645_v10  ;;  %7933 = vst [vmem:[#allocation36_spill] sm:$0xff] %v5659_v30  ;;  %v1455_v53 = vld [vmem:[#allocation5 + $0x1e8] sm:$0xff] }
 0x15c   : > { %1717 = vmatmul.mubr.f32.gmra.mrb[38].mxu0 %v1566_v16  ;;  %3765 = vmatprep.subr.bf16.mxu1 %v7929_v4  ;;  %v5666_v4 = vmul.f32 %v1450_v20, %v5002_v27  ;;  %v7940_v20 = vld [vmem:[#allocation106_spill] sm:$0xff] }
 0x15d   : > { %2039 = vmatmul.mubr.f32.gmra.mrb[38].mxu1 %v1566_v16  ;;  %3639 = vmatpush1.bf16.msra.mxu0 %v7931_v6  ;;  %v1574_v16 = vmul.f32 %v5652_v62, %v5652_v62  ;;  %v1454_v6 = vld [vmem:[#allocation5 + $0x1e0] sm:$0xff] }
 0x15e   : > { %3767 = vmatpush1.bf16.msra.mxu1 %v7932_v38  ;;  %1722 = vmatprep.mubr.f32.mxu0 %v1571_v37  ;;  %7935 = vst [vmem:[#allocation37_spill] sm:$0xff] %v5666_v4  ;;  %v7936_v38 = vld [vmem:[#allocation103_spill] sm:$0xff] }
 0x15f   : > { %2044 = vmatprep.mubr.f32.mxu1 %v1571_v37  ;;  %3641 = vmatprep.subr.bf16.mxu0 %v5267_v19  ;;  %v1579_v19 = vmul.f32 %v5659_v30, %v5659_v30  ;;  %v5673_v37 = vmul.f32 %v1455_v53, %v4954_v47  ;;  %v1401_v53 = vld [vmem:[#allocation5 + $0x38] sm:$0xff] }
 0x160   : > { %1723 = vmatmul.mubr.f32.gmra.mrb[40].mxu0 %v1570_v52  ;;  %3769 = vmatprep.subr.bf16.mxu1 %v7934_v8  ;;  %v1397_v8 = vld [vmem:[#allocation5 + $0x18] sm:$0xff] }
 0x161   : > { %2045 = vmatmul.mubr.f32.gmra.mrb[40].mxu1 %v1570_v52  ;;  %3643 = vmatpush1.bf16.msra.mxu0 %v7936_v38  ;;  %7938 = vst [vmem:[#allocation38_spill] sm:$0xff] %v5673_v37  ;;  %v1578_v52 = vmul.f32 %v5666_v4, %v5666_v4  ;;  %v5680_v38 = vmul.f32 %v1454_v6, %v5002_v27  ;;  %v1400_v6 = vld [vmem:[#allocation5 + $0x30] sm:$0xff]  ;;  %v1445_v30 = vld [vmem:[#allocation5 + $0x198] sm:$0xff] }
 0x162   : > { %3771 = vmatpush1.bf16.msra.mxu1 %v7937_v31  ;;  %1728 = vmatprep.mubr.f32.mxu0 %v1575_v29  ;;  %v7942_v31 = vld [vmem:[#allocation107_spill] sm:$0xff]  ;;  %v1583_v47 = vmul.f32 %v5673_v37, %v5673_v37 }
 0x163   : > { %2050 = vmatprep.mubr.f32.mxu1 %v1575_v29  ;;  %3645 = vmatprep.subr.bf16.mxu0 %v7939_v35  ;;  %7941 = vst [vmem:[#allocation39_spill] sm:$0xff] %v5680_v38  ;;  %v5687_v29 = vmul.f32 %v1397_v8, %v5177_v40  ;;  %v1582_v27 = vmul.f32 %v5680_v38, %v5680_v38  ;;  %v1404_v35 = vld [vmem:[#allocation5 + $0x50] sm:$0xff]  ;;  %v1449_v4 = vld [vmem:[#allocation5 + $0x1b8] sm:$0xff] }
 0x164   : > { %1729 = vmatmul.mubr.f32.gmra.mrb[42].mxu0 %v1574_v16  ;;  %3773 = vmatprep.subr.bf16.mxu1 %v7940_v20  ;;  %v5720_v8 = vmul.f32 %v1404_v35, %v4957_v54 }
 0x165   : > { %2051 = vmatmul.mubr.f32.gmra.mrb[42].mxu1 %v1574_v16  ;;  %3647 = vmatpush1.bf16.msra.mxu0 %v7942_v31  ;;  %v5694_v16 = vmul.f32 %v1396_v25, %v4957_v54  ;;  %v5708_v25 = vmul.f32 %v1400_v6, %v4957_v54  ;;  %v1412_v6 = vld [vmem:[#allocation5 + $0x90] sm:$0xff] }
 0x166   : > { %3775 = vmatpush1.bf16.msra.mxu1 %v5289_v42  ;;  %1734 = vmatprep.mubr.f32.mxu0 %v1579_v19  ;;  %v5698_v42 = vmul.f32 %v1401_v53, %v5177_v40  ;;  %7944 = vst [vmem:[#allocation41_spill] sm:$0xff] %v5720_v8  ;;  %v1532_v31 = vmul.f32 %v5720_v8, %v5720_v8 }
 0x167   : > { %2056 = vmatprep.mubr.f32.mxu1 %v1579_v19  ;;  %3649 = vmatprep.subr.bf16.mxu0 %v5291_v44  ;;  %v1525_v44 = vmul.f32 %v5687_v29, %v5687_v29 }
 0x168   : > { %1735 = vmatmul.mubr.f32.gmra.mrb[44].mxu0 %v1578_v52  ;;  %3777 = vmatprep.subr.bf16.mxu1 %v5294_v9  ;;  %v1405_v9 = vld [vmem:[#allocation5 + $0x58] sm:$0xff] }
 0x169   : > { %2057 = vmatmul.mubr.f32.gmra.mrb[44].mxu1 %v1578_v52  ;;  %3651 = vmatpush1.bf16.msra.mxu0 %v5297_v22  ;;  %v1524_v22 = vmul.f32 %v5694_v16, %v5694_v16  ;;  %v5714_v19 = vmul.f32 %v1405_v9, %v5177_v40  ;;  %v1408_v52 = vld [vmem:[#allocation5 + $0x70] sm:$0xff] }
 0x16a   : > { %3779 = vmatpush1.bf16.msra.mxu1 %v5302_v61  ;;  %1740 = vmatprep.mubr.f32.mxu0 %v1583_v47  ;;  %v1529_v61 = vmul.f32 %v5698_v42, %v5698_v42 }
 0x16b   : > { %2062 = vmatprep.mubr.f32.mxu1 %v1583_v47  ;;  %3653 = vmatprep.subr.bf16.mxu0 %v5304_v57  ;;  %7943 = vst [vmem:[#allocation40_spill] sm:$0xff] %v5714_v19  ;;  %v1409_v57 = vld [vmem:[#allocation5 + $0x78] sm:$0xff]  ;;  %v5730_v47 = vmul.f32 %v1408_v52, %v4957_v54 }
 0x16c   : > { %1741 = vmatmul.mubr.f32.gmra.mrb[46].mxu0 %v1582_v27  ;;  %3781 = vmatprep.subr.bf16.mxu1 %v5307_v60  ;;  %v1528_v60 = vmul.f32 %v5708_v25, %v5708_v25  ;;  %v5725_v20 = vmul.f32 %v1409_v57, %v5177_v40  ;;  %v1416_v57 = vld [vmem:[#allocation5 + $0xb0] sm:$0xff] }
 0x16d   : > { %2063 = vmatmul.mubr.f32.gmra.mrb[46].mxu1 %v1582_v27  ;;  %3655 = vmatpush1.bf16.msra.mxu0 %v5314_v55  ;;  %v1533_v55 = vmul.f32 %v5714_v19, %v5714_v19  ;;  %7946 = vst [vmem:[#allocation44_spill] sm:$0xff] %v5730_v47  ;;  %v1536_v9 = vmul.f32 %v5730_v47, %v5730_v47 }
 0x16e   : > { %3783 = vmatpush1.bf16.msra.mxu1 %v5319_v36  ;;  %1811 = vmatprep.mubr.f32.mxu0 %v1525_v44  ;;  %7945 = vst [vmem:[#allocation43_spill] sm:$0xff] %v5725_v20  ;;  %v1413_v36 = vld [vmem:[#allocation5 + $0x98] sm:$0xff]  ;;  %v1537_v53 = vmul.f32 %v5725_v20, %v5725_v20  ;;  %v5750_v52 = vmul.f32 %v1416_v57, %v4957_v54 }
 0x16f   : > { %2133 = vmatprep.mubr.f32.mxu1 %v1525_v44  ;;  %v5735_v27 = vmul.f32 %v1413_v36, %v5177_v40  ;;  %v1417_v44 = vld [vmem:[#allocation5 + $0xb8] sm:$0xff] }
 0x170   : > { %1812 = vmatmul.mubr.f32.vlgmr.msra.gmra.mrb[16].mxu0 %v1524_v22  ;;  %v5745_v35 = vmul.f32 %v1417_v44, %v5177_v40  ;;  %7950 = vst [vmem:[#allocation48_spill] sm:$0xff] %v5750_v52  ;;  %v1425_v44 = vld [vmem:[#allocation5 + $0xf8] sm:$0xff] }
 0x171   : > { %2134 = vmatmul.mubr.f32.vlgmr.msra.gmra.mrb[16].mxu1 %v1524_v22  ;;  %1817 = vmatprep.mubr.f32.mxu0 %v1529_v61  ;;  %7947 = vst [vmem:[#allocation45_spill] sm:$0xff] %v5735_v27  ;;  %v5740_v22 = vmul.f32 %v1412_v6, %v4957_v54  ;;  %v1420_v6 = vld [vmem:[#allocation5 + $0xd0] sm:$0xff]  ;;  %v5765_v57 = vmul.f32 %v1425_v44, %v5177_v40 }
 0x172   : > { %2139 = vmatprep.mubr.f32.mxu1 %v1529_v61  ;;  %v1541_v61 = vmul.f32 %v5735_v27, %v5735_v27  ;;  %7949 = vst [vmem:[#allocation47_spill] sm:$0xff] %v5745_v35  ;;  %v1545_v36 = vmul.f32 %v5745_v35, %v5745_v35  ;;  %v5760_v1 = vmul.f32 %v1420_v6, %v4957_v54  ;;  %v1428_v44 = vld [vmem:[#allocation5 + $0x110] sm:$0xff] }
 0x173   : > { %7948 = vst [vmem:[#allocation46_spill] sm:$0xff] %v5740_v22  ;;  %7953 = vst [vmem:[#allocation51_spill] sm:$0xff] %v5765_v57  ;;  %v5775_v6 = vmul.f32 %v1429_v12, %v5177_v40  ;;  %v5780_v46 = vmul.f32 %v1428_v44, %v4957_v54  ;;  %v1432_v12 = vld [vmem:[#allocation5 + $0x130] sm:$0xff]  ;;  %v5795_v44 = vmul.f32 %v1437_v59, %v5177_v40 }
 0x174   : > { %1818 = vmatmul.mubr.f32.gmra.mrb[18].mxu0 %v1528_v60  ;;  %7952 = vst [vmem:[#allocation50_spill] sm:$0xff] %v5760_v1  ;;  %v5790_v2 = vmul.f32 %v1432_v12, %v4957_v54  ;;  %v5805_v12 = vmul.f32 %v1441_v28, %v5177_v40  ;;  %v1440_v59 = vld [vmem:[#allocation5 + $0x170] sm:$0xff] }
 0x175   : > { %2140 = vmatmul.mubr.f32.gmra.mrb[18].mxu1 %v1528_v60  ;;  %1823 = vmatprep.mubr.f32.mxu0 %v1533_v55  ;;  %v1421_v60 = vld [vmem:[#allocation5 + $0xd8] sm:$0xff]  ;;  %7955 = vst [vmem:[#allocation54_spill] sm:$0xff] %v5775_v6  ;;  %7956 = vst [vmem:[#allocation56_spill] sm:$0xff] %v5780_v46  ;;  %v5810_v38 = vmul.f32 %v1440_v59, %v4957_v54  ;;  %v1444_v28 = vld [vmem:[#allocation5 + $0x190] sm:$0xff]  ;;  %v5825_v59 = vmul.f32 %v1449_v4, %v5177_v40 }
 0x176   : > { %2145 = vmatprep.mubr.f32.mxu1 %v1533_v55  ;;  %v1540_v55 = vmul.f32 %v5740_v22, %v5740_v22  ;;  %7958 = vst [vmem:[#allocation60_spill] sm:$0xff] %v5790_v2  ;;  %7959 = vst [vmem:[#allocation61_spill] sm:$0xff] %v5795_v44  ;;  %v5820_v62 = vmul.f32 %v1444_v28, %v4957_v54  ;;  %v5835_v28 = vmul.f32 %v1453_v13, %v5177_v40  ;;  %v1452_v4 = vld [vmem:[#allocation5 + $0x1d0] sm:$0xff] }
 0x177   : > { %7961 = vst [vmem:[#allocation65_spill] sm:$0xff] %v5805_v12  ;;  %7962 = vst [vmem:[#allocation66_spill] sm:$0xff] %v5810_v38  ;;  %v1456_v13 = vld [vmem:[#allocation5 + $0x1f0] sm:$0xff] }
 0x178   : > { %1824 = vmatmul.mubr.f32.gmra.mrb[20].mxu0 %v1532_v31  ;;  %7964 = vst [vmem:[#allocation70_spill] sm:$0xff] %v5820_v62  ;;  %7965 = vst [vmem:[#allocation71_spill] sm:$0xff] %v5825_v59 }
 0x179   : > { %2146 = vmatmul.mubr.f32.gmra.mrb[20].mxu1 %v1532_v31  ;;  %1829 = vmatprep.mubr.f32.mxu0 %v1537_v53  ;;  %v5755_v31 = vmul.f32 %v1421_v60, %v5177_v40  ;;  %v1424_v60 = vld [vmem:[#allocation5 + $0xf0] sm:$0xff]  ;;  %7967 = vst [vmem:[#allocation73_spill] sm:$0xff] %v5835_v28 }
 0x17a   : > { %2151 = vmatprep.mubr.f32.mxu1 %v1537_v53  ;;  %v1544_v53 = vmul.f32 %v5750_v52, %v5750_v52  ;;  %v5770_v7 = vmul.f32 %v1424_v60, %v4957_v54  ;;  %v5785_v60 = vmul.f32 %v1433_v24, %v5177_v40  ;;  %v1436_v24 = vld [vmem:[#allocation5 + $0x150] sm:$0xff] }
 0x17b   : > { %7951 = vst [vmem:[#allocation49_spill] sm:$0xff] %v5755_v31  ;;  %v5800_v37 = vmul.f32 %v1436_v24, %v4957_v54  ;;  %v5815_v24 = vmul.f32 %v1445_v30, %v5177_v40  ;;  %v1448_v30 = vld [vmem:[#allocation5 + $0x1b0] sm:$0xff] }
 0x17c   : > { %1830 = vmatmul.mubr.f32.gmra.mrb[22].mxu0 %v1536_v9  ;;  %7954 = vst [vmem:[#allocation53_spill] sm:$0xff] %v5770_v7  ;;  %7957 = vst [vmem:[#allocation59_spill] sm:$0xff] %v5785_v60  ;;  %v5830_v10 = vmul.f32 %v1448_v30, %v4957_v54 }
 0x17d   : > { %2152 = vmatmul.mubr.f32.gmra.mrb[22].mxu1 %v1536_v9  ;;  %1835 = vmatprep.mubr.f32.mxu0 %v1541_v61  ;;  %v1549_v9 = vmul.f32 %v5755_v31, %v5755_v31  ;;  %7960 = vst [vmem:[#allocation64_spill] sm:$0xff] %v5800_v37  ;;  %7963 = vst [vmem:[#allocation67_spill] sm:$0xff] %v5815_v24 }
 0x17e   : > { %2157 = vmatprep.mubr.f32.mxu1 %v1541_v61  ;;  %v1548_v61 = vmul.f32 %v5760_v1, %v5760_v1  ;;  %7966 = vst [vmem:[#allocation72_spill] sm:$0xff] %v5830_v10 }
 0x180   : > { %1836 = vmatmul.mubr.f32.gmra.mrb[24].mxu0 %v1540_v55 }
 0x181   : > { %2158 = vmatmul.mubr.f32.gmra.mrb[24].mxu1 %v1540_v55  ;;  %1841 = vmatprep.mubr.f32.mxu0 %v1545_v36  ;;  %v1553_v55 = vmul.f32 %v5765_v57, %v5765_v57 }
 0x182   : > { %2163 = vmatprep.mubr.f32.mxu1 %v1545_v36  ;;  %v1552_v36 = vmul.f32 %v5770_v7, %v5770_v7 }
 0x184   : > { %1842 = vmatmul.mubr.f32.gmra.mrb[26].mxu0 %v1544_v53 }
 0x185   : > { %2164 = vmatmul.mubr.f32.gmra.mrb[26].mxu1 %v1544_v53  ;;  %1847 = vmatprep.mubr.f32.mxu0 %v1549_v9  ;;  %v1557_v53 = vmul.f32 %v5775_v6, %v5775_v6 }
 0x186   : > { %2169 = vmatprep.mubr.f32.mxu1 %v1549_v9  ;;  %v1556_v9 = vmul.f32 %v5780_v46, %v5780_v46 }
 0x188   : > { %1848 = vmatmul.mubr.f32.gmra.mrb[28].mxu0 %v1548_v61 }
 0x189   : > { %2170 = vmatmul.mubr.f32.gmra.mrb[28].mxu1 %v1548_v61  ;;  %1853 = vmatprep.mubr.f32.mxu0 %v1553_v55  ;;  %v1561_v61 = vmul.f32 %v5785_v60, %v5785_v60 }
 0x18a   : > { %2175 = vmatprep.mubr.f32.mxu1 %v1553_v55  ;;  %v1560_v55 = vmul.f32 %v5790_v2, %v5790_v2 }
 0x18c   : > { %1854 = vmatmul.mubr.f32.gmra.mrb[30].mxu0 %v1552_v36 }
 0x18d   : > { %2176 = vmatmul.mubr.f32.gmra.mrb[30].mxu1 %v1552_v36  ;;  %1859 = vmatprep.mubr.f32.mxu0 %v1557_v53  ;;  %v1565_v36 = vmul.f32 %v5795_v44, %v5795_v44 }
 0x18e   : > { %2181 = vmatprep.mubr.f32.mxu1 %v1557_v53  ;;  %v1564_v53 = vmul.f32 %v5800_v37, %v5800_v37 }
 0x190   : > { %1860 = vmatmul.mubr.f32.gmra.mrb[32].mxu0 %v1556_v9 }
 0x191   : > { %2182 = vmatmul.mubr.f32.gmra.mrb[32].mxu1 %v1556_v9  ;;  %1865 = vmatprep.mubr.f32.mxu0 %v1561_v61  ;;  %v1569_v9 = vmul.f32 %v5805_v12, %v5805_v12 }
 0x192   : > { %2187 = vmatprep.mubr.f32.mxu1 %v1561_v61  ;;  %v1568_v61 = vmul.f32 %v5810_v38, %v5810_v38 }
 0x194   : > { %1866 = vmatmul.mubr.f32.gmra.mrb[34].mxu0 %v1560_v55 }
 0x195   : > { %2188 = vmatmul.mubr.f32.gmra.mrb[34].mxu1 %v1560_v55  ;;  %1871 = vmatprep.mubr.f32.mxu0 %v1565_v36  ;;  %v1573_v55 = vmul.f32 %v5815_v24, %v5815_v24  ;;  %v1457_v24 = vld [vmem:[#allocation5 + $0x1f8] sm:$0xff] }
 0x196   : > { %2193 = vmatprep.mubr.f32.mxu1 %v1565_v36  ;;  %v1572_v36 = vmul.f32 %v5820_v62, %v5820_v62  ;;  %v5840_v62 = vmul.f32 %v1452_v4, %v4957_v54  ;;  %v5845_v30 = vmul.f32 %v1457_v24, %v5177_v40 }
 0x198   : > { %1872 = vmatmul.mubr.f32.gmra.mrb[36].mxu0 %v1564_v53  ;;  %7968 = vst [vmem:[#allocation76_spill] sm:$0xff] %v5840_v62  ;;  %7969 = vst [vmem:[#allocation77_spill] sm:$0xff] %v5845_v30 }
 0x199   : > { %2194 = vmatmul.mubr.f32.gmra.mrb[36].mxu1 %v1564_v53  ;;  %1877 = vmatprep.mubr.f32.mxu0 %v1569_v9  ;;  %v1577_v53 = vmul.f32 %v5825_v59, %v5825_v59  ;;  %v5850_v59 = vmul.f32 %v1456_v13, %v4957_v54 }
 0x19a   : > { %2199 = vmatprep.mubr.f32.mxu1 %v1569_v9  ;;  %v1576_v9 = vmul.f32 %v5830_v10, %v5830_v10 }
 0x19b   : > { %7970 = vst [vmem:[#allocation78_spill] sm:$0xff] %v5850_v59  ;;  %v1584_v40 = vmul.f32 %v5850_v59, %v5850_v59 }
 0x19c   : > { %1878 = vmatmul.mubr.f32.gmra.mrb[38].mxu0 %v1568_v61 }
 0x19d   : > { %2200 = vmatmul.mubr.f32.gmra.mrb[38].mxu1 %v1568_v61  ;;  %1883 = vmatprep.mubr.f32.mxu0 %v1573_v55  ;;  %v1581_v61 = vmul.f32 %v5835_v28, %v5835_v28 }
 0x19e   : > { %2205 = vmatprep.mubr.f32.mxu1 %v1573_v55  ;;  %v1580_v55 = vmul.f32 %v5840_v62, %v5840_v62 }
 0x1a0   : > { %1884 = vmatmul.mubr.f32.gmra.mrb[40].mxu0 %v1572_v36 }
 0x1a1   : > { %2206 = vmatmul.mubr.f32.gmra.mrb[40].mxu1 %v1572_v36  ;;  %1889 = vmatprep.mubr.f32.mxu0 %v1577_v53  ;;  %v1585_v36 = vmul.f32 %v5845_v30, %v5845_v30 }
 0x1a2   : > { %2211 = vmatprep.mubr.f32.mxu1 %v1577_v53 }
 0x1a4   : > { %1890 = vmatmul.mubr.f32.gmra.mrb[42].mxu0 %v1576_v9 }
 0x1a5   : > { %2212 = vmatmul.mubr.f32.gmra.mrb[42].mxu1 %v1576_v9  ;;  %1895 = vmatprep.mubr.f32.mxu0 %v1581_v61 }
 0x1a6   : > { %2217 = vmatprep.mubr.f32.mxu1 %v1581_v61 }
 0x1a8   : > { %1896 = vmatmul.mubr.f32.gmra.mrb[44].mxu0 %v1580_v55 }
 0x1a9   : > { %2218 = vmatmul.mubr.f32.gmra.mrb[44].mxu1 %v1580_v55  ;;  %1901 = vmatprep.mubr.f32.mxu0 %v1585_v36 }
 0x1aa   : > { %2223 = vmatprep.mubr.f32.mxu1 %v1585_v36 }
 0x1ac   : > { %1902 = vmatmul.mubr.f32.gmra.mrb[46].mxu0 %v1584_v40 }
 0x1ad   : > { %2224 = vmatmul.mubr.f32.gmra.mrb[46].mxu1 %v1584_v40 }
 0x1c3   : > { %v5856_v24 = vpop.f32.mrb[0].mxu0 }
 0x1c4   : > { %v5858_v53 = vpop.f32.mrb[0].mxu1  ;;  %v803_v54 = vpop.f32.mrb[1].mxu0  ;;  %vm1076_vm4 = vcmp.eq.f32.partialorder %v5856_v24, inf  ;;  %vm1078_vm5 = vcmp.eq.f32.partialorder %v5856_v24, 0.0 }
 0x1c5   : > { %v1029_v4 = vpop.f32.mrb[1].mxu1  ;;  %4023 = vrsqrt.f32 %v803_v54  ;;  %vm1083_vm0 = vcmp.eq.f32.partialorder %v803_v54, inf  ;;  %vm1085_vm2 = vcmp.eq.f32.partialorder %v803_v54, 0.0  ;;  %vm1090_vm6 = vcmp.eq.f32.partialorder %v5858_v53, inf }
 0x1c6   : > { %4025 = vrsqrt.f32 %v1029_v4  ;;  %vm1097_vm1 = vcmp.eq.f32.partialorder %v1029_v4, inf  ;;  %vm1099_vm3 = vcmp.eq.f32.partialorder %v1029_v4, 0.0  ;;  %vm1092_vm7 = vcmp.eq.f32.partialorder %v5858_v53, 0.0 }
 0x1c7   : > { %v5860_v9 = vpop.f32.mrb[2].mxu0 }
 0x1c8   : > { %v5862_v13 = vpop.f32.mrb[2].mxu1  ;;  %v5864_v61 = vpop.f32.mrb[3].mxu0  ;;  %vm1104_vm8 = vcmp.eq.f32.partialorder %v5860_v9, inf  ;;  %vm1106_vm9 = vcmp.eq.f32.partialorder %v5860_v9, 0.0 }
 0x1c9   : > { %v5866_v30 = vpop.f32.mrb[3].mxu1  ;;  %vm1118_vm10 = vcmp.eq.f32.partialorder %v5862_v13, inf  ;;  %vm1120_vm11 = vcmp.eq.f32.partialorder %v5862_v13, 0.0  ;;  %vm1111_vm12 = vcmp.eq.f32.partialorder %v5864_v61, inf  ;;  %vm1113_vm13 = vcmp.eq.f32.partialorder %v5864_v61, 0.0 }
 0x1ca   : > { %vm1125_vm14 = vcmp.eq.f32.partialorder %v5866_v30, inf  ;;  %vm1127_vm15 = vcmp.eq.f32.partialorder %v5866_v30, 0.0 }
 0x1cb   : > { %v5868_v28 = vpop.f32.mrb[4].mxu0 }
 0x1cc   : > { %v5870_v55 = vpop.f32.mrb[4].mxu1  ;;  %v5872_v36 = vpop.f32.mrb[5].mxu0 }
 0x1cd   : > { %v5874_v40 = vpop.f32.mrb[5].mxu1  ;;  %v1149_v32 = vand.u32 2147483648, %v5870_v55  ;;  %v1142_v63 = vand.u32 2147483648, %v5872_v36 }
 0x1cf   : > { %v5876_v59 = vpop.f32.mrb[6].mxu0 }
 0x1d0   : > { %v5878_v62 = vpop.f32.mrb[6].mxu1  ;;  %v5880_v10 = vpop.f32.mrb[7].mxu0 }
 0x1d1   : > { %7971 = vst [vmem:[#allocation80_spill] sm:$0xff] %v5880_v10  ;;  %v5882_v34 = vpop.f32.mrb[7].mxu1 }
 0x1d2   : > { %7972 = vst [vmem:[#allocation82_spill] sm:$0xff] %v5882_v34 }
 0x1d3   : > { %v5884_v38 = vpop.f32.mrb[8].mxu0 }
 0x1d4   : > { %7973 = vst [vmem:[#allocation84_spill] sm:$0xff] %v5884_v38  ;;  %v5886_v37 = vpop.f32.mrb[8].mxu1  ;;  %v5888_v11 = vpop.f32.mrb[9].mxu0 }
 0x1d5   : > { %7974 = vst [vmem:[#allocation86_spill] sm:$0xff] %v5886_v37  ;;  %7975 = vst [vmem:[#allocation88_spill] sm:$0xff] %v5888_v11  ;;  %v5890_v15 = vpop.f32.mrb[9].mxu1 }
 0x1d6   : > { %7976 = vst [vmem:[#allocation89_spill] sm:$0xff] %v5890_v15 }
 0x1d7   : > { %v5892_v12 = vpop.f32.mrb[10].mxu0 }
 0x1d8   : > { %7977 = vst [vmem:[#allocation90_spill] sm:$0xff] %v5892_v12  ;;  %v5894_v44 = vpop.f32.mrb[10].mxu1  ;;  %v5896_v3 = vpop.f32.mrb[11].mxu0 }
 0x1d9   : > { %7978 = vst [vmem:[#allocation91_spill] sm:$0xff] %v5894_v44  ;;  %7979 = vst [vmem:[#allocation92_spill] sm:$0xff] %v5896_v3  ;;  %v5898_v23 = vpop.f32.mrb[11].mxu1  ;;  %v4024_v3 = vpop.eup %4023 }
 0x1da   : > { %7980 = vst [vmem:[#allocation93_spill] sm:$0xff] %v5898_v23  ;;  %v4026_v23 = vpop.eup %4025  ;;  %v1082_v41 = vmul.f32 %v4024_v3, %v803_v54  ;;  %v7990_v3 = vld [vmem:[#allocation87_spill] sm:$0xff] }
 0x1db   : > { %v5900_v2 = vpop.f32.mrb[12].mxu0 }
 0x1dc   : > { %7981 = vst [vmem:[#allocation94_spill] sm:$0xff] %v5900_v2  ;;  %v5902_v46 = vpop.f32.mrb[12].mxu1  ;;  %v5904_v58 = vpop.f32.mrb[13].mxu0  ;;  %v1096_v2 = vmul.f32 %v4026_v23, %v1029_v4 }
 0x1dd   : > { %7982 = vst [vmem:[#allocation95_spill] sm:$0xff] %v5902_v46  ;;  %7983 = vst [vmem:[#allocation96_spill] sm:$0xff] %v5904_v58  ;;  %v5906_v50 = vpop.f32.mrb[13].mxu1  ;;  %v1084_v46 = vsel %vm1083_vm0, %v803_v54, %v1082_v41  ;;  %v1086_v58 = vand.u32 2147483648, %v803_v54  ;;  %vm1132_vm0 = vcmp.eq.f32.partialorder %v5868_v28, inf }
 0x1de   : > { %7984 = vst [vmem:[#allocation97_spill] sm:$0xff] %v5906_v50  ;;  %v1098_v7 = vsel %vm1097_vm1, %v1029_v4, %v1096_v2  ;;  %v1100_v50 = vand.u32 2147483648, %v1029_v4  ;;  %vm1141_vm1 = vcmp.eq.f32.partialorder %v5872_v36, 0.0 }
 0x1df   : > { %v5908_v60 = vpop.f32.mrb[14].mxu0  ;;  %v1087_v1 = vsel %vm1085_vm2, %v1086_v58, %v1084_v46  ;;  %vm1146_vm2 = vcmp.eq.f32.partialorder %v5870_v55, inf }
 0x1e0   : > { %7985 = vst [vmem:[#allocation98_spill] sm:$0xff] %v5908_v60  ;;  %v5910_v6 = vpop.f32.mrb[14].mxu1  ;;  %v5912_v51 = vpop.f32.mrb[15].mxu0  ;;  %v1101_v60 = vsel %vm1099_vm3, %v1100_v50, %v1098_v7  ;;  %v1299_v5 = vmax.f32 %v1087_v1, 1e-12  ;;  %v1079_v7 = vand.u32 2147483648, %v5856_v24 }
 0x1e1   : > { %7986 = vst [vmem:[#allocation99_spill] sm:$0xff] %v5910_v6  ;;  %7987 = vst [vmem:[#allocation100_spill] sm:$0xff] %v5912_v51  ;;  %v5914_v44 = vpop.f32.mrb[15].mxu1  ;;  %v1301_v6 = vmax.f32 %v1101_v60, 1e-12  ;;  %v1107_v50 = vand.u32 2147483648, %v5860_v9 }
 0x1e2   : > { %7988 = vst [vmem:[#allocation101_spill] sm:$0xff] %v5914_v44  ;;  %4027 = vrcp.f32 %v1299_v5  ;;  %vm1148_vm3 = vcmp.eq.f32.partialorder %v5870_v55, 0.0 }
 0x1e3   : > { %4029 = vrcp.f32 %v1301_v6 }
 0x1e4   : > { %4031 = vrsqrt.f32 %v5856_v24 }
 0x1e5   : > { %4033 = vrsqrt.f32 %v5858_v53 }
 0x1e6   : > { %4035 = vrsqrt.f32 %v5860_v9 }
 0x1e7   : > { %4037 = vrsqrt.f32 %v5862_v13 }
 0x1e8   : > { %4039 = vrsqrt.f32 %v5864_v61 }
 0x1e9   : > { %4041 = vrsqrt.f32 %v5866_v30 }
 0x1ea   : > { %4043 = vrsqrt.f32 %v5868_v28 }
 0x1eb   : > { %4045 = vrsqrt.f32 %v5870_v55 }
 0x1ec   : > { %v4028_v51 = vpop.eup %4027  ;;  %4047 = vrsqrt.f32 %v5872_v36 }
 0x1ed   : > { %v4030_v44 = vpop.eup %4029  ;;  %v1333_v57 = vmul.f32 %v4028_v51, %v7989_v17  ;;  %4049 = vrsqrt.f32 %v5874_v40  ;;  %v1093_v17 = vand.u32 2147483648, %v5858_v53 }
 0x1ee   : > { %v1337_v23 = vmul.f32 %v4030_v44, %v7990_v3  ;;  %v4032_v2 = vpop.eup %4031  ;;  %4051 = vrsqrt.f32 %v5876_v59  ;;  %v1114_v44 = vand.u32 2147483648, %v5864_v61  ;;  %v1128_v3 = vand.u32 2147483648, %v5866_v30 }
 0x1ef   : > { %2934 = vmatprep.mubr.f32.mxu1 %v1333_v57  ;;  %v4034_v46 = vpop.eup %4033  ;;  %v1075_v41 = vmul.f32 %v4032_v2, %v5856_v24  ;;  %4053 = vrsqrt.f32 %v5878_v62  ;;  %v1121_v57 = vand.u32 2147483648, %v5862_v13 }
 0x1f0   : > { %3039 = vmatprep.mubr.f32.mxu0 %v1337_v23  ;;  %v4036_v1 = vpop.eup %4035  ;;  %v1089_v58 = vmul.f32 %v4034_v46, %v5858_v53 }
 0x1f1   : > { %v4038_v5 = vpop.eup %4037  ;;  %v1103_v60 = vmul.f32 %v4036_v1, %v5860_v9  ;;  %v1077_v2 = vsel %vm1076_vm4, %v5856_v24, %v1075_v41  ;;  %v1135_v1 = vand.u32 2147483648, %v5868_v28  ;;  %vm1139_vm4 = vcmp.eq.f32.partialorder %v5872_v36, inf }
 0x1f2   : > { %v4040_v51 = vpop.eup %4039  ;;  %v1117_v4 = vmul.f32 %v4038_v5, %v5862_v13  ;;  %v1091_v31 = vsel %vm1090_vm6, %v5858_v53, %v1089_v58  ;;  %v1080_v58 = vsel %vm1078_vm5, %v1079_v7, %v1077_v2  ;;  %vm1153_vm5 = vcmp.eq.f32.partialorder %v5874_v40, inf }
 0x1f3   : > { %v4042_v6 = vpop.eup %4041  ;;  %v1110_v46 = vmul.f32 %v4040_v51, %v5864_v61  ;;  %v1105_v41 = vsel %vm1104_vm8, %v5860_v9, %v1103_v60  ;;  %v1094_v60 = vsel %vm1092_vm7, %v1093_v17, %v1091_v31  ;;  %vm1155_vm6 = vcmp.eq.f32.partialorder %v5874_v40, 0.0 }
 0x1f4   : > { %v4044_v54 = vpop.eup %4043  ;;  %v1124_v45 = vmul.f32 %v4042_v6, %v5866_v30  ;;  %v1119_v6 = vsel %vm1118_vm10, %v5862_v13, %v1117_v4  ;;  %v1108_v24 = vsel %vm1106_vm9, %v1107_v50, %v1105_v41  ;;  %v1156_v53 = vand.u32 2147483648, %v5874_v40 }
 0x1f5   : > { %v4046_v23 = vpop.eup %4045  ;;  %v1131_v51 = vmul.f32 %v4044_v54, %v5868_v28  ;;  %v1112_v54 = vsel %vm1111_vm12, %v5864_v61, %v1110_v46  ;;  %v1298_v17 = vmax.f32 %v1080_v58, 1e-12  ;;  %v1122_v4 = vsel %vm1120_vm11, %v1121_v57, %v1119_v6 }
 0x1f6   : > { %v4048_v5 = vpop.eup %4047  ;;  %v1145_v22 = vmul.f32 %v4046_v23, %v5870_v55  ;;  %v1126_v7 = vsel %vm1125_vm14, %v5866_v30, %v1124_v45  ;;  %v1300_v50 = vmax.f32 %v1094_v60, 1e-12  ;;  %v1115_v2 = vsel %vm1113_vm13, %v1114_v44, %v1112_v54 }
 0x1f7   : > { %v4050_v52 = vpop.eup %4049  ;;  %v1138_v35 = vmul.f32 %v4048_v5, %v5872_v36  ;;  %v1133_v23 = vsel %vm1132_vm0, %v5868_v28, %v1131_v51  ;;  %v1302_v5 = vmax.f32 %v1108_v24, 1e-12  ;;  %v1129_v13 = vsel %vm1127_vm15, %v1128_v3, %v1126_v7 }
 0x1f8   : > { %v4052_v21 = vpop.eup %4051  ;;  %v1152_v9 = vmul.f32 %v4050_v52, %v5874_v40  ;;  %v1147_v45 = vsel %vm1146_vm2, %v5870_v55, %v1145_v22  ;;  %vm1160_vm7 = vcmp.eq.f32.partialorder %v5876_v59, inf  ;;  %v1304_v52 = vmax.f32 %v1122_v4, 1e-12 }
 0x1f9   : > { %v4054_v31 = vpop.eup %4053  ;;  %v1159_v46 = vmul.f32 %v4052_v21, %v5876_v59  ;;  %v1140_v57 = vsel %vm1139_vm4, %v5872_v36, %v1138_v35  ;;  %vm7991_vm8 = vcmp.eq.f32.partialorder %v5868_v28, 0.0  ;;  %vm1162_vm9 = vcmp.eq.f32.partialorder %v5876_v59, 0.0 }
 0x1fa   : > { %v1136_v61 = vsel %vm7991_vm8, %v1135_v1, %v1133_v23  ;;  %v1173_v22 = vmul.f32 %v4054_v31, %v5878_v62  ;;  %4055 = vrcp.f32 %v1298_v17  ;;  %v1303_v21 = vmax.f32 %v1115_v2, 1e-12 }
 0x1fb   : > { %v1150_v30 = vsel %vm1148_vm3, %v1149_v32, %v1147_v45  ;;  %v1154_v44 = vsel %vm1153_vm5, %v5874_v40, %v1152_v9  ;;  %4057 = vrcp.f32 %v1300_v50  ;;  %v1305_v35 = vmax.f32 %v1129_v13, 1e-12 }
 0x1fc   : > { %v1143_v3 = vsel %vm1141_vm1, %v1142_v63, %v1140_v57  ;;  %v1161_v28 = vsel %vm1160_vm7, %v5876_v59, %v1159_v46  ;;  %4059 = vrcp.f32 %v1302_v5  ;;  %v1306_v1 = vmax.f32 %v1136_v61, 1e-12 }
 0x1fd   : > { %v1163_v41 = vand.u32 2147483648, %v5876_v59  ;;  %vm1174_vm10 = vcmp.eq.f32.partialorder %v5878_v62, inf  ;;  %4061 = vrcp.f32 %v1304_v52  ;;  %v1308_v55 = vmax.f32 %v1150_v30, 1e-12 }
 0x1fe   : > { %v1157_v32 = vsel %vm1155_vm6, %v1156_v53, %v1154_v44  ;;  %v1175_v51 = vsel %vm1174_vm10, %v5878_v62, %v1173_v22  ;;  %4063 = vrcp.f32 %v1303_v21  ;;  %v1307_v58 = vmax.f32 %v1143_v3, 1e-12 }
 0x1ff   : > { %v1164_v63 = vsel %vm1162_vm9, %v1163_v41, %v1161_v28  ;;  %v1177_v36 = vand.u32 2147483648, %v5878_v62  ;;  %4065 = vrcp.f32 %v1305_v35  ;;  %vm1176_vm11 = vcmp.eq.f32.partialorder %v5878_v62, 0.0 }
 0x200   : > { %4067 = vrcp.f32 %v1306_v1  ;;  %v1309_v6 = vmax.f32 %v1157_v32, 1e-12  ;;  %v1310_v54 = vmax.f32 %v1164_v63, 1e-12 }
 0x201   : > { %v1178_v60 = vsel %vm1176_vm11, %v1177_v36, %v1175_v51  ;;  %4069 = vrcp.f32 %v1308_v55 }
 0x202   : > { %4071 = vrcp.f32 %v1307_v58  ;;  %v1312_v40 = vmax.f32 %v1178_v60, 1e-12 }
 0x203   : > { %4073 = vrsqrt.f32 %v5880_v10 }
 0x204   : > { %v6033_v24 = vpop.eup %4055  ;;  %4075 = vrcp.f32 %v1309_v6 }
 0x205   : > { %7992 = vst [vmem:[#allocation102_spill] sm:$0xff] %v6033_v24  ;;  %v6035_v7 = vpop.eup %4057  ;;  %4077 = vrcp.f32 %v1310_v54 }
 0x206   : > { %7993 = vst [vmem:[#allocation103_spill] sm:$0xff] %v6035_v7  ;;  %v6037_v59 = vpop.eup %4059  ;;  %4079 = vrsqrt.f32 %v5882_v34 }
 0x207   : > { %7994 = vst [vmem:[#allocation104_spill] sm:$0xff] %v6037_v59  ;;  %v6040_v62 = vpop.eup %4061  ;;  %4081 = vrcp.f32 %v1312_v40 }
 0x208   : > { %7995 = vst [vmem:[#allocation105_spill] sm:$0xff] %v6040_v62  ;;  %v6042_v53 = vpop.eup %4063  ;;  %4083 = vrsqrt.f32 %v5884_v38 }
 0x209   : > { %7996 = vst [vmem:[#allocation106_spill] sm:$0xff] %v6042_v53  ;;  %v6045_v31 = vpop.eup %4065  ;;  %4085 = vrsqrt.f32 %v5886_v37 }
 0x20a   : > { %7997 = vst [vmem:[#allocation107_spill] sm:$0xff] %v6045_v31  ;;  %v6048_v17 = vpop.eup %4067  ;;  %4087 = vrsqrt.f32 %v5888_v11 }
 0x20b   : > { %7998 = vst [vmem:[#allocation28_spill] sm:$0xff] %v6048_v17  ;;  %v6051_v4 = vpop.eup %4069  ;;  %4089 = vrsqrt.f32 %v5890_v15 }
 0x20c   : > { %7999 = vst [vmem:[#allocation87_spill] sm:$0xff] %v6051_v4  ;;  %v6054_v23 = vpop.eup %4071  ;;  %4091 = vrsqrt.f32 %v5892_v12 }
 0x20d   : > { %8000 = vst [vmem:[#allocation123_spill] sm:$0xff] %v6054_v23  ;;  %v6059_v50 = vpop.eup %4073 }
 0x20e   : > { %8001 = vst [vmem:[#allocation124_spill] sm:$0xff] %v6059_v50  ;;  %v6066_v46 = vpop.eup %4075 }
 0x20f   : > { %8002 = vst [vmem:[#allocation125_spill] sm:$0xff] %v6066_v46  ;;  %v6071_v13 = vpop.eup %4077 }
 0x210   : > { %8003 = vst [vmem:[#allocation126_spill] sm:$0xff] %v6071_v13  ;;  %v6074_v57 = vpop.eup %4079 }
 0x211   : > { %8004 = vst [vmem:[#allocation127_spill] sm:$0xff] %v6074_v57  ;;  %v6079_v61 = vpop.eup %4081 }
 0x212   : > { %8005 = vst [vmem:[#allocation128_spill] sm:$0xff] %v6079_v61  ;;  %v6086_v30 = vpop.eup %4083 }
 0x213   : > { %8006 = vst [vmem:[#allocation129_spill] sm:$0xff] %v6086_v30  ;;  %v6094_v3 = vpop.eup %4085 }
 0x214   : > { %8007 = vst [vmem:[#allocation130_spill] sm:$0xff] %v6094_v3  ;;  %v6100_v1 = vpop.eup %4087 }
 0x215   : > { %8008 = vst [vmem:[#allocation131_spill] sm:$0xff] %v6100_v1  ;;  %v6108_v32 = vpop.eup %4089 }
 0x216   : > { %8009 = vst [vmem:[#allocation132_spill] sm:$0xff] %v6108_v32  ;;  %v6118_v36 = vpop.eup %4091 }
 0x217   : > { %8010 = vst [vmem:[#allocation133_spill] sm:$0xff] %v6118_v36 }
 0x243   : > { %v6057_v9 = vpop.f32.mrb[16].mxu0 }
 0x244   : > { %4093 = vrsqrt.f32 %v6057_v9  ;;  %v6062_v2 = vpop.f32.mrb[16].mxu1  ;;  %v6064_v45 = vpop.f32.mrb[17].mxu0  ;;  %vm2232_vm12 = vcmp.eq.f32.partialorder %v6057_v9, inf  ;;  %vm2234_vm13 = vcmp.eq.f32.partialorder %v6057_v9, 0.0  ;;  %v2235_v44 = vand.u32 2147483648, %v6057_v9 }
 0x245   : > { %4095 = vrsqrt.f32 %v6062_v2  ;;  %v6069_v5 = vpop.f32.mrb[17].mxu1  ;;  %vm2246_vm14 = vcmp.eq.f32.partialorder %v6062_v2, inf  ;;  %vm2248_vm15 = vcmp.eq.f32.partialorder %v6062_v2, 0.0  ;;  %v2249_v28 = vand.u32 2147483648, %v6062_v2 }
 0x246   : > { %4097 = vrsqrt.f32 %v6064_v45  ;;  %vm2239_vm0 = vcmp.eq.f32.partialorder %v6064_v45, inf  ;;  %vm2241_vm1 = vcmp.eq.f32.partialorder %v6064_v45, 0.0  ;;  %vm2253_vm2 = vcmp.eq.f32.partialorder %v6069_v5, inf }
 0x247   : > { %4099 = vrsqrt.f32 %v6069_v5  ;;  %v6077_v52 = vpop.f32.mrb[18].mxu0  ;;  %vm2255_vm3 = vcmp.eq.f32.partialorder %v6069_v5, 0.0  ;;  %v8011_v53 = vand.u32 2147483648, %v6064_v45  ;;  %v8012_v24 = vand.u32 2147483648, %v6069_v5 }
 0x248   : > { %4101 = vrsqrt.f32 %v6077_v52  ;;  %v6082_v22 = vpop.f32.mrb[18].mxu1  ;;  %v6084_v21 = vpop.f32.mrb[19].mxu0  ;;  %vm2260_vm4 = vcmp.eq.f32.partialorder %v6077_v52, inf  ;;  %vm2262_vm5 = vcmp.eq.f32.partialorder %v6077_v52, 0.0  ;;  %v8013_v36 = vand.u32 2147483648, %v6077_v52 }
 0x249   : > { %4103 = vrsqrt.f32 %v6082_v22  ;;  %v6092_v35 = vpop.f32.mrb[19].mxu1  ;;  %vm2274_vm6 = vcmp.eq.f32.partialorder %v6082_v22, inf  ;;  %vm2276_vm7 = vcmp.eq.f32.partialorder %v6082_v22, 0.0  ;;  %vm2267_vm8 = vcmp.eq.f32.partialorder %v6084_v21, inf }
 0x24a   : > { %4105 = vrsqrt.f32 %v6084_v21  ;;  %vm2269_vm9 = vcmp.eq.f32.partialorder %v6084_v21, 0.0 }
 0x24b   : > { %4107 = vrsqrt.f32 %v6092_v35  ;;  %v6106_v55 = vpop.f32.mrb[20].mxu0 }
 0x24c   : > { %4109 = vrsqrt.f32 %v6106_v55  ;;  %v6114_v58 = vpop.f32.mrb[20].mxu1  ;;  %v6116_v63 = vpop.f32.mrb[21].mxu0  ;;  %vm2290_vm11 = vcmp.eq.f32.partialorder %v6106_v55, 0.0  ;;  %v8019_v32 = vand.u32 2147483648, %v6106_v55 }
 0x24d   : > { %4111 = vrsqrt.f32 %v6114_v58  ;;  %v6124_v60 = vpop.f32.mrb[21].mxu1  ;;  %vm2302_vm10 = vcmp.eq.f32.partialorder %v6114_v58, inf }
 0x24e   : > { %v4094_v54 = vpop.eup %4093  ;;  %4113 = vrsqrt.f32 %v6116_v63 }
 0x24f   : > { %v4096_v51 = vpop.eup %4095  ;;  %v2231_v41 = vmul.f32 %v4094_v54, %v6057_v9  ;;  %v6134_v4 = vpop.f32.mrb[22].mxu0  ;;  %4115 = vrsqrt.f32 %v6124_v60 }
 0x250   : > { %v4098_v46 = vpop.eup %4097  ;;  %v2245_v17 = vmul.f32 %v4096_v51, %v6062_v2  ;;  %v6141_v54 = vpop.f32.mrb[22].mxu1  ;;  %4117 = vrsqrt.f32 %v6134_v4 }
 0x251   : > { %v6143_v61 = vpop.f32.mrb[23].mxu0  ;;  %v4100_v6 = vpop.eup %4099  ;;  %v2233_v13 = vsel %vm2232_vm12, %v6057_v9, %v2231_v41  ;;  %v2238_v23 = vmul.f32 %v4098_v46, %v6064_v45  ;;  %vm2283_vm12 = vcmp.eq.f32.partialorder %v6092_v35, 0.0  ;;  %4119 = vrsqrt.f32 %v6141_v54 }
 0x252   : > { %v6154_v62 = vpop.f32.mrb[23].mxu1  ;;  %v4102_v40 = vpop.eup %4101  ;;  %v2236_v31 = vsel %vm2234_vm13, %v2235_v44, %v2233_v13  ;;  %v2247_v46 = vsel %vm2246_vm14, %v6062_v2, %v2245_v17  ;;  %v2252_v41 = vmul.f32 %v4100_v6, %v6069_v5  ;;  %vm2304_vm13 = vcmp.eq.f32.partialorder %v6114_v58, 0.0 }
 0x253   : > { %v4104_v51 = vpop.eup %4103  ;;  %v2678_v59 = vmax.f32 %v2236_v31, 1e-12  ;;  %v2250_v9 = vsel %vm2248_vm15, %v2249_v28, %v2247_v46  ;;  %v2240_v13 = vsel %vm2239_vm0, %v6064_v45, %v2238_v23  ;;  %v2259_v17 = vmul.f32 %v4102_v40, %v6077_v52  ;;  %v6174_v44 = vpop.f32.mrb[24].mxu0 }
 0x254   : > { %vm2295_vm14 = vcmp.eq.f32.partialorder %v6116_v63, inf  ;;  %v4106_v6 = vpop.eup %4105  ;;  %v2680_v7 = vmax.f32 %v2250_v9, 1e-12  ;;  %v2243_v31 = vsel %vm2241_vm1, %v8011_v53, %v2240_v13  ;;  %v2254_v2 = vsel %vm2253_vm2, %v6069_v5, %v2252_v41  ;;  %v6185_v28 = vpop.f32.mrb[24].mxu1 }
 0x255   : > { %v2273_v23 = vmul.f32 %v4104_v51, %v6082_v22  ;;  %vm2297_vm15 = vcmp.eq.f32.partialorder %v6116_v63, 0.0  ;;  %v6187_v40 = vpop.f32.mrb[25].mxu0  ;;  %v4108_v46 = vpop.eup %4107  ;;  %4121 = vrcp.f32 %v2678_v59  ;;  %v2679_v9 = vmax.f32 %v2243_v31, 1e-12 }
 0x256   : > { %v2257_v53 = vsel %vm2255_vm3, %v8012_v24, %v2254_v2  ;;  %v2261_v45 = vsel %vm2260_vm4, %v6077_v52, %v2259_v17  ;;  %v6196_v41 = vpop.f32.mrb[25].mxu1  ;;  %v4110_v51 = vpop.eup %4109  ;;  %4123 = vrcp.f32 %v2680_v7  ;;  %vm2309_vm0 = vcmp.eq.f32.partialorder %v6124_v60, inf }
 0x257   : > { %v2681_v13 = vmax.f32 %v2257_v53, 1e-12  ;;  %v2264_v59 = vsel %vm2262_vm5, %v8013_v36, %v2261_v45  ;;  %v2275_v31 = vsel %vm2274_vm6, %v6082_v22, %v2273_v23  ;;  %v4112_v24 = vpop.eup %4111  ;;  %4125 = vrcp.f32 %v2679_v9  ;;  %v6213_v52 = vpop.f32.mrb[26].mxu0 }
 0x258   : > { %v2682_v5 = vmax.f32 %v2264_v59, 1e-12  ;;  %v8014_v17 = vand.u32 2147483648, %v6082_v22  ;;  %v2266_v2 = vmul.f32 %v4106_v6, %v6084_v21  ;;  %vm2311_vm1 = vcmp.eq.f32.partialorder %v6124_v60, 0.0  ;;  %v4114_v36 = vpop.eup %4113  ;;  %v6218_v45 = vpop.f32.mrb[26].mxu1 }
 0x259   : > { %vm2316_vm2 = vcmp.eq.f32.partialorder %v6134_v4, inf  ;;  %4127 = vrcp.f32 %v2681_v13  ;;  %v2280_v53 = vmul.f32 %v4108_v46, %v6092_v35  ;;  %v2287_v9 = vmul.f32 %v4110_v51, %v6106_v55  ;;  %v6220_v22 = vpop.f32.mrb[27].mxu0  ;;  %v4116_v46 = vpop.eup %4115 }
 0x25a   : > { %v2278_v7 = vsel %vm2276_vm7, %v8014_v17, %v2275_v31  ;;  %vm2318_vm3 = vcmp.eq.f32.partialorder %v6134_v4, 0.0  ;;  %4129 = vrcp.f32 %v2682_v5  ;;  %v2268_v6 = vsel %vm2267_vm8, %v6084_v21, %v2266_v2  ;;  %v6227_v31 = vpop.f32.mrb[27].mxu1 }
 0x25b   : > { %v2684_v23 = vmax.f32 %v2278_v7, 1e-12  ;;  %v2301_v59 = vmul.f32 %v4112_v24, %v6114_v58  ;;  %v2294_v13 = vmul.f32 %v4114_v36, %v6116_v63  ;;  %v8015_v51 = vand.u32 2147483648, %v6084_v21  ;;  %v4118_v24 = vpop.eup %4117 }
 0x25c   : > { %vm8016_vm4 = vcmp.eq.f32.partialorder %v6092_v35, inf  ;;  %vm8017_vm5 = vcmp.eq.f32.partialorder %v6106_v55, inf  ;;  %v8018_v36 = vand.u32 2147483648, %v6092_v35  ;;  %vm2330_vm6 = vcmp.eq.f32.partialorder %v6141_v54, inf }
 0x25d   : > { %4131 = vrcp.f32 %v2684_v23  ;;  %v2271_v17 = vsel %vm2269_vm9, %v8015_v51, %v2268_v6  ;;  %v2282_v5 = vsel %vm8016_vm4, %v6092_v35, %v2280_v53  ;;  %v2289_v7 = vsel %vm8017_vm5, %v6106_v55, %v2287_v9  ;;  %v6250_v6 = vpop.f32.mrb[28].mxu0  ;;  %v4120_v51 = vpop.eup %4119 }
 0x25e   : > { %v2683_v2 = vmax.f32 %v2271_v17, 1e-12  ;;  %v2285_v23 = vsel %vm2283_vm12, %v8018_v36, %v2282_v5  ;;  %v2292_v21 = vsel %vm2290_vm11, %v8019_v32, %v2289_v7  ;;  %v2303_v53 = vsel %vm2302_vm10, %v6114_v58, %v2301_v59  ;;  %v6259_v55 = vpop.f32.mrb[28].mxu1  ;;  %v6261_v32 = vpop.f32.mrb[29].mxu0 }
 0x25f   : > { %v2685_v9 = vmax.f32 %v2285_v23, 1e-12  ;;  %v2686_v1 = vmax.f32 %v2292_v21, 1e-12  ;;  %v8020_v17 = vand.u32 2147483648, %v6114_v58  ;;  %v2296_v5 = vsel %vm2295_vm14, %v6116_v63, %v2294_v13  ;;  %v6268_v21 = vpop.f32.mrb[29].mxu1 }
 0x260   : > { %4133 = vrcp.f32 %v2683_v2  ;;  %v8021_v7 = vand.u32 2147483648, %v6116_v63  ;;  %v2308_v23 = vmul.f32 %v4116_v46, %v6124_v60  ;;  %v2329_v13 = vmul.f32 %v4120_v51, %v6141_v54  ;;  %v6279_v46 = vpop.f32.mrb[30].mxu0 }
 0x261   : > { %v2306_v35 = vsel %vm2304_vm13, %v8020_v17, %v2303_v53  ;;  %4135 = vrcp.f32 %v2685_v9  ;;  %v2315_v53 = vmul.f32 %v4118_v24, %v6134_v4  ;;  %v6272_v17 = vpop.eup %4121  ;;  %v2319_v63 = vand.u32 2147483648, %v6134_v4 }
 0x262   : > { %v2688_v59 = vmax.f32 %v2306_v35, 1e-12  ;;  %v2299_v36 = vsel %vm2297_vm15, %v8021_v7, %v2296_v5  ;;  %4137 = vrcp.f32 %v2686_v1  ;;  %v2310_v2 = vsel %vm2309_vm0, %v6124_v60, %v2308_v23  ;;  %v6281_v35 = vpop.eup %4123  ;;  %v6291_v5 = vpop.f32.mrb[30].mxu1 }
 0x263   : > { %v2687_v58 = vmax.f32 %v2299_v36, 1e-12  ;;  %v8022_v24 = vand.u32 2147483648, %v6124_v60  ;;  %v2317_v1 = vsel %vm2316_vm2, %v6134_v4, %v2315_v53  ;;  %v2331_v9 = vsel %vm2330_vm6, %v6141_v54, %v2329_v13  ;;  %v6293_v7 = vpop.f32.mrb[31].mxu0  ;;  %v6295_v36 = vpop.eup %4125 }
 0x264   : > { %4139 = vrcp.f32 %v2688_v59  ;;  %v2320_v59 = vsel %vm2318_vm3, %v2319_v63, %v2317_v1  ;;  %v2333_v60 = vand.u32 2147483648, %v6141_v54  ;;  %vm2332_vm7 = vcmp.eq.f32.partialorder %v6141_v54, 0.0 }
 0x265   : > { %v2313_v51 = vsel %vm2311_vm1, %v8022_v24, %v2310_v2  ;;  %4141 = vrcp.f32 %v2687_v58  ;;  %v6300_v2 = vpop.f32.mrb[31].mxu1  ;;  %v6302_v24 = vpop.eup %4127  ;;  %v2690_v53 = vmax.f32 %v2320_v59, 1e-12  ;;  %vm2323_vm8 = vcmp.eq.f32.partialorder %v6143_v61, inf }
 0x266   : > { %v2689_v23 = vmax.f32 %v2313_v51, 1e-12  ;;  %4143 = vrsqrt.f32 %v6143_v61  ;;  %v6306_v13 = vpop.eup %4129  ;;  %v2334_v12 = vsel %vm2332_vm7, %v2333_v60, %v2331_v9  ;;  %v6308_v58 = vpop.f32.mrb[32].mxu0  ;;  %vm2325_vm9 = vcmp.eq.f32.partialorder %v6143_v61, 0.0 }
 0x267   : > { %v6310_v51 = vpop.eup %4131  ;;  %v2692_v4 = vmax.f32 %v2334_v12, 1e-12  ;;  %v6312_v63 = vpop.f32.mrb[32].mxu1  ;;  %v2326_v15 = vand.u32 2147483648, %v6143_v61  ;;  %vm2337_vm10 = vcmp.eq.f32.partialorder %v6154_v62, inf  ;;  %vm2339_vm11 = vcmp.eq.f32.partialorder %v6154_v62, 0.0 }
 0x268   : > { %4145 = vrcp.f32 %v2689_v23  ;;  %v6314_v1 = vpop.f32.mrb[33].mxu0  ;;  %v6317_v59 = vpop.f32.mrb[33].mxu1  ;;  %v2340_v11 = vand.u32 2147483648, %v6154_v62  ;;  %vm2344_vm12 = vcmp.eq.f32.partialorder %v6174_v44, inf  ;;  %vm2346_vm13 = vcmp.eq.f32.partialorder %v6174_v44, 0.0 }
 0x269   : > { %4147 = vrcp.f32 %v2690_v53  ;;  %v6322_v9 = vpop.f32.mrb[34].mxu0  ;;  %v6327_v12 = vpop.f32.mrb[34].mxu1  ;;  %vm2358_vm14 = vcmp.eq.f32.partialorder %v6185_v28, inf  ;;  %vm2360_vm15 = vcmp.eq.f32.partialorder %v6185_v28, 0.0  ;;  %vm2351_vm0 = vcmp.eq.f32.partialorder %v6187_v40, inf }
 0x26a   : > { %4149 = vrsqrt.f32 %v6154_v62  ;;  %v6319_v54 = vpop.eup %4133  ;;  %v6329_v60 = vpop.f32.mrb[35].mxu0  ;;  %vm2353_vm1 = vcmp.eq.f32.partialorder %v6187_v40, 0.0  ;;  %vm2365_vm2 = vcmp.eq.f32.partialorder %v6196_v41, inf  ;;  %vm2367_vm3 = vcmp.eq.f32.partialorder %v6196_v41, 0.0 }
 0x26b   : > { %4151 = vrcp.f32 %v2692_v4  ;;  %v6324_v23 = vpop.eup %4135  ;;  %v6335_v4 = vpop.f32.mrb[35].mxu1  ;;  %vm2372_vm4 = vcmp.eq.f32.partialorder %v6213_v52, inf  ;;  %vm2374_vm5 = vcmp.eq.f32.partialorder %v6213_v52, 0.0  ;;  %vm2386_vm6 = vcmp.eq.f32.partialorder %v6218_v45, inf }
 0x26c   : > { %4153 = vrsqrt.f32 %v6174_v44  ;;  %v6331_v53 = vpop.eup %4137  ;;  %v6349_v57 = vpop.f32.mrb[36].mxu0  ;;  %vm2388_vm7 = vcmp.eq.f32.partialorder %v6218_v45, 0.0  ;;  %v8033_v56 = vand.u32 2147483648, %v6185_v28 }
 0x26d   : > { %4155 = vrsqrt.f32 %v6185_v28  ;;  %8023 = vst [vmem:[#allocation134_spill] sm:$0xff] %v6331_v53  ;;  %v6355_v38 = vpop.f32.mrb[36].mxu1  ;;  %v6357_v34 = vpop.f32.mrb[37].mxu0 }
 0x26e   : > { %4157 = vrsqrt.f32 %v6187_v40  ;;  %v6337_v3 = vpop.eup %4139  ;;  %v6366_v37 = vpop.f32.mrb[37].mxu1 }
 0x26f   : > { %8024 = vst [vmem:[#allocation135_spill] sm:$0xff] %v6337_v3  ;;  %4159 = vrsqrt.f32 %v6196_v41  ;;  %v6343_v30 = vpop.eup %4141  ;;  %v6382_v47 = vpop.f32.mrb[38].mxu0 }
 0x270   : > { %4161 = vrsqrt.f32 %v6213_v52  ;;  %v4144_v50 = vpop.eup %4143  ;;  %v6392_v8 = vpop.f32.mrb[38].mxu1 }
 0x271   : > { %4163 = vrsqrt.f32 %v6218_v45  ;;  %v2322_v27 = vmul.f32 %v4144_v50, %v6143_v61 }
 0x272   : > { %v6359_v10 = vpop.eup %4145  ;;  %4165 = vrsqrt.f32 %v6220_v22 }
 0x273   : > { %8025 = vst [vmem:[#allocation136_spill] sm:$0xff] %v6359_v10  ;;  %v6368_v48 = vpop.eup %4147  ;;  %4167 = vrsqrt.f32 %v6227_v31  ;;  %v2324_v43 = vsel %vm2323_vm8, %v6143_v61, %v2322_v27  ;;  %v6401_v61 = vpop.f32.mrb[39].mxu1  ;;  %vm2379_vm8 = vcmp.eq.f32.partialorder %v6220_v22, inf }
 0x274   : > { %8026 = vst [vmem:[#allocation137_spill] sm:$0xff] %v6368_v48  ;;  %v4150_v3 = vpop.eup %4149  ;;  %4169 = vrsqrt.f32 %v6250_v6  ;;  %v2327_v50 = vsel %vm2325_vm9, %v2326_v15, %v2324_v43  ;;  %v6394_v48 = vpop.f32.mrb[39].mxu0  ;;  %8028 = vst [vmem:[#allocation139_spill] sm:$0xff] %v6401_v61  ;;  %vm2381_vm9 = vcmp.eq.f32.partialorder %v6220_v22, 0.0 }
 0x275   : > { %v6384_v18 = vpop.eup %4151  ;;  %v2336_v53 = vmul.f32 %v4150_v3, %v6154_v62  ;;  %4171 = vrsqrt.f32 %v6259_v55  ;;  %v2691_v20 = vmax.f32 %v2327_v50, 1e-12 }
 0x276   : > { %8027 = vst [vmem:[#allocation138_spill] sm:$0xff] %v6384_v18  ;;  %v4154_v39 = vpop.eup %4153  ;;  %4173 = vrsqrt.f32 %v6261_v32 }
 0x277   : > { %v4156_v3 = vpop.eup %4155  ;;  %v2338_v27 = vsel %vm2337_vm10, %v6154_v62, %v2336_v53  ;;  %v2343_v18 = vmul.f32 %v4154_v39, %v6174_v44  ;;  %4175 = vrsqrt.f32 %v6268_v21  ;;  %vm2393_vm10 = vcmp.eq.f32.partialorder %v6227_v31, inf  ;;  %v6417_v53 = vpop.f32.mrb[40].mxu0 }
 0x278   : > { %v4158_v15 = vpop.eup %4157  ;;  %4177 = vrcp.f32 %v2691_v20  ;;  %v2341_v43 = vsel %vm2339_vm11, %v2340_v11, %v2338_v27  ;;  %v2357_v61 = vmul.f32 %v4156_v3, %v6185_v28  ;;  %8029 = vst [vmem:[#allocation140_spill] sm:$0xff] %v6417_v53  ;;  %vm2395_vm11 = vcmp.eq.f32.partialorder %v6227_v31, 0.0  ;;  %v6425_v11 = vpop.f32.mrb[40].mxu1 }
 0x279   : > { %v4160_v10 = vpop.eup %4159  ;;  %v2693_v19 = vmax.f32 %v2341_v43, 1e-12  ;;  %v2345_v50 = vsel %vm2344_vm12, %v6174_v44, %v2343_v18  ;;  %v2350_v20 = vmul.f32 %v4158_v15, %v6187_v40  ;;  %4179 = vrsqrt.f32 %v6279_v46  ;;  %8030 = vst [vmem:[#allocation141_spill] sm:$0xff] %v6425_v11  ;;  %v6427_v62 = vpop.f32.mrb[41].mxu0 }
 0x27a   : > { %8031 = vst [vmem:[#allocation142_spill] sm:$0xff] %v6427_v62  ;;  %v4162_v27 = vpop.eup %4161  ;;  %v8032_v3 = vand.u32 2147483648, %v6174_v44  ;;  %v2359_v18 = vsel %vm2358_vm14, %v6185_v28, %v2357_v61  ;;  %v2364_v15 = vmul.f32 %v4160_v10, %v6196_v41  ;;  %vm2400_vm12 = vcmp.eq.f32.partialorder %v6250_v6, inf  ;;  %v6439_v53 = vpop.f32.mrb[41].mxu1 }
 0x27b   : > { %v4164_v11 = vpop.eup %4163  ;;  %4181 = vrcp.f32 %v2693_v19  ;;  %v2362_v44 = vsel %vm2360_vm15, %v8033_v56, %v2359_v18  ;;  %v2352_v61 = vsel %vm2351_vm0, %v6187_v40, %v2350_v20  ;;  %vm2414_vm14 = vcmp.eq.f32.partialorder %v6259_v55, inf  ;;  %v6460_v20 = vpop.f32.mrb[42].mxu0 }
 0x27c   : > { %v2348_v43 = vsel %vm2346_vm13, %v8032_v3, %v2345_v50  ;;  %vm2402_vm13 = vcmp.eq.f32.partialorder %v6250_v6, 0.0  ;;  %v4166_v10 = vpop.eup %4165  ;;  %v2696_v50 = vmax.f32 %v2362_v44, 1e-12  ;;  %v8034_v3 = vand.u32 2147483648, %v6187_v40 }
 0x27d   : > { %v2694_v62 = vmax.f32 %v2348_v43, 1e-12  ;;  %v2366_v28 = vsel %vm2365_vm2, %v6196_v41, %v2364_v15  ;;  %v2371_v56 = vmul.f32 %v4162_v27, %v6213_v52  ;;  %vm2416_vm15 = vcmp.eq.f32.partialorder %v6259_v55, 0.0  ;;  %v4168_v43 = vpop.eup %4167  ;;  %v6469_v27 = vpop.f32.mrb[42].mxu1 }
 0x27e   : > { %v2355_v19 = vsel %vm2353_vm1, %v8034_v3, %v2352_v61  ;;  %vm2407_vm0 = vcmp.eq.f32.partialorder %v6261_v32, inf  ;;  %v8035_v44 = vand.u32 2147483648, %v6196_v41  ;;  %v2385_v61 = vmul.f32 %v4164_v11, %v6218_v45  ;;  %v6471_v15 = vpop.f32.mrb[43].mxu0  ;;  %v4170_v3 = vpop.eup %4169 }
 0x27f   : > { %4183 = vrcp.f32 %v2694_v62  ;;  %v2695_v18 = vmax.f32 %v2355_v19, 1e-12  ;;  %vm2409_vm1 = vcmp.eq.f32.partialorder %v6261_v32, 0.0  ;;  %vm2421_vm2 = vcmp.eq.f32.partialorder %v6268_v21, inf  ;;  %8036 = vst [vmem:[#allocation143_spill] sm:$0xff] %v6471_v15  ;;  %v6478_v11 = vpop.f32.mrb[43].mxu1  ;;  %v4172_v19 = vpop.eup %4171 }
 0x280   : > { %v2369_v40 = vsel %vm2367_vm3, %v8035_v44, %v2366_v28  ;;  %4185 = vrcp.f32 %v2696_v50  ;;  %v2373_v62 = vsel %vm2372_vm4, %v6213_v52, %v2371_v56  ;;  %v2378_v41 = vmul.f32 %v4166_v10, %v6220_v22  ;;  %8037 = vst [vmem:[#allocation144_spill] sm:$0xff] %v6478_v11  ;;  %v4174_v56 = vpop.eup %4173 }
 0x281   : > { %v2697_v39 = vmax.f32 %v2369_v40, 1e-12  ;;  %vm2423_vm3 = vcmp.eq.f32.partialorder %v6268_v21, 0.0  ;;  %4187 = vrcp.f32 %v2695_v18  ;;  %v8038_v28 = vand.u32 2147483648, %v6213_v52  ;;  %v6495_v52 = vpop.f32.mrb[44].mxu0 }
 0x282   : > { %v2387_v50 = vsel %vm2386_vm6, %v6218_v45, %v2385_v61  ;;  %v2392_v40 = vmul.f32 %v4168_v43, %v6227_v31  ;;  %v8039_v15 = vand.u32 2147483648, %v6218_v45  ;;  %v2380_v18 = vsel %vm2379_vm8, %v6220_v22, %v2378_v41 }
 0x283   : > { %v2376_v44 = vsel %vm2374_vm5, %v8038_v28, %v2373_v62  ;;  %4189 = vrcp.f32 %v2697_v39  ;;  %v4176_v62 = vpop.eup %4175  ;;  %v8040_v61 = vand.u32 2147483648, %v6220_v22  ;;  %v2399_v45 = vmul.f32 %v4170_v3, %v6250_v6 }
 0x284   : > { %v2698_v10 = vmax.f32 %v2376_v44, 1e-12  ;;  %v2390_v11 = vsel %vm2388_vm7, %v8039_v15, %v2387_v50  ;;  %v2394_v39 = vsel %vm2393_vm10, %v6227_v31, %v2392_v40  ;;  %v6505_v15 = vpop.f32.mrb[44].mxu1  ;;  %v6507_v44 = vpop.f32.mrb[45].mxu0  ;;  %vm2428_vm4 = vcmp.eq.f32.partialorder %v6279_v46, inf }
 0x285   : > { %v2700_v28 = vmax.f32 %v2390_v11, 1e-12  ;;  %v2383_v43 = vsel %vm2381_vm9, %v8040_v61, %v2380_v18  ;;  %8041 = vst [vmem:[#allocation145_spill] sm:$0xff] %v6505_v15  ;;  %8042 = vst [vmem:[#allocation146_spill] sm:$0xff] %v6507_v44  ;;  %v6509_v41 = vpop.eup %4177  ;;  %v8043_v11 = vand.u32 2147483648, %v6227_v31  ;;  %v2413_v18 = vmul.f32 %v4172_v19, %v6259_v55  ;;  %v6516_v61 = vpop.f32.mrb[45].mxu1 }
 0x286   : > { %4191 = vrcp.f32 %v2698_v10  ;;  %v2699_v50 = vmax.f32 %v2383_v43, 1e-12  ;;  %v4180_v40 = vpop.eup %4179  ;;  %v2401_v44 = vsel %vm2400_vm12, %v6250_v6, %v2399_v45  ;;  %v2406_v15 = vmul.f32 %v4174_v56, %v6261_v32 }
 0x287   : > { %v2397_v22 = vsel %vm2395_vm11, %v8043_v11, %v2394_v39  ;;  %4193 = vrcp.f32 %v2700_v28  ;;  %v8044_v10 = vand.u32 2147483648, %v6250_v6  ;;  %v2415_v19 = vsel %vm2414_vm14, %v6259_v55, %v2413_v18  ;;  %v6530_v28 = vpop.f32.mrb[46].mxu0  ;;  %v6532_v39 = vpop.eup %4181 }
 0x288   : > { %v2701_v3 = vmax.f32 %v2397_v22, 1e-12  ;;  %4195 = vrcp.f32 %v2699_v50  ;;  %v2420_v43 = vmul.f32 %v4176_v62, %v6268_v21  ;;  %v8045_v56 = vand.u32 2147483648, %v6259_v55  ;;  %v6543_v11 = vpop.f32.mrb[47].mxu0 }
 0x289   : > { %v2404_v31 = vsel %vm2402_vm13, %v8044_v10, %v2401_v44  ;;  %v2408_v6 = vsel %vm2407_vm0, %v6261_v32, %v2406_v15  ;;  %v6541_v44 = vpop.f32.mrb[46].mxu1  ;;  %v8046_v22 = vand.u32 2147483648, %v6261_v32  ;;  %v2427_v55 = vmul.f32 %v4180_v40, %v6279_v46 }
 0x28a   : > { %4197 = vrcp.f32 %v2701_v3  ;;  %v2702_v45 = vmax.f32 %v2404_v31, 1e-12  ;;  %v2418_v50 = vsel %vm2416_vm15, %v8045_v56, %v2415_v19  ;;  %v2422_v3 = vsel %vm2421_vm2, %v6268_v21, %v2420_v43  ;;  %v6553_v10 = vpop.f32.mrb[47].mxu1  ;;  %v6555_v31 = vpop.eup %4183 }
 0x28b   : > { %v2704_v62 = vmax.f32 %v2418_v50, 1e-12  ;;  %v2411_v18 = vsel %vm2409_vm1, %v8046_v22, %v2408_v6  ;;  %v8047_v19 = vand.u32 2147483648, %v6268_v21  ;;  %v6562_v32 = vpop.eup %4185  ;;  %v2429_v43 = vsel %vm2428_vm4, %v6279_v46, %v2427_v55 }
 0x28c   : > { %4199 = vrcp.f32 %v2702_v45  ;;  %v2703_v15 = vmax.f32 %v2411_v18, 1e-12  ;;  %v2431_v40 = vand.u32 2147483648, %v6279_v46  ;;  %v6566_v6 = vpop.eup %4187  ;;  %vm2430_vm5 = vcmp.eq.f32.partialorder %v6279_v46, 0.0 }
 0x28d   : > { %v2425_v56 = vsel %vm2423_vm3, %v8047_v19, %v2422_v3  ;;  %4201 = vrcp.f32 %v2704_v62  ;;  %v6569_v45 = vpop.eup %4189  ;;  %vm2442_vm6 = vcmp.eq.f32.partialorder %v6291_v5, inf  ;;  %vm2444_vm7 = vcmp.eq.f32.partialorder %v6291_v5, 0.0 }
 0x28e   : > { %v2705_v50 = vmax.f32 %v2425_v56, 1e-12  ;;  %4203 = vrcp.f32 %v2703_v15  ;;  %v2432_v21 = vsel %vm2430_vm5, %v2431_v40, %v2429_v43  ;;  %v2445_v46 = vand.u32 2147483648, %v6291_v5 }
 0x28f   : > { %v2706_v22 = vmax.f32 %v2432_v21, 1e-12  ;;  %vm2435_vm8 = vcmp.eq.f32.partialorder %v6293_v7, inf  ;;  %vm2437_vm9 = vcmp.eq.f32.partialorder %v6293_v7, 0.0  ;;  %v2438_v19 = vand.u32 2147483648, %v6293_v7 }
 0x290   : > { %4205 = vrcp.f32 %v2705_v50  ;;  %v6572_v18 = vpop.eup %4191  ;;  %vm2449_vm10 = vcmp.eq.f32.partialorder %v6300_v2, inf  ;;  %vm2451_vm11 = vcmp.eq.f32.partialorder %v6300_v2, 0.0  ;;  %vm2456_vm12 = vcmp.eq.f32.partialorder %v6308_v58, inf }
 0x291   : > { %4207 = vrsqrt.f32 %v6291_v5  ;;  %v6575_v62 = vpop.eup %4193  ;;  %vm2458_vm13 = vcmp.eq.f32.partialorder %v6308_v58, 0.0  ;;  %vm2470_vm14 = vcmp.eq.f32.partialorder %v6312_v63, inf  ;;  %v2745_v21 = vmul.f32 %v6295_v36, %v5432_v0 }
 0x292   : > { %4209 = vrsqrt.f32 %v6293_v7  ;;  %v6577_v3 = vpop.eup %4195  ;;  %vm2472_vm15 = vcmp.eq.f32.partialorder %v6312_v63, 0.0  ;;  %vm2463_vm0 = vcmp.eq.f32.partialorder %v6314_v1, inf  ;;  %v2749_v43 = vmul.f32 %v6302_v24, %v5687_v29 }
 0x293   : > { %4211 = vrcp.f32 %v2706_v22  ;;  %vm2465_vm1 = vcmp.eq.f32.partialorder %v6314_v1, 0.0  ;;  %v2743_v0 = vmul.f32 %v6272_v17, %v5472_v14  ;;  %v2751_v36 = vmul.f32 %v6306_v13, %v5484_v49 }
 0x294   : > { %4213 = vrsqrt.f32 %v6300_v2  ;;  %v6580_v55 = vpop.eup %4197  ;;  %vm2477_vm2 = vcmp.eq.f32.partialorder %v6317_v59, inf  ;;  %vm2479_vm3 = vcmp.eq.f32.partialorder %v6317_v59, 0.0  ;;  %vm2484_vm4 = vcmp.eq.f32.partialorder %v6322_v9, inf }
 0x295   : > { %4215 = vrsqrt.f32 %v6308_v58  ;;  %v3786_v14 = vpack.c.bf16 %v2751_v36, %v2743_v0  ;;  %v2755_v49 = vmul.f32 %v6310_v51, %v5708_v25  ;;  %vm2486_vm5 = vcmp.eq.f32.partialorder %v6322_v9, 0.0 }
 0x296   : > { %4217 = vrsqrt.f32 %v6312_v63  ;;  %v6587_v15 = vpop.eup %4199  ;;  %v8052_v0 = vand.u32 2147483648, %v6300_v2 }
 0x297   : > { %8048 = vst [vmem:[#allocation147_spill] sm:$0xff] %v6587_v15  ;;  %4219 = vrsqrt.f32 %v6314_v1  ;;  %v6593_v56 = vpop.eup %4201 }
 0x298   : > { %8049 = vst [vmem:[#allocation148_spill] sm:$0xff] %v6593_v56  ;;  %4221 = vrsqrt.f32 %v6317_v59  ;;  %v6599_v40 = vpop.eup %4203  ;;  %v2753_v56 = vmul.f32 %v6319_v54, %v5478_v33  ;;  %v2747_v54 = vmul.f32 %v6281_v35, %v5694_v16 }
 0x299   : > { %8050 = vst [vmem:[#allocation149_spill] sm:$0xff] %v6599_v40  ;;  %4223 = vrsqrt.f32 %v6322_v9 }
 0x29a   : > { %v6607_v15 = vpop.eup %4205  ;;  %4225 = vrsqrt.f32 %v6327_v12 }
 0x29b   : > { %8051 = vst [vmem:[#allocation150_spill] sm:$0xff] %v6607_v15  ;;  %v4208_v22 = vpop.eup %4207  ;;  %4227 = vrsqrt.f32 %v6329_v60  ;;  %v2757_v15 = vmul.f32 %v6324_v23, %v5698_v42  ;;  %v3784_v42 = vpack.c.bf16 %v2753_v56, %v2745_v21  ;;  %v3818_v56 = vpack.c.bf16 %v2755_v49, %v2747_v54 }
 0x29c   : > { %v4210_v50 = vpop.eup %4209  ;;  %v2441_v40 = vmul.f32 %v4208_v22, %v6291_v5  ;;  %4229 = vrsqrt.f32 %v6335_v4 }
 0x29d   : > { %v6632_v33 = vpop.eup %4211  ;;  %v2434_v29 = vmul.f32 %v4210_v50, %v6293_v7  ;;  %v3816_v24 = vpack.c.bf16 %v2757_v15, %v2749_v43  ;;  %4231 = vrsqrt.f32 %v6349_v57  ;;  %v2494_v15 = vand.u32 2147483648, %v6329_v60  ;;  %3785 = vmatprep.subr.bf16.mxu1 %v3784_v42 }
 0x29e   : > { %v4214_v23 = vpop.eup %4213  ;;  %v2443_v22 = vsel %vm2442_vm6, %v6291_v5, %v2441_v40  ;;  %3787 = vmatpush1.bf16.xpose.msra.mxu1 %v3786_v14  ;;  %vm2493_vm6 = vcmp.eq.f32.partialorder %v6329_v60, 0.0 }
 0x29f   : > { %v4216_v17 = vpop.eup %4215  ;;  %v2446_v13 = vsel %vm2444_vm7, %v2445_v46, %v2443_v22  ;;  %v2436_v16 = vsel %vm2435_vm8, %v6293_v7, %v2434_v29  ;;  %v2448_v35 = vmul.f32 %v4214_v23, %v6300_v2  ;;  %3817 = vmatprep.subr.bf16.mxu0 %v3816_v24  ;;  %vm2500_vm7 = vcmp.eq.f32.partialorder %v6327_v12, 0.0 }
 0x2a0   : > { %v4218_v25 = vpop.eup %4217  ;;  %v2708_v51 = vmax.f32 %v2446_v13, 1e-12  ;;  %v2439_v5 = vsel %vm2437_vm9, %v2438_v19, %v2436_v16  ;;  %v2455_v46 = vmul.f32 %v4216_v17, %v6308_v58  ;;  %vm2491_vm8 = vcmp.eq.f32.partialorder %v6329_v60, inf  ;;  %3819 = vmatpush1.bf16.xpose.msra.mxu0 %v3818_v56 }
 0x2a1   : > { %v4220_v50 = vpop.eup %4219  ;;  %v2707_v43 = vmax.f32 %v2439_v5, 1e-12  ;;  %v2450_v40 = vsel %vm2449_vm10, %v6300_v2, %v2448_v35  ;;  %v2469_v21 = vmul.f32 %v4218_v25, %v6312_v63  ;;  %v2508_v7 = vand.u32 2147483648, %v6335_v4 }
 0x2a2   : > { %v4222_v19 = vpop.eup %4221  ;;  %4233 = vrcp.f32 %v2708_v51  ;;  %v2453_v36 = vsel %vm2451_vm11, %v8052_v0, %v2450_v40  ;;  %v2457_v29 = vsel %vm2456_vm12, %v6308_v58, %v2455_v46  ;;  %v2462_v42 = vmul.f32 %v4220_v50, %v6314_v1 }
 0x2a3   : > { %vm2505_vm9 = vcmp.eq.f32.partialorder %v6335_v4, inf  ;;  %v4224_v24 = vpop.eup %4223  ;;  %4235 = vrcp.f32 %v2707_v43  ;;  %v2709_v54 = vmax.f32 %v2453_v36, 1e-12  ;;  %v8053_v23 = vand.u32 2147483648, %v6308_v58 }
 0x2a4   : > { %v2471_v2 = vsel %vm2470_vm14, %v6312_v63, %v2469_v21  ;;  %vm2507_vm10 = vcmp.eq.f32.partialorder %v6335_v4, 0.0  ;;  %vm2512_vm11 = vcmp.eq.f32.partialorder %v6349_v57, inf  ;;  %v4226_v14 = vpop.eup %4225  ;;  %v8054_v17 = vand.u32 2147483648, %v6312_v63 }
 0x2a5   : > { %v2460_v22 = vsel %vm2458_vm13, %v8053_v23, %v2457_v29  ;;  %v2464_v58 = vsel %vm2463_vm0, %v6314_v1, %v2462_v42  ;;  %v2476_v16 = vmul.f32 %v4222_v19, %v6317_v59  ;;  %v4228_v35 = vpop.eup %4227  ;;  %4237 = vrcp.f32 %v2709_v54 }
 0x2a6   : > { %v2710_v49 = vmax.f32 %v2460_v22, 1e-12  ;;  %v2474_v13 = vsel %vm2472_vm15, %v8054_v17, %v2471_v2  ;;  %v8055_v51 = vand.u32 2147483648, %v6314_v1  ;;  %v2483_v46 = vmul.f32 %v4224_v24, %v6322_v9  ;;  %v4230_v56 = vpop.eup %4229 }
 0x2a7   : > { %v2712_v25 = vmax.f32 %v2474_v13, 1e-12  ;;  %v2478_v50 = vsel %vm2477_vm2, %v6317_v59, %v2476_v16  ;;  %v2497_v43 = vmul.f32 %v4226_v14, %v6327_v12  ;;  %v8056_v40 = vand.u32 2147483648, %v6317_v59  ;;  %v4232_v0 = vpop.eup %4231 }
 0x2a8   : > { %v2467_v5 = vsel %vm2465_vm1, %v8055_v51, %v2464_v58  ;;  %4239 = vrcp.f32 %v2710_v49  ;;  %v2485_v1 = vsel %vm2484_vm4, %v6322_v9, %v2483_v46  ;;  %v2490_v19 = vmul.f32 %v4228_v35, %v6329_v60 }
 0x2a9   : > { %v2711_v63 = vmax.f32 %v2467_v5, 1e-12  ;;  %4241 = vrcp.f32 %v2712_v25  ;;  %v2481_v21 = vsel %vm2479_vm3, %v8056_v40, %v2478_v50  ;;  %v8057_v29 = vand.u32 2147483648, %v6322_v9 }
 0x2aa   : > { %v2713_v36 = vmax.f32 %v2481_v21, 1e-12  ;;  %vm8058_vm12 = vcmp.eq.f32.partialorder %v6327_v12, inf  ;;  %v8059_v54 = vand.u32 2147483648, %v6327_v12  ;;  %v2492_v22 = vsel %vm2491_vm8, %v6329_v60, %v2490_v19  ;;  %v8060_v21 = vld [vmem:[#allocation13_spill] sm:$0xff]  ;;  %v8061_v19 = vld [vmem:[#allocation40_spill] sm:$0xff] }
 0x2ab   : > { %4243 = vrcp.f32 %v2711_v63  ;;  %v2488_v42 = vsel %vm2486_vm5, %v8057_v29, %v2485_v1  ;;  %v2499_v24 = vsel %vm8058_vm12, %v6327_v12, %v2497_v43  ;;  %v2504_v2 = vmul.f32 %v4230_v56, %v6335_v4  ;;  %v8063_v29 = vld [vmem:[#allocation43_spill] sm:$0xff] }
 0x2ac   : > { %v2714_v59 = vmax.f32 %v2488_v42, 1e-12  ;;  %v2502_v23 = vsel %vm2500_vm7, %v8059_v54, %v2499_v24  ;;  %4245 = vrcp.f32 %v2713_v36  ;;  %v2495_v9 = vsel %vm2493_vm6, %v2494_v15, %v2492_v22  ;;  %v6731_v58 = vpop.eup %4233  ;;  %v8068_v22 = vld [vmem:[#allocation137_spill] sm:$0xff] }
 0x2ad   : > { %v2716_v14 = vmax.f32 %v2502_v23, 1e-12  ;;  %v2511_v49 = vmul.f32 %v4232_v0, %v6349_v57  ;;  %v2715_v17 = vmax.f32 %v2495_v9, 1e-12  ;;  %v2506_v12 = vsel %vm2505_vm9, %v6335_v4, %v2504_v2  ;;  %v6739_v15 = vpop.eup %4235  ;;  %v8062_v0 = vld [vmem:[#allocation136_spill] sm:$0xff]  ;;  %v8067_v23 = vld [vmem:[#allocation14_spill] sm:$0xff] }
 0x2ae   : > { %4247 = vrcp.f32 %v2714_v59  ;;  %v2515_v13 = vand.u32 2147483648, %v6349_v57  ;;  %v2509_v16 = vsel %vm2507_vm10, %v2508_v7, %v2506_v12  ;;  %vm2514_vm13 = vcmp.eq.f32.partialorder %v6349_v57, 0.0  ;;  %v8066_v59 = vld [vmem:[#allocation134_spill] sm:$0xff]  ;;  %v8069_v2 = vld [vmem:[#allocation41_spill] sm:$0xff]  ;;  %v8071_v12 = vld [vmem:[#allocation44_spill] sm:$0xff] }
 0x2af   : > { %4249 = vrcp.f32 %v2716_v14  ;;  %v2513_v60 = vsel %vm2512_vm11, %v6349_v57, %v2511_v49  ;;  %v2717_v35 = vmax.f32 %v2509_v16, 1e-12  ;;  %v6742_v5 = vpop.eup %4237  ;;  %vm2526_vm14 = vcmp.eq.f32.partialorder %v6355_v38, inf  ;;  %v8070_v14 = vld [vmem:[#allocation135_spill] sm:$0xff] }
 0x2b0   : > { %4251 = vrcp.f32 %v2715_v17  ;;  %v2516_v25 = vsel %vm2514_vm13, %v2515_v13, %v2513_v60  ;;  %vm2528_vm15 = vcmp.eq.f32.partialorder %v6355_v38, 0.0  ;;  %v2529_v57 = vand.u32 2147483648, %v6355_v38  ;;  %v8072_v13 = vld [vmem:[#allocation138_spill] sm:$0xff]  ;;  %v8073_v60 = vld [vmem:[#allocation140_spill] sm:$0xff] }
 0x2b1   : > { %v2718_v51 = vmax.f32 %v2516_v25, 1e-12  ;;  %4253 = vrsqrt.f32 %v6355_v38  ;;  %v2522_v63 = vand.u32 2147483648, %v6357_v34  ;;  %v2536_v50 = vand.u32 2147483648, %v6366_v37 }
 0x2b2   : > { %4255 = vrcp.f32 %v2717_v35  ;;  %v6744_v46 = vpop.eup %4239  ;;  %v2761_v43 = vmul.f32 %v6343_v30, %v5492_v26  ;;  %vm2519_vm0 = vcmp.eq.f32.partialorder %v6357_v34, inf  ;;  %v2769_v1 = vmul.f32 %v6509_v41, %v8060_v21  ;;  %v8064_v26 = vld [vmem:[#allocation139_spill] sm:$0xff]  ;;  %v8065_v30 = vld [vmem:[#allocation12_spill] sm:$0xff] }
 0x2b3   : > { %4257 = vrcp.f32 %v2718_v51  ;;  %v6746_v4 = vpop.eup %4241  ;;  %v2765_v36 = vmul.f32 %v8062_v0, %v8061_v19  ;;  %v2773_v42 = vmul.f32 %v6532_v39, %v8063_v29  ;;  %vm2521_vm1 = vcmp.eq.f32.partialorder %v6357_v34, 0.0  ;;  %v8074_v0 = vld [vmem:[#allocation141_spill] sm:$0xff] }
 0x2b4   : > { %4259 = vrsqrt.f32 %v6357_v34  ;;  %vm2533_vm2 = vcmp.eq.f32.partialorder %v6366_v37, inf  ;;  %v2759_v54 = vmul.f32 %v8066_v59, %v8065_v30  ;;  %v2767_v41 = vmul.f32 %v8068_v22, %v8067_v23 }
 0x2b5   : > { %v6749_v7 = vpop.eup %4243  ;;  %4261 = vrsqrt.f32 %v6366_v37  ;;  %v2763_v9 = vmul.f32 %v8070_v14, %v8069_v2  ;;  %vm2535_vm3 = vcmp.eq.f32.partialorder %v6366_v37, 0.0  ;;  %vm2540_vm4 = vcmp.eq.f32.partialorder %v6382_v47, inf }
 0x2b6   : > { %4263 = vrsqrt.f32 %v6382_v47  ;;  %v6756_v56 = vpop.eup %4245  ;;  %v3788_v39 = vpack.c.bf16 %v2769_v1, %v2761_v43  ;;  %v3820_v17 = vpack.c.bf16 %v2773_v42, %v2765_v36  ;;  %v2771_v16 = vmul.f32 %v8072_v13, %v8071_v12  ;;  %v8075_v42 = vld [vmem:[#allocation142_spill] sm:$0xff] }
 0x2b7   : > { %4265 = vrsqrt.f32 %v6392_v8  ;;  %vm2542_vm5 = vcmp.eq.f32.partialorder %v6382_v47, 0.0  ;;  %v2543_v25 = vand.u32 2147483648, %v6382_v47  ;;  %vm2554_vm6 = vcmp.eq.f32.partialorder %v6392_v8, inf }
 0x2b8   : > { %v6763_v40 = vpop.eup %4247  ;;  %4267 = vrsqrt.f32 %v6394_v48  ;;  %v3790_v51 = vpack.c.bf16 %v2767_v41, %v2759_v54  ;;  %vm2556_vm7 = vcmp.eq.f32.partialorder %v6392_v8, 0.0  ;;  %v2557_v43 = vand.u32 2147483648, %v6392_v8  ;;  %3789 = vmatprep.subr.bf16.mxu1 %v3788_v39  ;;  %3821 = vmatprep.subr.bf16.mxu0 %v3820_v17 }
 0x2b9   : > { %v6773_v24 = vpop.eup %4249  ;;  %4269 = vrsqrt.f32 %v8064_v26  ;;  %v3822_v1 = vpack.c.bf16 %v2771_v16, %v2763_v9  ;;  %vm2547_vm8 = vcmp.eq.f32.partialorder %v6394_v48, inf  ;;  %vm2549_vm9 = vcmp.eq.f32.partialorder %v6394_v48, 0.0 }
 0x2ba   : > { %v6784_v49 = vpop.eup %4251  ;;  %4271 = vrsqrt.f32 %v8073_v60  ;;  %v2550_v29 = vand.u32 2147483648, %v6394_v48  ;;  %3791 = vmatpush1.bf16.xpose.msra.mxu1 %v3790_v51  ;;  %vm2561_vm10 = vcmp.eq.f32.partialorder %v8064_v26, inf  ;;  %vm2563_vm11 = vcmp.eq.f32.partialorder %v8064_v26, 0.0 }
 0x2bb   : > { %v4254_v35 = vpop.eup %4253  ;;  %4273 = vrsqrt.f32 %v8074_v0  ;;  %3823 = vmatpush1.bf16.xpose.msra.mxu0 %v3822_v1  ;;  %v2564_v41 = vand.u32 2147483648, %v8064_v26  ;;  %v2571_v2 = vand.u32 2147483648, %v8073_v60  ;;  %vm2568_vm12 = vcmp.eq.f32.partialorder %v8073_v60, inf }
 0x2bc   : > { %v6794_v21 = vpop.eup %4255  ;;  %v2525_v19 = vmul.f32 %v4254_v35, %v6355_v38  ;;  %4275 = vrsqrt.f32 %v8075_v42  ;;  %v2585_v17 = vand.u32 2147483648, %v8074_v0  ;;  %vm2570_vm13 = vcmp.eq.f32.partialorder %v8073_v60, 0.0 }
 0x2bd   : > { %v6800_v36 = vpop.eup %4257  ;;  %4277 = vrsqrt.f32 %v6439_v53  ;;  %v2578_v13 = vand.u32 2147483648, %v8075_v42 }
 0x2be   : > { %v4260_v30 = vpop.eup %4259  ;;  %v2527_v59 = vsel %vm2526_vm14, %v6355_v38, %v2525_v19  ;;  %4279 = vrsqrt.f32 %v6460_v20  ;;  %vm2577_vm14 = vcmp.eq.f32.partialorder %v8075_v42, 0.0 }
 0x2bf   : > { %v4262_v54 = vpop.eup %4261  ;;  %v2530_v23 = vsel %vm2528_vm15, %v2529_v57, %v2527_v59  ;;  %v2518_v22 = vmul.f32 %v4260_v30, %v6357_v34  ;;  %vm2589_vm15 = vcmp.eq.f32.partialorder %v6439_v53, inf }
 0x2c0   : > { %v4264_v14 = vpop.eup %4263  ;;  %v2720_v9 = vmax.f32 %v2530_v23, 1e-12  ;;  %v2532_v39 = vmul.f32 %v4262_v54, %v6366_v37 }
 0x2c1   : > { %v4266_v12 = vpop.eup %4265  ;;  %v2520_v38 = vsel %vm2519_vm0, %v6357_v34, %v2518_v22  ;;  %v2539_v57 = vmul.f32 %v4264_v14, %v6382_v47  ;;  %vm2584_vm0 = vcmp.eq.f32.partialorder %v8074_v0, 0.0 }
 0x2c2   : > { %v4268_v16 = vpop.eup %4267  ;;  %4281 = vrcp.f32 %v2720_v9  ;;  %v2523_v35 = vsel %vm2521_vm1, %v2522_v63, %v2520_v38  ;;  %v2534_v51 = vsel %vm2533_vm2, %v6366_v37, %v2532_v39  ;;  %v2553_v19 = vmul.f32 %v4266_v12, %v6392_v8 }
 0x2c3   : > { %v4270_v1 = vpop.eup %4269  ;;  %v2719_v30 = vmax.f32 %v2523_v35, 1e-12  ;;  %v2537_v34 = vsel %vm2535_vm3, %v2536_v50, %v2534_v51  ;;  %v2541_v63 = vsel %vm2540_vm4, %v6382_v47, %v2539_v57  ;;  %v2546_v59 = vmul.f32 %v4268_v16, %v6394_v48 }
 0x2c4   : > { %vm2591_vm1 = vcmp.eq.f32.partialorder %v6439_v53, 0.0  ;;  %v4272_v54 = vpop.eup %4271  ;;  %v2721_v23 = vmax.f32 %v2537_v34, 1e-12  ;;  %v2544_v22 = vsel %vm2542_vm5, %v2543_v25, %v2541_v63  ;;  %v2555_v14 = vsel %vm2554_vm6, %v6392_v8, %v2553_v19 }
 0x2c5   : > { %v2560_v37 = vmul.f32 %v4270_v1, %v8064_v26  ;;  %4283 = vrcp.f32 %v2719_v30  ;;  %v2722_v50 = vmax.f32 %v2544_v22, 1e-12  ;;  %v2558_v9 = vsel %vm2556_vm7, %v2557_v43, %v2555_v14  ;;  %v4274_v12 = vpop.eup %4273 }
 0x2c6   : > { %v2548_v39 = vsel %vm2547_vm8, %v6394_v48, %v2546_v59  ;;  %4285 = vrcp.f32 %v2721_v23  ;;  %v2724_v38 = vmax.f32 %v2558_v9, 1e-12  ;;  %v4276_v57 = vpop.eup %4275  ;;  %v2567_v43 = vmul.f32 %v4272_v54, %v8073_v60 }
 0x2c7   : > { %v2551_v47 = vsel %vm2549_vm9, %v2550_v29, %v2548_v39  ;;  %v2562_v25 = vsel %vm2561_vm10, %v8064_v26, %v2560_v37  ;;  %4287 = vrcp.f32 %v2722_v50  ;;  %v4278_v35 = vpop.eup %4277  ;;  %v2581_v19 = vmul.f32 %v4274_v12, %v8074_v0 }
 0x2c8   : > { %v2723_v16 = vmax.f32 %v2551_v47, 1e-12  ;;  %v2565_v8 = vsel %vm2563_vm11, %v2564_v41, %v2562_v25  ;;  %4289 = vrcp.f32 %v2724_v38  ;;  %v2574_v48 = vmul.f32 %v4276_v57, %v8075_v42  ;;  %v4280_v26 = vpop.eup %4279  ;;  %v8078_v38 = vld [vmem:[#allocation15_spill] sm:$0xff]  ;;  %v8079_v25 = vld [vmem:[#allocation17_spill] sm:$0xff] }
 0x2c9   : > { %v2725_v51 = vmax.f32 %v2565_v8, 1e-12  ;;  %v2569_v29 = vsel %vm2568_vm12, %v8073_v60, %v2567_v43  ;;  %v2588_v1 = vmul.f32 %v4278_v35, %v6439_v53  ;;  %v2592_v30 = vand.u32 2147483648, %v6439_v53  ;;  %v8081_v43 = vld [vmem:[#allocation47_spill] sm:$0xff] }
 0x2ca   : > { %4291 = vrcp.f32 %v2723_v16  ;;  %v2572_v41 = vsel %vm2570_vm13, %v2571_v2, %v2569_v29  ;;  %vm8076_vm2 = vcmp.eq.f32.partialorder %v8074_v0, inf  ;;  %vm8077_vm3 = vcmp.eq.f32.partialorder %v8075_v42, inf  ;;  %v8083_v29 = vld [vmem:[#allocation16_spill] sm:$0xff] }
 0x2cb   : > { %4293 = vrcp.f32 %v2725_v51  ;;  %v2583_v34 = vsel %vm8076_vm2, %v8074_v0, %v2581_v19  ;;  %v2576_v63 = vsel %vm8077_vm3, %v8075_v42, %v2574_v48  ;;  %v2726_v59 = vmax.f32 %v2572_v41, 1e-12  ;;  %v8082_v19 = vld [vmem:[#allocation143_spill] sm:$0xff] }
 0x2cc   : > { %v2586_v54 = vsel %vm2584_vm0, %v2585_v17, %v2583_v34  ;;  %v2579_v23 = vsel %vm2577_vm14, %v2578_v13, %v2576_v63  ;;  %v2590_v60 = vsel %vm2589_vm15, %v6439_v53, %v2588_v1  ;;  %v6890_v2 = vpop.eup %4281  ;;  %v2595_v50 = vmul.f32 %v4280_v26, %v6460_v20  ;;  %v8084_v1 = vld [vmem:[#allocation18_spill] sm:$0xff]  ;;  %v8085_v26 = vld [vmem:[#allocation144_spill] sm:$0xff] }
 0x2cd   : > { %v2728_v22 = vmax.f32 %v2586_v54, 1e-12  ;;  %v2727_v14 = vmax.f32 %v2579_v23, 1e-12  ;;  %v2593_v37 = vsel %vm2591_vm1, %v2592_v30, %v2590_v60  ;;  %4295 = vrcp.f32 %v2726_v59  ;;  %v8088_v59 = vld [vmem:[#allocation80_spill] sm:$0xff]  ;;  %v8089_v23 = vld [vmem:[#allocation82_spill] sm:$0xff] }
 0x2ce   : > { %v2729_v9 = vmax.f32 %v2593_v37, 1e-12  ;;  %vm2596_vm4 = vcmp.eq.f32.partialorder %v6460_v20, inf  ;;  %v2599_v0 = vand.u32 2147483648, %v6460_v20  ;;  %vm2598_vm5 = vcmp.eq.f32.partialorder %v6460_v20, 0.0  ;;  %v8091_v37 = vld [vmem:[#allocation145_spill] sm:$0xff] }
 0x2cf   : > { %4297 = vrcp.f32 %v2728_v22  ;;  %v2597_v42 = vsel %vm2596_vm4, %v6460_v20, %v2595_v50  ;;  %v6899_v17 = vpop.eup %4283  ;;  %v2777_v47 = vmul.f32 %v6566_v6, %v8078_v38  ;;  %v2785_v57 = vmul.f32 %v6577_v3, %v8079_v25  ;;  %v8080_v20 = vld [vmem:[#allocation45_spill] sm:$0xff]  ;;  %v8092_v50 = vld [vmem:[#allocation146_spill] sm:$0xff]  ;;  %v8098_v54 = vld [vmem:[#allocation51_spill] sm:$0xff] }
 0x2d0   : > { %4299 = vrcp.f32 %v2727_v14  ;;  %v2600_v13 = vsel %vm2598_vm5, %v2599_v0, %v2597_v42  ;;  %v6901_v39 = vpop.eup %4285  ;;  %v2781_v8 = vmul.f32 %v6569_v45, %v8080_v20  ;;  %v2789_v35 = vmul.f32 %v6580_v55, %v8081_v43  ;;  %v8086_v45 = vld [vmem:[#allocation46_spill] sm:$0xff]  ;;  %v8087_v55 = vld [vmem:[#allocation48_spill] sm:$0xff] }
 0x2d1   : > { %4301 = vrcp.f32 %v2729_v9  ;;  %v2730_v53 = vmax.f32 %v2600_v13, 1e-12  ;;  %v6903_v12 = vpop.eup %4287  ;;  %v3792_v48 = vpack.c.bf16 %v2785_v57, %v2777_v47  ;;  %v2775_v6 = vmul.f32 %v6555_v31, %v8083_v29  ;;  %v8097_v22 = vld [vmem:[#allocation150_spill] sm:$0xff] }
 0x2d2   : > { %4303 = vrsqrt.f32 %v6469_v27  ;;  %v6910_v16 = vpop.eup %4289  ;;  %v2783_v3 = vmul.f32 %v6572_v18, %v8084_v1  ;;  %v3824_v41 = vpack.c.bf16 %v2789_v35, %v2781_v8  ;;  %v2779_v34 = vmul.f32 %v6562_v32, %v8086_v45  ;;  %v8090_v18 = vld [vmem:[#allocation84_spill] sm:$0xff]  ;;  %v8100_v1 = vld [vmem:[#allocation147_spill] sm:$0xff] }
 0x2d3   : > { %4305 = vrcp.f32 %v2730_v53  ;;  %v2787_v63 = vmul.f32 %v6575_v62, %v8087_v55  ;;  %3793 = vmatprep.subr.bf16.mxu1 %v3792_v48  ;;  %vm2610_vm6 = vcmp.eq.f32.partialorder %v6469_v27, inf  ;;  %vm2612_vm7 = vcmp.eq.f32.partialorder %v6469_v27, 0.0 }
 0x2d4   : > { %v6916_v51 = vpop.eup %4291  ;;  %4307 = vrsqrt.f32 %v8082_v19  ;;  %v3794_v31 = vpack.c.bf16 %v2783_v3, %v2775_v6  ;;  %3825 = vmatprep.subr.bf16.mxu0 %v3824_v41  ;;  %v2613_v62 = vand.u32 2147483648, %v6469_v27  ;;  %vm2603_vm8 = vcmp.eq.f32.partialorder %v8082_v19, inf  ;;  %v8093_v3 = vld [vmem:[#allocation19_spill] sm:$0xff]  ;;  %v8094_v41 = vld [vmem:[#allocation149_spill] sm:$0xff] }
 0x2d5   : > { %v6923_v30 = vpop.eup %4293  ;;  %4309 = vrsqrt.f32 %v8085_v26  ;;  %v3826_v14 = vpack.c.bf16 %v2787_v63, %v2779_v34  ;;  %vm2605_vm9 = vcmp.eq.f32.partialorder %v8082_v19, 0.0  ;;  %v2606_v0 = vand.u32 2147483648, %v8082_v19  ;;  %v8095_v34 = vld [vmem:[#allocation21_spill] sm:$0xff] }
 0x2d6   : > { %4311 = vrsqrt.f32 %v6495_v52  ;;  %3795 = vmatpush1.bf16.xpose.msra.mxu1 %v3794_v31  ;;  %vm2617_vm10 = vcmp.eq.f32.partialorder %v8085_v26, inf  ;;  %vm2619_vm11 = vcmp.eq.f32.partialorder %v8085_v26, 0.0  ;;  %v2620_v13 = vand.u32 2147483648, %v8085_v26 }
 0x2d7   : > { %4313 = vrsqrt.f32 %v8091_v37  ;;  %v6936_v32 = vpop.eup %4295  ;;  %3827 = vmatpush1.bf16.xpose.msra.mxu0 %v3826_v14  ;;  %vm2624_vm12 = vcmp.eq.f32.partialorder %v6495_v52, inf  ;;  %vm2626_vm13 = vcmp.eq.f32.partialorder %v6495_v52, 0.0  ;;  %v2627_v38 = vand.u32 2147483648, %v6495_v52 }
 0x2d8   : > { %4315 = vrsqrt.f32 %v8092_v50  ;;  %vm2638_vm14 = vcmp.eq.f32.partialorder %v8091_v37, inf  ;;  %vm2640_vm15 = vcmp.eq.f32.partialorder %v8091_v37, 0.0  ;;  %v2641_v25 = vand.u32 2147483648, %v8091_v37 }
 0x2d9   : > { %v6942_v9 = vpop.eup %4297  ;;  %4317 = vrsqrt.f32 %v6516_v61  ;;  %v2634_v57 = vand.u32 2147483648, %v8092_v50  ;;  %v2648_v20 = vand.u32 2147483648, %v6516_v61  ;;  %vm2631_vm0 = vcmp.eq.f32.partialorder %v8092_v50, inf }
 0x2da   : > { %v6948_v42 = vpop.eup %4299  ;;  %4319 = vrsqrt.f32 %v6530_v28  ;;  %v2655_v35 = vand.u32 2147483648, %v6530_v28  ;;  %vm2633_vm1 = vcmp.eq.f32.partialorder %v8092_v50, 0.0  ;;  %vm2645_vm2 = vcmp.eq.f32.partialorder %v6516_v61, inf }
 0x2db   : > { %v6954_v53 = vpop.eup %4301  ;;  %4321 = vrsqrt.f32 %v6541_v44  ;;  %v2793_v45 = vmul.f32 %v8094_v41, %v8093_v3  ;;  %v2801_v55 = vmul.f32 %v6739_v15, %v8095_v34  ;;  %vm2647_vm3 = vcmp.eq.f32.partialorder %v6516_v61, 0.0 }
 0x2dc   : > { %v4304_v47 = vpop.eup %4303  ;;  %4323 = vrsqrt.f32 %v6543_v11  ;;  %vm2652_vm4 = vcmp.eq.f32.partialorder %v6530_v28, inf  ;;  %v2805_v3 = vmul.f32 %v6742_v5, %v8098_v54  ;;  %vm2654_vm5 = vcmp.eq.f32.partialorder %v6530_v28, 0.0 }
 0x2dd   : > { %v6965_v8 = vpop.eup %4305  ;;  %v2609_v43 = vmul.f32 %v4304_v47, %v6469_v27  ;;  %4325 = vrsqrt.f32 %v6553_v10  ;;  %v8096_v47 = vld [vmem:[#allocation49_spill] sm:$0xff] }
 0x2de   : > { %v4308_v29 = vpop.eup %4307  ;;  %v2797_v60 = vmul.f32 %v8097_v22, %v8096_v47 }
 0x2df   : > { %v4310_v63 = vpop.eup %4309  ;;  %v2611_v31 = vsel %vm2610_vm6, %v6469_v27, %v2609_v43  ;;  %v2602_v14 = vmul.f32 %v4308_v29, %v8082_v19  ;;  %v3796_v43 = vpack.c.bf16 %v2801_v55, %v2793_v45  ;;  %v8099_v29 = vld [vmem:[#allocation20_spill] sm:$0xff]  ;;  %vm2659_vm6 = vcmp.eq.f32.partialorder %v6543_v11, inf  ;;  %v8101_v55 = vld [vmem:[#allocation22_spill] sm:$0xff] }
 0x2e0   : > { %v4312_v41 = vpop.eup %4311  ;;  %v2614_v15 = vsel %vm2612_vm7, %v2613_v62, %v2611_v31  ;;  %v2616_v34 = vmul.f32 %v4310_v63, %v8085_v26  ;;  %v6997_v6 = vmul.f32 %v8100_v1, %v8099_v29  ;;  %vm2668_vm7 = vcmp.eq.f32.partialorder %v6541_v44, 0.0 }
 0x2e1   : > { %v4314_v48 = vpop.eup %4313  ;;  %v2732_v22 = vmax.f32 %v2614_v15, 1e-12  ;;  %v2604_v5 = vsel %vm2603_vm8, %v8082_v19, %v2602_v14  ;;  %v2623_v27 = vmul.f32 %v4312_v41, %v6495_v52  ;;  %v3828_v54 = vpack.c.bf16 %v2805_v3, %v2797_v60  ;;  %3797 = vmatprep.subr.bf16.mxu1 %v3796_v43 }
 0x2e2   : > { %v4316_v62 = vpop.eup %4315  ;;  %v2607_v63 = vsel %vm2605_vm9, %v2606_v0, %v2604_v5  ;;  %v2618_v1 = vsel %vm2617_vm10, %v8085_v26, %v2616_v34  ;;  %v2637_v45 = vmul.f32 %v4314_v48, %v8091_v37  ;;  %v2799_v31 = vmul.f32 %v6632_v33, %v8101_v55 }
 0x2e3   : > { %v4318_v14 = vpop.eup %4317  ;;  %4327 = vrcp.f32 %v2732_v22  ;;  %v2731_v47 = vmax.f32 %v2607_v63, 1e-12  ;;  %v2621_v60 = vsel %vm2619_vm11, %v2620_v13, %v2618_v1  ;;  %v2625_v19 = vsel %vm2624_vm12, %v6495_v52, %v2623_v27  ;;  %3829 = vmatprep.subr.bf16.mxu0 %v3828_v54 }
 0x2e4   : > { %vm2661_vm8 = vcmp.eq.f32.partialorder %v6543_v11, 0.0  ;;  %vm2673_vm9 = vcmp.eq.f32.partialorder %v6553_v10, inf  ;;  %v4320_v0 = vpop.eup %4319  ;;  %v2733_v48 = vmax.f32 %v2621_v60, 1e-12  ;;  %v2628_v33 = vsel %vm2626_vm13, %v2627_v38, %v2625_v19  ;;  %v8105_v19 = vld [vmem:[#allocation50_spill] sm:$0xff] }
 0x2e5   : > { %v2639_v3 = vsel %vm2638_vm14, %v8091_v37, %v2637_v45  ;;  %v2630_v26 = vmul.f32 %v4316_v62, %v8092_v50  ;;  %vm2675_vm10 = vcmp.eq.f32.partialorder %v6553_v10, 0.0  ;;  %v4322_v13 = vpop.eup %4321  ;;  %4329 = vrcp.f32 %v2731_v47 }
 0x2e6   : > { %v2734_v41 = vmax.f32 %v2628_v33, 1e-12  ;;  %v2642_v15 = vsel %vm2640_vm15, %v2641_v25, %v2639_v3  ;;  %v2644_v34 = vmul.f32 %v4318_v14, %v6516_v61  ;;  %v4324_v43 = vpop.eup %4323  ;;  %4331 = vrcp.f32 %v2733_v48 }
 0x2e7   : > { %v2736_v52 = vmax.f32 %v2642_v15, 1e-12  ;;  %v2632_v38 = vsel %vm2631_vm0, %v8092_v50, %v2630_v26  ;;  %v2651_v29 = vmul.f32 %v4320_v0, %v6530_v28  ;;  %v4326_v22 = vpop.eup %4325  ;;  %v2665_v25 = vmul.f32 %v4322_v13, %v6541_v44  ;;  %v8106_v0 = vld [vmem:[#allocation148_spill] sm:$0xff] }
 0x2e8   : > { %4333 = vrcp.f32 %v2734_v41  ;;  %v2635_v5 = vsel %vm2633_vm1, %v2634_v57, %v2632_v38  ;;  %v2646_v37 = vsel %vm2645_vm2, %v6516_v61, %v2644_v34  ;;  %vm8102_vm11 = vcmp.eq.f32.partialorder %v6541_v44, inf  ;;  %v8109_v41 = vld [vmem:[#allocation23_spill] sm:$0xff]  ;;  %v8110_v34 = vld [vmem:[#allocation25_spill] sm:$0xff] }
 0x2e9   : > { %4335 = vrcp.f32 %v2736_v52  ;;  %v2735_v27 = vmax.f32 %v2635_v5, 1e-12  ;;  %v2649_v54 = vsel %vm2647_vm3, %v2648_v20, %v2646_v37  ;;  %v2653_v62 = vsel %vm2652_vm4, %v6530_v28, %v2651_v29  ;;  %v8111_v52 = vld [vmem:[#allocation54_spill] sm:$0xff]  ;;  %v8112_v5 = vld [vmem:[#allocation59_spill] sm:$0xff]  ;;  %v8113_v37 = vld [vmem:[#allocation24_spill] sm:$0xff] }
 0x2ea   : > { %v2737_v63 = vmax.f32 %v2649_v54, 1e-12  ;;  %v2656_v50 = vsel %vm2654_vm5, %v2655_v35, %v2653_v62  ;;  %v2667_v57 = vsel %vm8102_vm11, %v6541_v44, %v2665_v25  ;;  %v2658_v1 = vmul.f32 %v4324_v43, %v6543_v11  ;;  %v8114_v54 = vld [vmem:[#allocation26_spill] sm:$0xff]  ;;  %v8115_v62 = vld [vmem:[#allocation56_spill] sm:$0xff] }
 0x2eb   : > { %4337 = vrcp.f32 %v2735_v27  ;;  %v2738_v45 = vmax.f32 %v2656_v50, 1e-12  ;;  %v8103_v61 = vand.u32 2147483648, %v6541_v44  ;;  %v2672_v55 = vmul.f32 %v4326_v22, %v6553_v10  ;;  %v8116_v50 = vld [vmem:[#allocation60_spill] sm:$0xff] }
 0x2ec   : > { %4339 = vrcp.f32 %v2737_v63  ;;  %v2660_v28 = vsel %vm2659_vm6, %v6543_v11, %v2658_v1  ;;  %v3798_v35 = vpack.c.bf16 %v2799_v31, %v6997_v6  ;;  %v8104_v47 = vand.u32 2147483648, %v6543_v11  ;;  %v8108_v31 = vld [vmem:[#allocation53_spill] sm:$0xff]  ;;  %v8117_v1 = vld [vmem:[#allocation27_spill] sm:$0xff] }
 0x2ed   : > { %v2670_v20 = vsel %vm2668_vm7, %v8103_v61, %v2667_v57  ;;  %4341 = vrcp.f32 %v2738_v45  ;;  %v2674_v44 = vsel %vm2673_vm9, %v6553_v10, %v2672_v55  ;;  %v2795_v48 = vmul.f32 %v8106_v0, %v8105_v19  ;;  %v4328_v33 = vpop.eup %4327  ;;  %v8118_v45 = vld [vmem:[#allocation30_spill] sm:$0xff]  ;;  %v8119_v55 = vld [vmem:[#allocation61_spill] sm:$0xff] }
 0x2ee   : > { %v2740_v14 = vmax.f32 %v2670_v20, 1e-12  ;;  %v2663_v60 = vsel %vm2661_vm8, %v8104_v47, %v2660_v28  ;;  %v8107_v26 = vand.u32 2147483648, %v6553_v10  ;;  %3799 = vmatpush1.bf16.xpose.msra.mxu1 %v3798_v35  ;;  %v2803_v11 = vmul.f32 %v6731_v58, %v8108_v31  ;;  %v8121_v28 = vld [vmem:[#allocation29_spill] sm:$0xff]  ;;  %v8127_v31 = vld [vmem:[#allocation91_spill] sm:$0xff] }
 0x2ef   : > { %v2739_v3 = vmax.f32 %v2663_v60, 1e-12  ;;  %v2809_v15 = vmul.f32 %v6749_v7, %v8109_v41  ;;  %v2817_v43 = vmul.f32 %v6784_v49, %v8110_v34  ;;  %v2813_v38 = vmul.f32 %v6756_v56, %v8111_v52  ;;  %v4330_v29 = vpop.eup %4329  ;;  %v8130_v34 = vld [vmem:[#allocation33_spill] sm:$0xff]  ;;  %v8131_v52 = vld [vmem:[#allocation35_spill] sm:$0xff] }
 0x2f0   : > { %4343 = vrcp.f32 %v2740_v14  ;;  %v2677_v6 = vsel %vm2675_vm10, %v8107_v26, %v2674_v44  ;;  %v3830_v22 = vpack.c.bf16 %v2803_v11, %v2795_v48  ;;  %v2821_v10 = vmul.f32 %v6794_v21, %v8112_v5  ;;  %v4332_v58 = vpop.eup %4331  ;;  %v8120_v14 = vld [vmem:[#allocation65_spill] sm:$0xff]  ;;  %v8133_v5 = vld [vmem:[#allocation70_spill] sm:$0xff] }
 0x2f1   : > { %v2741_v13 = vmax.f32 %v2677_v6, 1e-12  ;;  %4345 = vrcp.f32 %v2739_v3  ;;  %v2807_v25 = vmul.f32 %v6744_v46, %v8113_v37  ;;  %v3800_v27 = vpack.c.bf16 %v2817_v43, %v2809_v15  ;;  %v8126_v3 = vld [vmem:[#allocation34_spill] sm:$0xff]  ;;  %v8134_v37 = vld [vmem:[#allocation72_spill] sm:$0xff] }
 0x2f2   : > { %v2815_v7 = vmul.f32 %v6763_v40, %v8114_v54  ;;  %v2811_v49 = vmul.f32 %v6746_v4, %v8115_v62  ;;  %v4334_v63 = vpop.eup %4333  ;;  %3831 = vmatpush1.bf16.xpose.msra.mxu0 %v3830_v22  ;;  %v3832_v56 = vpack.c.bf16 %v2821_v10, %v2813_v38  ;;  %v2819_v57 = vmul.f32 %v6773_v24, %v8116_v50  ;;  %v8137_v54 = vld [vmem:[#allocation39_spill] sm:$0xff] }
 0x2f3   : > { %4347 = vrcp.f32 %v2741_v13  ;;  %v2825_v21 = vmul.f32 %v6899_v17, %v8117_v1  ;;  %v2833_v46 = vmul.f32 %v6916_v51, %v8118_v45  ;;  %v4336_v61 = vpop.eup %4335  ;;  %3801 = vmatprep.subr.bf16.mxu1 %v3800_v27  ;;  %v2829_v40 = vmul.f32 %v6901_v39, %v8119_v55  ;;  %v8122_v17 = vld [vmem:[#allocation31_spill] sm:$0xff]  ;;  %v8123_v51 = vld [vmem:[#allocation64_spill] sm:$0xff]  ;;  %v8124_v39 = vld [vmem:[#allocation66_spill] sm:$0xff] }
 0x2f4   : > { %v3802_v20 = vpack.c.bf16 %v2815_v7, %v2807_v25  ;;  %v2837_v4 = vmul.f32 %v6923_v30, %v8120_v14  ;;  %v7107_v35 = vmul.f32 %v6800_v36, %v8121_v28  ;;  %3833 = vmatprep.subr.bf16.mxu0 %v3832_v56  ;;  %v3834_v24 = vpack.c.bf16 %v2819_v57, %v2811_v49  ;;  %v8125_v30 = vld [vmem:[#allocation32_spill] sm:$0xff]  ;;  %v8129_v13 = vld [vmem:[#allocation71_spill] sm:$0xff]  ;;  %v8140_v57 = vld [vmem:[#allocation78_spill] sm:$0xff] }
 0x2f5   : > { %v3804_v47 = vpack.c.bf16 %v2833_v46, %v2825_v21  ;;  %v2831_v60 = vmul.f32 %v6903_v12, %v8122_v17  ;;  %v7113_v44 = vmul.f32 %v6890_v2, %v8123_v51  ;;  %v4338_v19 = vpop.eup %4337  ;;  %v7117_v48 = vmul.f32 %v6910_v16, %v8124_v39  ;;  %v8128_v12 = vld [vmem:[#allocation67_spill] sm:$0xff]  ;;  %v8139_v56 = vld [vmem:[#allocation76_spill] sm:$0xff]  ;;  %v8143_v55 = vld [vmem:[#allocation38_spill] sm:$0xff] }
 0x2f6   : > { %v3836_v0 = vpack.c.bf16 %v2837_v4, %v2829_v40  ;;  %v2841_v36 = vmul.f32 %v6948_v42, %v8125_v30  ;;  %v2849_v26 = vmul.f32 %v4330_v29, %v8126_v3  ;;  %v4340_v6 = vpop.eup %4339  ;;  %vm1167_vm12 = vcmp.eq.f32.partialorder %v8088_v59, inf  ;;  %3803 = vmatpush1.bf16.xpose.msra.mxu1 %v3802_v20  ;;  %v8132_v29 = vld [vmem:[#allocation92_spill] sm:$0xff]  ;;  %v8145_v28 = vld [vmem:[#allocation73_spill] sm:$0xff] }
 0x2f7   : > { %4349 = vrsqrt.f32 %v8127_v31  ;;  %v3806_v2 = vpack.c.bf16 %v2831_v60, %v7107_v35  ;;  %v7127_v11 = vmul.f32 %v6954_v53, %v8128_v12  ;;  %v7130_v16 = vmul.f32 %v4332_v58, %v8129_v13  ;;  %v4342_v41 = vpop.eup %4341  ;;  %3805 = vmatprep.subr.bf16.mxu1 %v3804_v47  ;;  %v8136_v58 = vld [vmem:[#allocation37_spill] sm:$0xff]  ;;  %v8141_v21 = vld [vmem:[#allocation124_spill] sm:$0xff]  ;;  %v8152_v12 = vld [vmem:[#allocation130_spill] sm:$0xff] }
 0x2f8   : > { %vm1181_vm13 = vcmp.eq.f32.partialorder %v8089_v23, inf  ;;  %v3838_v42 = vpack.c.bf16 %v7117_v48, %v7113_v44  ;;  %v3808_v15 = vpack.c.bf16 %v2849_v26, %v2841_v36  ;;  %v7137_v43 = vmul.f32 %v6936_v32, %v8130_v34  ;;  %v8135_v32 = vld [vmem:[#allocation93_spill] sm:$0xff]  ;;  %v8142_v46 = vld [vmem:[#allocation36_spill] sm:$0xff]  ;;  %v8153_v34 = vld [vmem:[#allocation90_spill] sm:$0xff] }
 0x2f9   : > { %v7141_v38 = vmul.f32 %v6965_v8, %v8131_v52  ;;  %4351 = vrsqrt.f32 %v8132_v29  ;;  %v3840_v22 = vpack.c.bf16 %v7130_v16, %v7127_v11  ;;  %v7148_v10 = vmul.f32 %v6942_v9, %v8133_v5  ;;  %v8147_v60 = vld [vmem:[#allocation88_spill] sm:$0xff]  ;;  %v8149_v39 = vld [vmem:[#allocation129_spill] sm:$0xff]  ;;  %v8163_v11 = vld [vmem:[#allocation98_spill] sm:$0xff] }
 0x2fa   : > { %v4344_v53 = vpop.eup %4343  ;;  %v7151_v25 = vmul.f32 %v4328_v33, %v8134_v37  ;;  %vm1169_vm14 = vcmp.eq.f32.partialorder %v8088_v59, 0.0  ;;  %vm1188_vm15 = vcmp.eq.f32.partialorder %v8090_v18, inf  ;;  %4353 = vrsqrt.f32 %v8135_v32  ;;  %v8138_v33 = vld [vmem:[#allocation86_spill] sm:$0xff]  ;;  %3835 = vmatpush1.bf16.xpose.msra.mxu0 %v3834_v24  ;;  %v8146_v24 = vld [vmem:[#allocation77_spill] sm:$0xff]  ;;  %v8151_v3 = vld [vmem:[#allocation96_spill] sm:$0xff] }
 0x2fb   : > { %v3810_v8 = vpack.c.bf16 %v7141_v38, %v7137_v43  ;;  %v7159_v27 = vmul.f32 %v4334_v63, %v8136_v58  ;;  %v7162_v7 = vmul.f32 %v4342_v41, %v8137_v54  ;;  %v4346_v9 = vpop.eup %4345  ;;  %vm1183_vm0 = vcmp.eq.f32.partialorder %v8089_v23, 0.0  ;;  %3837 = vmatprep.subr.bf16.mxu0 %v3836_v0  ;;  %v8150_v36 = vld [vmem:[#allocation89_spill] sm:$0xff]  ;;  %v8161_v48 = vld [vmem:[#allocation100_spill] sm:$0xff] }
 0x2fc   : > { %vm1202_vm1 = vcmp.eq.f32.partialorder %v8138_v33, inf  ;;  %v1205_v62 = vand.u32 2147483648, %v8138_v33  ;;  %v3842_v49 = vpack.c.bf16 %v7151_v25, %v7148_v10  ;;  %v7170_v50 = vmul.f32 %v4336_v61, %v8139_v56  ;;  %v8144_v61 = vld [vmem:[#allocation127_spill] sm:$0xff] }
 0x2fd   : > { %v7173_v63 = vmul.f32 %v4344_v53, %v8140_v57  ;;  %v4348_v1 = vpop.eup %4347  ;;  %v1166_v45 = vmul.f32 %v8141_v21, %v8088_v59  ;;  %v7178_v20 = vmul.f32 %v4338_v19, %v8142_v46  ;;  %v7181_v40 = vmul.f32 %v4346_v9, %v8143_v55  ;;  %v8148_v19 = vld [vmem:[#allocation94_spill] sm:$0xff]  ;;  %v8154_v53 = vld [vmem:[#allocation131_spill] sm:$0xff] }
 0x2fe   : > { %v3814_v14 = vpack.c.bf16 %v7162_v7, %v7159_v27  ;;  %v1180_v4 = vmul.f32 %v8144_v61, %v8089_v23  ;;  %vm1190_vm2 = vcmp.eq.f32.partialorder %v8090_v18, 0.0  ;;  %v7189_v35 = vmul.f32 %v4340_v6, %v8145_v28  ;;  %3807 = vmatpush1.bf16.xpose.msra.mxu1 %v3806_v2 }
 0x2ff   : > { %v7192_v47 = vmul.f32 %v4348_v1, %v8146_v24  ;;  %v3846_v17 = vpack.c.bf16 %v7173_v63, %v7170_v50  ;;  %vm1204_vm3 = vcmp.eq.f32.partialorder %v8138_v33, 0.0  ;;  %vm1195_vm4 = vcmp.eq.f32.partialorder %v8147_v60, inf  ;;  %3809 = vmatprep.subr.bf16.mxu1 %v3808_v15  ;;  %v8156_v1 = vld [vmem:[#allocation132_spill] sm:$0xff]  ;;  %v8169_v63 = vld [vmem:[#allocation106_spill] sm:$0xff] }
 0x300   : > { %v1198_v51 = vand.u32 2147483648, %v8147_v60  ;;  %4355 = vrsqrt.f32 %v8148_v19  ;;  %v3812_v0 = vpack.c.bf16 %v7181_v40, %v7178_v20  ;;  %v1187_v30 = vmul.f32 %v8149_v39, %v8090_v18  ;;  %v8159_v40 = vld [vmem:[#allocation133_spill] sm:$0xff]  ;;  %v8168_v50 = vld [vmem:[#allocation52_spill] sm:$0xff] }
 0x301   : > { %vm1197_vm5 = vcmp.eq.f32.partialorder %v8147_v60, 0.0  ;;  %vm1209_vm6 = vcmp.eq.f32.partialorder %v8150_v36, inf  ;;  %4357 = vrsqrt.f32 %v8151_v3  ;;  %v3844_v26 = vpack.c.bf16 %v7192_v47, %v7189_v35  ;;  %v4350_v52 = vpop.eup %4349 }
 0x302   : > { %v1168_v6 = vsel %vm1167_vm12, %v8088_v59, %v1166_v45  ;;  %v1201_v13 = vmul.f32 %v8152_v12, %v8138_v33  ;;  %v1212_v41 = vand.u32 2147483648, %v8150_v36  ;;  %vm1216_vm7 = vcmp.eq.f32.partialorder %v8153_v34, inf  ;;  %v8157_v45 = vld [vmem:[#allocation97_spill] sm:$0xff]  ;;  %3839 = vmatpush1.bf16.xpose.msra.mxu0 %v3838_v42 }
 0x303   : > { %v1182_v2 = vsel %vm1181_vm13, %v8089_v23, %v1180_v4  ;;  %v1194_v5 = vmul.f32 %v8154_v53, %v8147_v60  ;;  %vm1211_vm8 = vcmp.eq.f32.partialorder %v8150_v36, 0.0  ;;  %v1219_v37 = vand.u32 2147483648, %v8153_v34  ;;  %v4352_v54 = vpop.eup %4351  ;;  %v8160_v4 = vld [vmem:[#allocation95_spill] sm:$0xff]  ;;  %3841 = vmatprep.subr.bf16.mxu0 %v3840_v22 }
 0x304   : > { %vm1230_vm9 = vcmp.eq.f32.partialorder %v8127_v31, inf  ;;  %vm1218_vm10 = vcmp.eq.f32.partialorder %v8153_v34, 0.0  ;;  %v1233_v58 = vand.u32 2147483648, %v8127_v31  ;;  %vm1223_vm11 = vcmp.eq.f32.partialorder %v8132_v29, inf  ;;  %v4354_v46 = vpop.eup %4353 }
 0x305   : > { %v1226_v15 = vand.u32 2147483648, %v8132_v29  ;;  %vm1237_vm12 = vcmp.eq.f32.partialorder %v8135_v32, inf  ;;  %v8155_v9 = vand.u32 2147483648, %v8088_v59  ;;  %v1189_v57 = vsel %vm1188_vm15, %v8090_v18, %v1187_v30 }
 0x306   : > { %v1208_v21 = vmul.f32 %v8156_v1, %v8150_v36  ;;  %vm1232_vm13 = vcmp.eq.f32.partialorder %v8127_v31, 0.0  ;;  %4359 = vrsqrt.f32 %v8157_v45  ;;  %v8158_v20 = vand.u32 2147483648, %v8089_v23  ;;  %3811 = vmatpush1.bf16.xpose.msra.mxu1 %v3810_v8  ;;  %v8164_v8 = vld [vmem:[#allocation101_spill] sm:$0xff] }
 0x307   : > { %v1171_v56 = vsel %vm1169_vm14, %v8155_v9, %v1168_v6  ;;  %v1203_v55 = vsel %vm1202_vm1, %v8138_v33, %v1201_v13  ;;  %v1215_v61 = vmul.f32 %v8159_v40, %v8153_v34  ;;  %vm1225_vm14 = vcmp.eq.f32.partialorder %v8132_v29, 0.0  ;;  %3813 = vmatprep.subr.bf16.mxu1 %v3812_v0  ;;  %v8165_v9 = vld [vmem:[#allocation99_spill] sm:$0xff] }
 0x308   : > { %v1185_v59 = vsel %vm1183_vm0, %v8158_v20, %v1182_v2  ;;  %4361 = vrsqrt.f32 %v8160_v4  ;;  %v1196_v23 = vsel %vm1195_vm4, %v8147_v60, %v1194_v5  ;;  %v1229_v44 = vmul.f32 %v4350_v52, %v8127_v31 }
 0x309   : > { %vm1239_vm15 = vcmp.eq.f32.partialorder %v8135_v32, 0.0  ;;  %4363 = vrsqrt.f32 %v8161_v48  ;;  %v1311_v42 = vmax.f32 %v1171_v56, 1e-12  ;;  %v8162_v28 = vand.u32 2147483648, %v8090_v18 }
 0x30a   : > { %v1222_v39 = vmul.f32 %v4352_v54, %v8132_v29  ;;  %4365 = vrsqrt.f32 %v8163_v11  ;;  %v1313_v16 = vmax.f32 %v1185_v59, 1e-12  ;;  %v1206_v22 = vsel %vm1204_vm3, %v1205_v62, %v1203_v55  ;;  %v4356_v18 = vpop.eup %4355  ;;  %3843 = vmatpush1.bf16.xpose.msra.mxu0 %v3842_v49 }
 0x30b   : > { %v1192_v24 = vsel %vm1190_vm2, %v8162_v28, %v1189_v57  ;;  %v1210_v30 = vsel %vm1209_vm6, %v8150_v36, %v1208_v21  ;;  %v1236_v6 = vmul.f32 %v4354_v46, %v8135_v32  ;;  %v1199_v12 = vsel %vm1197_vm5, %v1198_v51, %v1196_v23  ;;  %v4358_v62 = vpop.eup %4357  ;;  %3845 = vmatprep.subr.bf16.mxu0 %v3844_v26  ;;  %v8167_v23 = vld [vmem:[#allocation102_spill] sm:$0xff] }
 0x30c   : > { %v1217_v13 = vsel %vm1216_vm7, %v8153_v34, %v1215_v61  ;;  %v1240_v33 = vand.u32 2147483648, %v8135_v32  ;;  %vm1244_vm0 = vcmp.eq.f32.partialorder %v8148_v19, inf  ;;  %v1314_v52 = vmax.f32 %v1192_v24, 1e-12  ;;  %v8166_v61 = vld [vmem:[#allocation42_spill] sm:$0xff] }
 0x30d   : > { %v1231_v43 = vsel %vm1230_vm9, %v8127_v31, %v1229_v44  ;;  %v1247_v38 = vand.u32 2147483648, %v8148_v19  ;;  %4367 = vrsqrt.f32 %v8164_v8  ;;  %v1316_v60 = vmax.f32 %v1206_v22, 1e-12 }
 0x30e   : > { %4369 = vrcp.f32 %v1311_v42  ;;  %v1213_v51 = vsel %vm1211_vm8, %v1212_v41, %v1210_v30  ;;  %v1224_v2 = vsel %vm1223_vm11, %v8132_v29, %v1222_v39  ;;  %vm1246_vm1 = vcmp.eq.f32.partialorder %v8148_v19, 0.0  ;;  %3815 = vmatpush1.bf16.xpose.msra.mxu1 %v3814_v14 }
 0x30f   : > { %4371 = vrcp.f32 %v1313_v16  ;;  %v1315_v0 = vmax.f32 %v1199_v12, 1e-12  ;;  %v1220_v53 = vsel %vm1218_vm10, %v1219_v37, %v1217_v13  ;;  %v1238_v5 = vsel %vm1237_vm12, %v8135_v32, %v1236_v6 }
 0x310   : > { %v1234_v36 = vsel %vm1232_vm13, %v1233_v58, %v1231_v43  ;;  %v1243_v41 = vmul.f32 %v4356_v18, %v8148_v19  ;;  %vm1258_vm2 = vcmp.eq.f32.partialorder %v8160_v4, inf  ;;  %v1250_v54 = vmul.f32 %v4358_v62, %v8151_v3  ;;  %v4360_v34 = vpop.eup %4359  ;;  %v8171_v62 = vld [vmem:[#allocation103_spill] sm:$0xff] }
 0x311   : > { %4373 = vrsqrt.f32 %v8165_v9  ;;  %v1317_v37 = vmax.f32 %v1213_v51, 1e-12  ;;  %v1227_v10 = vsel %vm1225_vm14, %v1226_v15, %v1224_v2  ;;  %v1261_v31 = vand.u32 2147483648, %v8160_v4  ;;  %v8172_v43 = vld [vmem:[#allocation55_spill] sm:$0xff] }
 0x312   : > { %4375 = vrcp.f32 %v1314_v52  ;;  %v4362_v25 = vpop.eup %4361  ;;  %v1318_v49 = vmax.f32 %v1220_v53, 1e-12  ;;  %v1241_v58 = vsel %vm1239_vm15, %v1240_v33, %v1238_v5  ;;  %vm1251_vm3 = vcmp.eq.f32.partialorder %v8151_v3, inf  ;;  %3847 = vmatpush1.bf16.xpose.msra.mxu0 %v3846_v17  ;;  %v8170_v33 = vld [vmem:[#allocation108_spill] sm:$0xff]  ;;  %v8175_v53 = vld [vmem:[#allocation107_spill] sm:$0xff] }
 0x313   : > { %4377 = vrcp.f32 %v1316_v60  ;;  %v4364_v56 = vpop.eup %4363  ;;  %v1320_v35 = vmax.f32 %v1234_v36, 1e-12  ;;  %vm1253_vm4 = vcmp.eq.f32.partialorder %v8151_v3, 0.0  ;;  %v1254_v47 = vand.u32 2147483648, %v8151_v3  ;;  %v8176_v36 = vld [vmem:[#allocation57_spill] sm:$0xff] }
 0x314   : > { %4379 = vrcp.f32 %v1315_v0  ;;  %v4366_v29 = vpop.eup %4365  ;;  %v1319_v26 = vmax.f32 %v1227_v10, 1e-12  ;;  %v1245_v32 = vsel %vm1244_vm0, %v8148_v19, %v1243_v41  ;;  %v1252_v15 = vsel %vm1251_vm3, %v8151_v3, %v1250_v54  ;;  %v8174_v0 = vld [vmem:[#allocation109_spill] sm:$0xff]  ;;  %v8177_v41 = vld [vmem:[#allocation123_spill] sm:$0xff] }
 0x315   : > { %v1264_v57 = vmul.f32 %v4360_v34, %v8157_v45  ;;  %4381 = vrcp.f32 %v1317_v37  ;;  %v1321_v1 = vmax.f32 %v1241_v58, 1e-12  ;;  %v1257_v21 = vmul.f32 %v4362_v25, %v8160_v4 }
 0x316   : > { %vm1260_vm5 = vcmp.eq.f32.partialorder %v8160_v4, 0.0  ;;  %vm1265_vm6 = vcmp.eq.f32.partialorder %v8157_v45, inf  ;;  %4383 = vrcp.f32 %v1318_v49  ;;  %vm1267_vm7 = vcmp.eq.f32.partialorder %v8157_v45, 0.0 }
 0x317   : > { %v1268_v27 = vand.u32 2147483648, %v8157_v45  ;;  %v1278_v7 = vmul.f32 %v4364_v56, %v8161_v48  ;;  %v4368_v14 = vpop.eup %4367  ;;  %4385 = vrcp.f32 %v1320_v35  ;;  %v1248_v46 = vsel %vm1246_vm1, %v1247_v38, %v1245_v32  ;;  %v8173_v38 = vld [vmem:[#allocation104_spill] sm:$0xff]  ;;  %v8180_v35 = vld [vmem:[#allocation58_spill] sm:$0xff] }
 0x318   : > { %v1255_v20 = vsel %vm1253_vm4, %v1254_v47, %v1252_v15  ;;  %v1271_v59 = vmul.f32 %v4366_v29, %v8163_v11  ;;  %v4370_v55 = vpop.eup %4369  ;;  %4387 = vrcp.f32 %v1319_v26  ;;  %v1266_v40 = vsel %vm1265_vm6, %v8157_v45, %v1264_v57  ;;  %v8181_v47 = vld [vmem:[#allocation28_spill] sm:$0xff]  ;;  %v8182_v57 = vld [vmem:[#allocation111_spill] sm:$0xff] }
 0x319   : > { %vm1272_vm8 = vcmp.eq.f32.partialorder %v8163_v11, inf  ;;  %v1331_v44 = vmul.f32 %v8167_v23, %v8166_v61  ;;  %v7349_v19 = vpop.eup %4371  ;;  %4389 = vrcp.f32 %v1321_v1  ;;  %v1259_v3 = vsel %vm1258_vm2, %v8160_v4, %v1257_v21  ;;  %v8178_v4 = vld [vmem:[#allocation110_spill] sm:$0xff]  ;;  %v8183_v1 = vld [vmem:[#allocation125_spill] sm:$0xff]  ;;  %v8186_v61 = vld [vmem:[#allocation87_spill] sm:$0xff] }
 0x31a   : > { %vm1279_vm9 = vcmp.eq.f32.partialorder %v8161_v48, inf  ;;  %v1341_v17 = vmul.f32 %v8169_v63, %v8168_v50  ;;  %v1322_v28 = vmax.f32 %v1248_v46, 1e-12  ;;  %v1323_v24 = vmax.f32 %v1255_v20, 1e-12  ;;  %v8188_v50 = vld [vmem:[#allocation126_spill] sm:$0xff] }
 0x31b   : > { %v4374_v42 = vpop.eup %4373  ;;  %v1280_v39 = vsel %vm1279_vm9, %v8161_v48, %v1278_v7  ;;  %v1292_v16 = vmul.f32 %v4368_v14, %v8164_v8  ;;  %2935 = vmatmul.mubr.f32.vlgmr.msra.gmra.mrb[48].mxu1 %v1331_v44  ;;  %v1269_v30 = vsel %vm1267_vm7, %v1268_v27, %v1266_v40  ;;  %v1273_v6 = vsel %vm1272_vm8, %v8163_v11, %v1271_v59  ;;  %v8184_v27 = vld [vmem:[#allocation62_spill] sm:$0xff]  ;;  %v8185_v40 = vld [vmem:[#allocation112_spill] sm:$0xff] }
 0x31c   : > { %v7359_v22 = vpop.eup %4375  ;;  %v1275_v18 = vand.u32 2147483648, %v8163_v11  ;;  %v1282_v12 = vand.u32 2147483648, %v8161_v48  ;;  %2939 = vmatprep.mubr.f32.mxu1 %v1341_v17  ;;  %vm1281_vm10 = vcmp.eq.f32.partialorder %v8161_v48, 0.0  ;;  %vm1293_vm11 = vcmp.eq.f32.partialorder %v8164_v8, inf  ;;  %v8189_v17 = vld [vmem:[#allocation113_spill] sm:$0xff] }
 0x31d   : > { %v7366_v13 = vpop.eup %4377  ;;  %v1335_v52 = vmul.f32 %v8171_v62, %v8170_v33  ;;  %v1339_v45 = vmul.f32 %v8173_v38, %v8172_v43  ;;  %v1285_v51 = vmul.f32 %v4374_v42, %v8165_v9  ;;  %v1345_v5 = vmul.f32 %v8175_v53, %v8174_v0  ;;  %v8194_v33 = vld [vmem:[#allocation115_spill] sm:$0xff]  ;;  %v8196_v38 = vld [vmem:[#allocation116_spill] sm:$0xff]  ;;  %v8198_v0 = vld [vmem:[#allocation117_spill] sm:$0xff] }
 0x31e   : > { %v4380_v60 = vpop.eup %4379  ;;  %v1283_v2 = vsel %vm1281_vm10, %v1282_v12, %v1280_v39  ;;  %v1349_v54 = vmul.f32 %v8177_v41, %v8176_v36  ;;  %v1262_v48 = vsel %vm1260_vm5, %v1261_v31, %v1259_v3  ;;  %v1325_v34 = vmax.f32 %v1269_v30, 1e-12  ;;  %v8179_v31 = vld [vmem:[#allocation105_spill] sm:$0xff]  ;;  %v8187_v3 = vld [vmem:[#allocation63_spill] sm:$0xff]  ;;  %v8191_v39 = vld [vmem:[#allocation114_spill] sm:$0xff] }
 0x31f   : > { %vm1274_vm12 = vcmp.eq.f32.partialorder %v8163_v11, 0.0  ;;  %v1294_v37 = vsel %vm1293_vm11, %v8164_v8, %v1292_v16  ;;  %3040 = vmatmul.mubr.f32.vlgmr.msra.gmra.mrb[48].mxu0 %v1335_v52  ;;  %2940 = vmatmul.mubr.f32.gmra.mrb[50].mxu1 %v1339_v45  ;;  %v4382_v10 = vpop.eup %4381  ;;  %4391 = vrcp.f32 %v1323_v24  ;;  %vm1286_vm13 = vcmp.eq.f32.partialorder %v8165_v9, inf  ;;  %v8192_v16 = vld [vmem:[#allocation128_spill] sm:$0xff] }
 0x320   : > { %v1276_v25 = vsel %vm1274_vm12, %v1275_v18, %v1273_v6  ;;  %v1296_v49 = vand.u32 2147483648, %v8164_v8  ;;  %3044 = vmatprep.mubr.f32.mxu0 %v1345_v5  ;;  %2944 = vmatprep.mubr.f32.mxu1 %v1349_v54  ;;  %v4384_v58 = vpop.eup %4383  ;;  %v1327_v56 = vmax.f32 %v1283_v2, 1e-12  ;;  %vm1295_vm14 = vcmp.eq.f32.partialorder %v8164_v8, 0.0  ;;  %v8193_v6 = vld [vmem:[#allocation69_spill] sm:$0xff]  ;;  %v8200_v54 = vld [vmem:[#allocation118_spill] sm:$0xff] }
 0x321   : > { %v1343_v11 = vmul.f32 %v8179_v31, %v8178_v4  ;;  %v1347_v29 = vmul.f32 %v8181_v47, %v8180_v35  ;;  %v4386_v26 = vpop.eup %4385  ;;  %v1287_v32 = vsel %vm1286_vm13, %v8165_v9, %v1285_v51  ;;  %v1353_v21 = vmul.f32 %v8183_v1, %v8182_v57  ;;  %v8204_v4 = vld [vmem:[#allocation120_spill] sm:$0xff] }
 0x322   : > { %v1297_v15 = vsel %vm1295_vm14, %v1296_v49, %v1294_v37  ;;  %v1357_v7 = vmul.f32 %v4370_v55, %v8184_v27  ;;  %v4388_v14 = vpop.eup %4387  ;;  %4393 = vrcp.f32 %v1322_v28  ;;  %v1324_v46 = vmax.f32 %v1262_v48, 1e-12  ;;  %v8190_v28 = vld [vmem:[#allocation68_spill] sm:$0xff]  ;;  %v8203_v49 = vld [vmem:[#allocation83_spill] sm:$0xff] }
 0x323   : > { %v1289_v8 = vand.u32 2147483648, %v8165_v9  ;;  %3045 = vmatmul.mubr.f32.gmra.mrb[50].mxu0 %v1343_v11  ;;  %2945 = vmatmul.mubr.f32.gmra.mrb[52].mxu1 %v1347_v29  ;;  %v4390_v20 = vpop.eup %4389  ;;  %4395 = vrcp.f32 %v1325_v34  ;;  %v1326_v59 = vmax.f32 %v1276_v25, 1e-12  ;;  %vm1288_vm15 = vcmp.eq.f32.partialorder %v8165_v9, 0.0  ;;  %v8201_v34 = vld [vmem:[#allocation81_spill] sm:$0xff]  ;;  %v8202_v25 = vld [vmem:[#allocation119_spill] sm:$0xff] }
 0x324   : > { %3049 = vmatprep.mubr.f32.mxu0 %v1353_v21  ;;  %v1351_v23 = vmul.f32 %v8186_v61, %v8185_v40  ;;  %2949 = vmatprep.mubr.f32.mxu1 %v1357_v7  ;;  %4397 = vrcp.f32 %v1327_v56  ;;  %v1329_v55 = vmax.f32 %v1297_v15, 1e-12  ;;  %v1355_v63 = vmul.f32 %v8188_v50, %v8187_v3  ;;  %v8205_v11 = vld [vmem:[#allocation85_spill] sm:$0xff] }
 0x325   : > { %v1290_v44 = vsel %vm1288_vm15, %v1289_v8, %v1287_v32  ;;  %v1361_v42 = vmul.f32 %v7349_v19, %v8189_v17  ;;  %v1365_v24 = vmul.f32 %v4380_v60, %v8190_v28  ;;  %4399 = vrcp.f32 %v1324_v46  ;;  %v8195_v19 = vld [vmem:[#allocation74_spill] sm:$0xff]  ;;  %v8197_v60 = vld [vmem:[#allocation75_spill] sm:$0xff]  ;;  %v8206_v29 = vld [vmem:[#allocation121_spill] sm:$0xff] }
 0x326   : > { %4401 = vrcp.f32 %v1326_v59  ;;  %v1328_v9 = vmax.f32 %v1290_v44, 1e-12  ;;  %v1359_v30 = vmul.f32 %v8192_v16, %v8191_v39  ;;  %v1363_v18 = vmul.f32 %v7359_v22, %v8193_v6  ;;  %v8199_v22 = vld [vmem:[#allocation79_spill] sm:$0xff] }
 0x327   : > { %3050 = vmatmul.mubr.f32.gmra.mrb[52].mxu0 %v1351_v23  ;;  %2950 = vmatmul.mubr.f32.gmra.mrb[54].mxu1 %v1355_v63  ;;  %4403 = vrcp.f32 %v1329_v55  ;;  %v1369_v62 = vmul.f32 %v4382_v10, %v8194_v33  ;;  %v1373_v52 = vmul.f32 %v4388_v14, %v8195_v19  ;;  %v1367_v45 = vmul.f32 %v7366_v13, %v8196_v38 }
 0x328   : > { %3054 = vmatprep.mubr.f32.mxu0 %v1361_v42  ;;  %2954 = vmatprep.mubr.f32.mxu1 %v1365_v24  ;;  %4405 = vrcp.f32 %v1328_v9  ;;  %v1371_v51 = vmul.f32 %v4384_v58, %v8197_v60  ;;  %v1377_v53 = vmul.f32 %v4390_v20, %v8198_v0  ;;  %v1375_v48 = vmul.f32 %v4386_v26, %v8200_v54  ;;  %v8207_v26 = vld [vmem:[#allocation122_spill] sm:$0xff] }
 0x329   : > { %v4392_v12 = vpop.eup %4391 }
 0x32a   : > { %v1381_v5 = vmul.f32 %v4392_v12, %v8199_v22 }
 0x32b   : > { %3055 = vmatmul.mubr.f32.gmra.mrb[54].mxu0 %v1359_v30  ;;  %2955 = vmatmul.mubr.f32.gmra.mrb[56].mxu1 %v1363_v18 }
 0x32c   : > { %3059 = vmatprep.mubr.f32.mxu0 %v1369_v62  ;;  %2959 = vmatprep.mubr.f32.mxu1 %v1373_v52  ;;  %v4394_v43 = vpop.eup %4393 }
 0x32d   : > { %v4396_v2 = vpop.eup %4395  ;;  %v1379_v37 = vmul.f32 %v4394_v43, %v8201_v34 }
 0x32e   : > { %v4398_v36 = vpop.eup %4397  ;;  %v1385_v13 = vmul.f32 %v4396_v2, %v8202_v25 }
 0x32f   : > { %3060 = vmatmul.mubr.f32.gmra.mrb[56].mxu0 %v1367_v45  ;;  %2960 = vmatmul.mubr.f32.gmra.mrb[58].mxu1 %v1371_v51  ;;  %v4400_v41 = vpop.eup %4399  ;;  %v1389_v58 = vmul.f32 %v4398_v36, %v8203_v49 }
 0x330   : > { %3064 = vmatprep.mubr.f32.mxu0 %v1377_v53  ;;  %2964 = vmatprep.mubr.f32.mxu1 %v1381_v5  ;;  %v4402_v10 = vpop.eup %4401  ;;  %v1383_v31 = vmul.f32 %v4400_v41, %v8204_v4 }
 0x331   : > { %v4404_v56 = vpop.eup %4403  ;;  %v1387_v35 = vmul.f32 %v4402_v10, %v8205_v11 }
 0x332   : > { %v4406_v47 = vpop.eup %4405  ;;  %v1393_v32 = vmul.f32 %v4404_v56, %v8206_v29 }
 0x333   : > { %3065 = vmatmul.mubr.f32.gmra.mrb[58].mxu0 %v1375_v48  ;;  %2965 = vmatmul.mubr.f32.gmra.mrb[60].mxu1 %v1379_v37  ;;  %v1391_v15 = vmul.f32 %v4406_v47, %v8207_v26 }
 0x334   : > { %3069 = vmatprep.mubr.f32.mxu0 %v1385_v13  ;;  %2969 = vmatprep.mubr.f32.mxu1 %v1389_v58 }
 0x337   : > { %3070 = vmatmul.mubr.f32.gmra.mrb[60].mxu0 %v1383_v31  ;;  %2970 = vmatmul.mubr.f32.gmra.mrb[62].mxu1 %v1387_v35 }
 0x338   : > { %3074 = vmatprep.mubr.f32.mxu0 %v1393_v32 }
 0x33b   : > { %3075 = vmatmul.mubr.f32.gmra.mrb[62].mxu0 %v1391_v15 }
 0x3ee   : > { %v2936_v57 = vpop.f32.mrb[48].mxu1 }
 0x3ef   : > { %v2938_v1 = vpop.f32.mrb[49].mxu1 }
 0x3f2   : > { %v3041_v21 = vpop.f32.mrb[48].mxu0  ;;  %v2941_v27 = vpop.f32.mrb[50].mxu1 }
 0x3f3   : > { %v3042_v7 = vadd.f32 %v3041_v21, %v2936_v57  ;;  %v3043_v14 = vpop.f32.mrb[49].mxu0  ;;  %v2943_v46 = vpop.f32.mrb[51].mxu1 }
 0x3f5   : > { %v7424_v8 = vmul.f32 0.0625, %v3042_v7 }
 0x3f6   : > { %v3046_v20 = vpop.f32.mrb[50].mxu0  ;;  %v2946_v59 = vpop.f32.mrb[52].mxu1 }
 0x3f7   : > { %v3047_v40 = vadd.f32 %v3046_v20, %v2941_v27  ;;  %v3048_v61 = vpop.f32.mrb[51].mxu0  ;;  %v3088_v23 = vmax.f32 %v7424_v8, 0.0  ;;  %v2948_v44 = vpop.f32.mrb[53].mxu1 }
 0x3f9   : > { %v7427_v55 = vmul.f32 0.0625, %v3047_v40  ;;  %3096 = vadd.xlane.f32.xlu0 %v3088_v23 }
 0x3fa   : > { %v3051_v3 = vpop.f32.mrb[52].mxu0  ;;  %v2951_v50 = vpop.f32.mrb[54].mxu1 }
 0x3fb   : > { %v3052_v63 = vadd.f32 %v3051_v3, %v2946_v59  ;;  %v3053_v17 = vpop.f32.mrb[53].mxu0  ;;  %v3089_v42 = vmax.f32 %v7427_v55, 0.0  ;;  %v2953_v28 = vpop.f32.mrb[55].mxu1 }
 0x3fd   : > { %v7432_v24 = vmul.f32 0.0625, %v3052_v63  ;;  %3098 = vadd.xlane.f32.xlu0 %v3089_v42 }
 0x3fe   : > { %v3056_v9 = vpop.f32.mrb[54].mxu0  ;;  %v2956_v39 = vpop.f32.mrb[56].mxu1 }
 0x3ff   : > { %v3057_v16 = vadd.f32 %v3056_v9, %v2951_v50  ;;  %v3058_v30 = vpop.f32.mrb[55].mxu0  ;;  %v3090_v6 = vmax.f32 %v7432_v24, 0.0  ;;  %v2958_v18 = vpop.f32.mrb[57].mxu1 }
 0x401   : > { %v7437_v12 = vmul.f32 0.0625, %v3057_v16  ;;  %3100 = vadd.xlane.f32.xlu1 %v3090_v6 }
 0x402   : > { %v3061_v33 = vpop.f32.mrb[56].mxu0  ;;  %v2961_v62 = vpop.f32.mrb[58].mxu1 }
 0x403   : > { %v3062_v19 = vadd.f32 %v3061_v33, %v2956_v39  ;;  %v3063_v52 = vpop.f32.mrb[57].mxu0  ;;  %v3091_v43 = vmax.f32 %v7437_v12, 0.0  ;;  %v2963_v38 = vpop.f32.mrb[59].mxu1 }
 0x405   : > { %v7440_v45 = vmul.f32 0.0625, %v3062_v19  ;;  %3102 = vadd.xlane.f32.xlu1 %v3091_v43 }
 0x406   : > { %v3066_v60 = vpop.f32.mrb[58].mxu0  ;;  %v2966_v51 = vpop.f32.mrb[60].mxu1 }
 0x407   : > { %v3067_v2 = vadd.f32 %v3066_v60, %v2961_v62  ;;  %v3068_v0 = vpop.f32.mrb[59].mxu0  ;;  %v3092_v53 = vmax.f32 %v7440_v45, 0.0  ;;  %v2968_v22 = vpop.f32.mrb[61].mxu1 }
 0x409   : > { %v3085_v5 = vmul.f32 0.0625, %v3067_v2  ;;  %3104 = vadd.xlane.f32.xlu0 %v3092_v53 }
 0x40a   : > { %v3071_v36 = vpop.f32.mrb[60].mxu0  ;;  %v2971_v41 = vpop.f32.mrb[62].mxu1 }
 0x40b   : > { %v3072_v54 = vadd.f32 %v3071_v36, %v2966_v51  ;;  %v3073_v48 = vpop.f32.mrb[61].mxu0  ;;  %v3093_v34 = vmax.f32 %v3085_v5, 0.0  ;;  %v2973_v37 = vpop.f32.mrb[63].mxu1 }
 0x40d   : > { %v3086_v10 = vmul.f32 0.0625, %v3072_v54  ;;  %3106 = vadd.xlane.f32.xlu1 %v3093_v34 }
 0x40e   : > { %v3076_v25 = vpop.f32.mrb[62].mxu0 }
 0x40f   : > { %v3077_v13 = vadd.f32 %v3076_v25, %v2971_v41  ;;  %v3078_v49 = vpop.f32.mrb[63].mxu0  ;;  %v3094_v58 = vmax.f32 %v3086_v10, 0.0 }
 0x411   : > { %v3087_v56 = vmul.f32 0.0625, %v3077_v13  ;;  %3108 = vadd.xlane.f32.xlu0 %v3094_v58 }
 0x413   : > { %v3095_v4 = vmax.f32 %v3087_v56, 0.0 }
 0x415   : > { %3110 = vadd.xlane.f32.xlu1 %v3095_v4 }
 0x486   : > { %v3097_v31 = vpop.xlane.xlu0 %3096 }
 0x487   : > { %v3112_v11 = vmax.f32 %v3097_v31, 1e-12 }
 0x489   : > { %4407 = vrcp.f32 %v3112_v11 }
 0x48a   : > { %v3099_v35 = vpop.xlane.xlu0 %3098 }
 0x48b   : > { %v3113_v47 = vmax.f32 %v3099_v35, 1e-12 }
 0x48d   : > { %4409 = vrcp.f32 %v3113_v47 }
 0x48e   : > { %v3101_v29 = vpop.xlane.xlu1 %3100 }
 0x48f   : > { %v3114_v32 = vmax.f32 %v3101_v29, 1e-12 }
 0x491   : > { %4411 = vrcp.f32 %v3114_v32 }
 0x492   : > { %v3103_v26 = vpop.xlane.xlu1 %3102 }
 0x493   : > { %v4408_v15 = vpop.eup %4407  ;;  %v3115_v57 = vmax.f32 %v3103_v26, 1e-12 }
 0x494   : > { %v3121_v1 = vmul.f32 %v4408_v15, %v3088_v23 }
 0x495   : > { %4413 = vrcp.f32 %v3115_v57 }
 0x496   : > { %3136 = vst [vmem:[%s7446_s12] sm:$0xff] %v3121_v1  ;;  %v3105_v21 = vpop.xlane.xlu0 %3104 }
 0x497   : > { %v4410_v27 = vpop.eup %4409  ;;  %v3116_v7 = vmax.f32 %v3105_v21, 1e-12 }
 0x498   : > { %v3123_v14 = vmul.f32 %v4410_v27, %v3089_v42 }
 0x499   : > { %4415 = vrcp.f32 %v3116_v7 }
 0x49a   : > { %3137 = vst [vmem:[%s7446_s12 + $0x8] sm:$0xff] %v3123_v14  ;;  %v3107_v46 = vpop.xlane.xlu1 %3106 }
 0x49b   : > { %v4412_v20 = vpop.eup %4411  ;;  %v3117_v8 = vmax.f32 %v3107_v46, 1e-12 }
 0x49c   : > { %v3125_v59 = vmul.f32 %v4412_v20, %v3090_v6 }
 0x49d   : > { %4417 = vrcp.f32 %v3117_v8 }
 0x49e   : > { %3138 = vst [vmem:[%s7446_s12 + $0x10] sm:$0xff] %v3125_v59  ;;  %v3109_v40 = vpop.xlane.xlu0 %3108 }
 0x49f   : > { %v4414_v61 = vpop.eup %4413  ;;  %v3118_v23 = vmax.f32 %v3109_v40, 1e-12 }
 0x4a0   : > { %v3127_v44 = vmul.f32 %v4414_v61, %v3091_v43 }
 0x4a1   : > { %4419 = vrcp.f32 %v3118_v23 }
 0x4a2   : > { %3139 = vst [vmem:[%s7446_s12 + $0x18] sm:$0xff] %v3127_v44  ;;  %v3111_v55 = vpop.xlane.xlu1 %3110 }
 0x4a3   : > { %v4416_v3 = vpop.eup %4415  ;;  %v3119_v50 = vmax.f32 %v3111_v55, 1e-12 }
 0x4a4   : > { %v3129_v63 = vmul.f32 %v4416_v3, %v3092_v53 }
 0x4a5   : > { %4421 = vrcp.f32 %v3119_v50 }
 0x4a6   : > { %3140 = vst [vmem:[%s7446_s12 + $0x20] sm:$0xff] %v3129_v63 }
 0x4a7   : > { %v4418_v17 = vpop.eup %4417 }
 0x4a8   : > { %v3131_v42 = vmul.f32 %v4418_v17, %v3093_v34 }
 0x4aa   : > { %3141 = vst [vmem:[%s7446_s12 + $0x28] sm:$0xff] %v3131_v42 }
 0x4ab   : > { %v4420_v28 = vpop.eup %4419 }
 0x4ac   : > { %v3133_v24 = vmul.f32 %v4420_v28, %v3094_v58 }
 0x4ae   : > { %3142 = vst [vmem:[%s7446_s12 + $0x30] sm:$0xff] %v3133_v24 }
 0x4af   : > { %v4422_v9 = vpop.eup %4421 }
 0x4b0   : > { %v3135_v39 = vmul.f32 %v4422_v9, %v3095_v4 }
 0x4b2   : > { %3143 = vst [vmem:[%s7446_s12 + $0x38] sm:$0xff] %v3135_v39 }
 0x4b3   : > { %4522 = shalt.err (!%p4519_p1)
}
 0x4b4   : > { %s4523_s10 = scalar_lea.hbm %s7462_s27, 1024  ;;  %s4527_s21 = scalar_lea.hbm %s7513_s4, 2048 }
 0x4b5   : > { %p4524_p13 = scmp.ne.s32.totalorder %s7462_s27, %s4523_s10  ;;  %p4528_p4 = scmp.lt.u32.totalorder %s7462_s27, %s7513_s4 }
 0x4b6   : > { %p4529_p5 = scmp.lt.u32.totalorder %s4527_s21, %s4523_s10  ;;  %p4531_p11 = scmp.lt.u32.totalorder %s4523_s10, %s7462_s27 }
 0x4b7   : > { %p4525_p6 = pnand %p4524_p13, %p8208_p0 }
 0x4b8   : > { %p4530_p8 = por %p4529_p5, %p4528_p4 }
 0x4b9   : > { %p4526_p10 = pneg %p4525_p6 }
 0x4ba   : > { %p4532_p2 = por %p4531_p11, %p4530_p8 }
 0x4bc   : > { %p4533_p3 = pnand %p4532_p2, %p4526_p10 }
 0x4be   : > { %4536 = shalt.err (!%p4533_p3)
}
 0x4bf   : > { %s4587_s12 = smov 128   ;;  %s4588_s30 = smov 8  }
 0x4c0   : > { %3962 = dma.vmem_to_hbm [thread:$0]  (%p8208_p0), %s7464_s6, 1024, %s7462_s27, %s3145_s20, %s4587_s12, %s4587_s12, %s4588_s30  }
 0x4c1 PF: > { %s3173_s25 = sand.u32 1, %s4567_s15   ;;  %p8209_p7 = scmp.ne.s32.totalorder %s7717_s22, 0 }
 0x4c2   : > { %p8210_p9 = scmp.ge.s32.totalorder %s4579_s18, 2  ;;  %s3174_s7 = scalar_lea.sflag [#allocation4], %s3173_s25 }
 0x4c4   : > { %p3976_p12 = pnand %p8210_p9, %p8209_p7 }
 0x4c6   : > { %4562 = dma.done.wait (!%p3976_p12), %s3174_s7, 1024  }
 0x4c7   : > { %4564 = vsyncadd (!%p3976_p12), %s3174_s7, 4294966272  ;;  %p18_p1 = scmp.ge.s32.totalorder %s4730_s26, 4   ;;  %s8211_s15 = smov %s4571_s16 }
 0x4c8   : > { %s8212_s16 = smov %s4575_s17  ;;  %s8213_s17 = smov %s4746_s14 }
 0x4c9   : > { %s8214_s18 = smov %s4730_s26  ;;  %20 = sbr.rel (!%p18_p1) target bundleno = 6 (0x6), region = 89 }
 0x4d0   :  { %3179 = vsyncpa [#allocation3], 1 }
 0x4d1   :  { %3181 = vsyncpa [#allocation3 + $0x1], 1 }
 0x4d2   :  { %3182 = vsyncpa [#allocation6], 1 }
 0x4d3   :  { %3183 = vsyncpa [#allocation4], 1 }
 0x4d4   :  { %3185 = vsyncpa [#allocation4 + $0x1], 1 }

</bundles_post_ra>
